<compile_context>
chip_gen: v7x
topology: tpu7x:2x2x1
jax: 0.10.0
libtpu: 0.0.40
codegen_flags: <defaults>
</compile_context>

<pallas_src>
import jax
import jax.numpy as jnp
from jax import lax
from jax.experimental import pallas as pl
from jax.experimental.pallas import tpu as pltpu


# ---------------------------------------------------------------------------
# Kernel 1a: ConvTranspose2d(kernel=2, stride=2) -> parity planes
#   plane p = 2*di + dj holds  out[2i+di, 2j+dj, :] = x[i, j, :] @ W[:, :, di, dj] + b
# ---------------------------------------------------------------------------

def _deconv_up_kernel(x_ref, w_ref, b_ref, o_ref):
    # x: [1, H*W, Cin]   w: [4, Cin, Cout]   b: [1, Cout]   o: [1, 4, H*W, Cout]
    x = x_ref[0]
    b = b_ref[...]
    for p in range(4):                                    # 4 whole-tile matmuls, M = H*W
        y = jnp.dot(x, w_ref[p], preferred_element_type=jnp.float32) + b
        o_ref[0, p] = y.astype(o_ref.dtype)


def deconv_up(x_flat, w4, b):
    N, HW, Cin = x_flat.shape
    c_out = w4.shape[-1]
    return pl.pallas_call(
        _deconv_up_kernel,
        out_shape=jax.ShapeDtypeStruct((N, 4, HW, c_out), jnp.float32),
        grid=(N,),
        in_specs=[
            pl.BlockSpec((1, HW, Cin), lambda n: (n, 0, 0)),
            pl.BlockSpec((4, Cin, c_out), lambda n: (0, 0, 0)),
            pl.BlockSpec((1, c_out), lambda n: (0, 0)),
        ],
        out_specs=pl.BlockSpec((1, 4, HW, c_out), lambda n: (n, 0, 0, 0)),
        compiler_params=pltpu.CompilerParams(dimension_semantics=("parallel",)),
    )(x_flat, w4, b)


# ---------------------------------------------------------------------------
# Kernel 1b: bilinear 2x (align_corners=False) + 1x1 conv, fused in one kernel.
# The 1x1 conv commutes with the (linear, weight-sum-1) bilinear resize, so the
# matmul runs on the low-res map; the resize is a static 0.75/0.25 2-tap stencil
# done with VMEM shift buffers (no gathers), emitted as 4 parity planes.
# ---------------------------------------------------------------------------

def _make_bilinear_up_kernel(W, HW):
    def kernel(x_ref, w_ref, b_ref, col_ref, o_ref, sbuf):
        # x: [1, H*W, Cin]  w: [Cin, Cout]  b: [1, Cout]  col: [H*W, 1] (j index)
        # o: [1, 4, H*W, Cout]   sbuf: [H*W + W, Cout] shift scratch
        z = jnp.dot(x_ref[0], w_ref[...], preferred_element_type=jnp.float32) + b_ref[...]
        jcol = col_ref[...]

        def shift_down(v, s, fill):      # u[k] = v[k - s] for k >= s, u[:s] = fill
            sbuf[s:HW + s, :] = v
            sbuf[0:s, :] = fill
            return sbuf[0:HW, :]

        def shift_up(v, s, fill):        # u[k] = v[k + s] for k < HW - s, tail = fill
            sbuf[0:HW, :] = v
            sbuf[HW:HW + s, :] = fill
            return sbuf[s:HW + s, :]

        # row neighbours (shift by W in flat row-major), clamped at the border
        r0 = 0.75 * z + 0.25 * shift_down(z, W, z[:W])    # output rows 2i
        r1 = 0.75 * z + 0.25 * shift_up(z, W, z[-W:])     # output rows 2i + 1

        # column neighbours (shift by 1), clamped at j == 0 / j == W - 1
        def blend_left(v):
            return 0.75 * v + 0.25 * jnp.where(jcol == 0, v, shift_down(v, 1, v[:1]))

        def blend_right(v):
            return 0.75 * v + 0.25 * jnp.where(jcol == W - 1, v, shift_up(v, 1, v[-1:]))

        o_ref[0, 0] = blend_left(r0).astype(o_ref.dtype)   # (di=0, dj=0)
        o_ref[0, 1] = blend_right(r0).astype(o_ref.dtype)  # (0, 1)
        o_ref[0, 2] = blend_left(r1).astype(o_ref.dtype)   # (1, 0)
        o_ref[0, 3] = blend_right(r1).astype(o_ref.dtype)  # (1, 1)

    return kernel


def bilinear_up(x_flat, w_mat, b, H, W):
    N, HW, Cin = x_flat.shape
    c_out = w_mat.shape[-1]
    col_idx = (jnp.arange(HW, dtype=jnp.int32) % W).reshape(HW, 1)
    kernel = _make_bilinear_up_kernel(W, HW)
    return pl.pallas_call(
        kernel,
        out_shape=jax.ShapeDtypeStruct((N, 4, HW, c_out), jnp.float32),
        grid=(N,),
        in_specs=[
            pl.BlockSpec((1, HW, Cin), lambda n: (n, 0, 0)),
            pl.BlockSpec((Cin, c_out), lambda n: (0, 0)),
            pl.BlockSpec((1, c_out), lambda n: (0, 0)),
            pl.BlockSpec((HW, 1), lambda n: (0, 0)),
        ],
        out_specs=pl.BlockSpec((1, 4, HW, c_out), lambda n: (n, 0, 0, 0)),
        scratch_shapes=[pltpu.VMEM((HW + W, c_out), jnp.float32)],
        compiler_params=pltpu.CompilerParams(dimension_semantics=("parallel",)),
    )(x_flat, w_mat, b, col_idx)


# ---------------------------------------------------------------------------
# Kernel 2: fused concat + zero-pad + (conv3x3 + ReLU) x 2, per batch element.
#   - concat and 'same' padding done by writing into a padded VMEM scratch
#   - each conv is 9 whole-tile tap matmuls with M = H2*W2 (no per-row loops)
#   - conv1 intermediate never leaves VMEM
#   - conv2 accumulates transposed so the output is the lane-dense NCHW slab
# ---------------------------------------------------------------------------

def _make_fused_double_conv_kernel(H2, W2, c_up, c_skips, c_out):
    c_tot = c_up + sum(c_skips)
    n_skip = len(c_skips)
    m = H2 * W2

    def kernel(*refs):
        up_ref = refs[0]
        skip_refs = refs[1:1 + n_skip]
        w1_ref, b1_ref, w2_ref, b2_ref = refs[1 + n_skip:5 + n_skip]
        o_ref = refs[5 + n_skip]
        pad1, pad2 = refs[6 + n_skip], refs[7 + n_skip]

        # zero the halos (interior is fully overwritten below) -> in-kernel padding
        pad1[...] = jnp.zeros_like(pad1)
        pad2[...] = jnp.zeros_like(pad2)

        # fused channel concat + pad: no HBM concatenate / jnp.pad passes
        pad1[1:H2 + 1, 1:W2 + 1, 0:c_up] = up_ref[0]
        off = c_up
        for k in range(n_skip):
            pad1[1:H2 + 1, 1:W2 + 1, off:off + c_skips[k]] = skip_refs[k][0]
            off += c_skips[k]

        # conv1 (3x3, pad 1) + ReLU : 9 tap matmuls over the whole tile
        acc = jnp.zeros((m, c_out), jnp.float32)
        for dy in range(3):
            for dx in range(3):
                patch = pad1[dy:dy + H2, dx:dx + W2, :].reshape(m, c_tot)
                acc = acc + jnp.dot(patch, w1_ref[dy * 3 + dx],
                                    preferred_element_type=jnp.float32)
        h1 = jnp.maximum(acc + b1_ref[...], 0.0)
        pad2[1:H2 + 1, 1:W2 + 1, :] = h1.reshape(H2, W2, c_out)   # stays in VMEM

        # conv2 (3x3, pad 1) + ReLU, accumulated as [Cout, H2*W2] (NCHW, lane-dense)
        acc2 = jnp.zeros((c_out, m), jnp.float32)
        for dy in range(3):
            for dx in range(3):
                patch = pad2[dy:dy + H2, dx:dx + W2, :].reshape(m, c_out)
                acc2 = acc2 + lax.dot_general(
                    w2_ref[dy * 3 + dx], patch,
                    dimension_numbers=(((1,), (1,)), ((), ())),
                    preferred_element_type=jnp.float32)
        o_ref[0] = jnp.maximum(acc2 + b2_ref[...], 0.0).astype(o_ref.dtype)

    return kernel


def fused_double_conv(up_nhwc, skips_nhwc, w1, b1, w2t, b2):
    N, H2, W2, c_up = up_nhwc.shape
    c_skips = tuple(int(s.shape[-1]) for s in skips_nhwc)
    c_tot = c_up + sum(c_skips)
    c_out = w1.shape[-1]
    assert w1.shape == (9, c_tot, c_out)

    kernel = _make_fused_double_conv_kernel(H2, W2, c_up, c_skips, c_out)
    in_specs = [pl.BlockSpec((1, H2, W2, c_up), lambda n: (n, 0, 0, 0))]
    for cs in c_skips:
        in_specs.append(pl.BlockSpec((1, H2, W2, cs), lambda n: (n, 0, 0, 0)))
    in_specs += [
        pl.BlockSpec((9, c_tot, c_out), lambda n: (0, 0, 0)),
        pl.BlockSpec((1, c_out), lambda n: (0, 0)),
        pl.BlockSpec((9, c_out, c_out), lambda n: (0, 0, 0)),
        pl.BlockSpec((c_out, 1), lambda n: (0, 0)),
    ]

    flops = 2 * N * 9 * H2 * W2 * c_out * (c_tot + c_out)
    bytes_accessed = 4 * N * H2 * W2 * (c_tot + 2 * c_out)
    return pl.pallas_call(
        kernel,
        out_shape=jax.ShapeDtypeStruct((N, c_out, H2 * W2), jnp.float32),
        grid=(N,),
        in_specs=in_specs,
        out_specs=pl.BlockSpec((1, c_out, H2 * W2), lambda n: (n, 0, 0)),
        scratch_shapes=[
            pltpu.VMEM((H2 + 2, W2 + 2, c_tot), jnp.float32),
            pltpu.VMEM((H2 + 2, W2 + 2, c_out), jnp.float32),
        ],
        compiler_params=pltpu.CompilerParams(dimension_semantics=("parallel",)),
        cost_estimate=pl.CostEstimate(flops=flops, transcendentals=0,
                                      bytes_accessed=bytes_accessed),
    )(up_nhwc, *skips_nhwc, w1, b1, w2t, b2)


# ---------------------------------------------------------------------------
# UnetUp module (forward semantics of the PyTorch reference, use_bn=False)
# ---------------------------------------------------------------------------

class UnetUp:
    def __init__(self, in_channels, out_channels, use_deconv, n_concat=2, key=None):
        self.use_deconv = use_deconv
        self.out_channels = out_channels
        key = jax.random.PRNGKey(0) if key is None else key
        ks = jax.random.split(key, 6)
        conv_in = in_channels + (n_concat - 2) * out_channels
        s = 0.1
        if use_deconv:
            # PyTorch ConvTranspose2d(in, out, k=2, s=2): weight [Cin, Cout, 2, 2]
            up_w = s * jax.random.normal(ks[0], (in_channels, out_channels, 2, 2), jnp.float32)
            # -> [parity p = 2*di + dj, Cin, Cout]
            self.up_w_k = jnp.transpose(up_w, (2, 3, 0, 1)).reshape(4, in_channels, out_channels)
        else:
            # PyTorch Conv2d(in, out, 1): weight [Cout, Cin, 1, 1]
            up_w = s * jax.random.normal(ks[0], (out_channels, in_channels, 1, 1), jnp.float32)
            self.up_w_k = up_w.reshape(out_channels, in_channels).T          # [Cin, Cout]
        up_b = s * jax.random.normal(ks[1], (out_channels,), jnp.float32)
        self.up_b_k = up_b.reshape(1, out_channels)

        # UnetConv2d(conv_in, out, use_bn=False): two (Conv3x3 + ReLU) layers
        c1_w = s * jax.random.normal(ks[2], (out_channels, conv_in, 3, 3), jnp.float32)
        c1_b = s * jax.random.normal(ks[3], (out_channels,), jnp.float32)
        c2_w = s * jax.random.normal(ks[4], (out_channels, out_channels, 3, 3), jnp.float32)
        c2_b = s * jax.random.normal(ks[5], (out_channels,), jnp.float32)
        # tap-major layouts for the fused kernel (tap = dy*3 + dx)
        self.c1_w_k = jnp.transpose(c1_w, (2, 3, 1, 0)).reshape(9, conv_in, out_channels)
        self.c1_b_k = c1_b.reshape(1, out_channels)
        self.c2_w_k = jnp.transpose(c2_w, (2, 3, 0, 1)).reshape(9, out_channels, out_channels)
        self.c2_b_k = c2_b.reshape(out_channels, 1)

        self._fwd = jax.jit(self._forward)     # fuse the thin NCHW<->NHWC glue

    def _forward(self, high_feature, *low_features):
        N, c_in, H, W = high_feature.shape
        c_out = self.out_channels
        hf = jnp.transpose(high_feature, (0, 2, 3, 1)).reshape(N, H * W, c_in)
        if self.use_deconv:
            up4 = deconv_up(hf, self.up_w_k, self.up_b_k)
        else:
            up4 = bilinear_up(hf, self.up_w_k, self.up_b_k, H, W)
        # parity planes -> dense NHWC upsampled map (single XLA pass over the
        # smallest tensor in the block).
        # TODO(synk): fold this interleave into the up-kernel's store pattern
        # (strided VMEM stores) to remove this remaining XLA transpose.
        up = up4.reshape(N, 2, 2, H, W, c_out)
        up = jnp.transpose(up, (0, 3, 1, 4, 2, 5)).reshape(N, 2 * H, 2 * W, c_out)
        skips = [jnp.transpose(f, (0, 2, 3, 1)) for f in low_features]
        out = fused_double_conv(up, skips, self.c1_w_k, self.c1_b_k,
                                self.c2_w_k, self.c2_b_k)
        return out.reshape(N, c_out, 2 * H, 2 * W)         # already NCHW

    def __call__(self, high_feature, *low_features):
        return self._fwd(high_feature, *low_features)


if __name__ == "__main__":
    key = jax.random.PRNGKey(0)
    k_hf, k_lf, k_p1, k_p2 = jax.random.split(key, 4)

    N, Cin, Cout = 2, 8, 4
    H = W = 8                               # high feature 8x8 -> upsampled to 16x16
    high_feature = jax.random.normal(k_hf, (N, Cin, H, W), jnp.float32)
    low_feature = jax.random.normal(k_lf, (N, Cout, 2 * H, 2 * W), jnp.float32)

    up_deconv = UnetUp(Cin, Cout, use_deconv=True, n_concat=2, key=k_p1)
    up_bilinear = UnetUp(Cin, Cout, use_deconv=False, n_concat=2, key=k_p2)

    y1 = up_deconv(high_feature, low_feature)
    y2 = up_bilinear(high_feature, low_feature)
    jax.block_until_ready((y1, y2))

    assert y1.shape == (N, Cout, 2 * H, 2 * W)
    assert y2.shape == (N, Cout, 2 * H, 2 * W)
    print("KERNEL_OK")
</pallas_src>

<mosaic_0001>
module attributes {stable_mosaic.version = 11 : i64} {
  func.func @_deconv_up_kernel(%arg0: i32, %arg1: memref<1x64x8xf32, #tpu.memory_space<vmem>>, %arg2: memref<4x8x4xf32, #tpu.memory_space<vmem>>, %arg3: memref<1x4xf32, #tpu.memory_space<vmem>>, %arg4: memref<1x4x64x4xf32, #tpu.memory_space<vmem>>) attributes {dimension_semantics = [#tpu.dimension_semantics<parallel>], iteration_bounds = array<i64: 2>, scalar_prefetch = 0 : i64, scratch_operands = 0 : i64, tpu.core_type = #tpu.core_type<tc>, window_params = [{transform_indices = @transform_0, window_bounds = array<i64: 1, 64, 8>}, {pipeline_mode = #tpu.pipeline_mode<synchronous>, transform_indices = @transform_1, window_bounds = array<i64: 4, 8, 4>}, {pipeline_mode = #tpu.pipeline_mode<synchronous>, transform_indices = @transform_2, window_bounds = array<i64: 1, 4>}, {transform_indices = @transform_3, window_bounds = array<i64: 1, 4, 64, 4>}]} {
    %c0 = arith.constant 0 : index
    %c0_0 = arith.constant 0 : index
    %c0_1 = arith.constant 0 : index
    %0 = vector.load %arg1[%c0, %c0_0, %c0_1] : memref<1x64x8xf32, #tpu.memory_space<vmem>>, vector<1x64x8xf32>
    %1 = vector.shape_cast %0 : vector<1x64x8xf32> to vector<64x8xf32>
    %c0_2 = arith.constant 0 : index
    %c0_3 = arith.constant 0 : index
    %2 = vector.load %arg3[%c0_2, %c0_3] : memref<1x4xf32, #tpu.memory_space<vmem>>, vector<1x4xf32>
    %c0_4 = arith.constant 0 : index
    %c0_5 = arith.constant 0 : index
    %c0_6 = arith.constant 0 : index
    %3 = vector.load %arg2[%c0_4, %c0_5, %c0_6] : memref<4x8x4xf32, #tpu.memory_space<vmem>>, vector<1x8x4xf32>
    %4 = vector.shape_cast %3 : vector<1x8x4xf32> to vector<8x4xf32>
    %cst = arith.constant dense<0.000000e+00> : vector<64x4xf32>
    %5 = tpu.matmul %1, %4, %cst {dimension_numbers = #tpu.dot_dimension_numbers<[1], [0], [0], [1], [0, 0, 1, 1], [], []>} : vector<64x8xf32>, vector<8x4xf32>, vector<64x4xf32> -> vector<64x4xf32>
    %6 = vector.broadcast %2 : vector<1x4xf32> to vector<64x4xf32>
    %7 = arith.addf %5, %6 : vector<64x4xf32>
    %c0_7 = arith.constant 0 : index
    %c0_8 = arith.constant 0 : index
    %c0_9 = arith.constant 0 : index
    %c0_10 = arith.constant 0 : index
    %8 = vector.load %arg4[%c0_7, %c0_8, %c0_9, %c0_10] : memref<1x4x64x4xf32, #tpu.memory_space<vmem>>, vector<1x1x64x4xf32>
    %9 = vector.shape_cast %8 : vector<1x1x64x4xf32> to vector<64x4xf32>
    %10 = vector.shape_cast %7 : vector<64x4xf32> to vector<1x1x64x4xf32>
    tpu.vector_store %arg4[%c0_7, %c0_8, %c0_9, %c0_10], %10 {strides = array<i32>} : memref<1x4x64x4xf32, #tpu.memory_space<vmem>>, vector<1x1x64x4xf32>,
    %c1 = arith.constant 1 : index
    %c0_11 = arith.constant 0 : index
    %c0_12 = arith.constant 0 : index
    %11 = vector.load %arg2[%c1, %c0_11, %c0_12] : memref<4x8x4xf32, #tpu.memory_space<vmem>>, vector<1x8x4xf32>
    %12 = vector.shape_cast %11 : vector<1x8x4xf32> to vector<8x4xf32>
    %cst_13 = arith.constant dense<0.000000e+00> : vector<64x4xf32>
    %13 = tpu.matmul %1, %12, %cst_13 {dimension_numbers = #tpu.dot_dimension_numbers<[1], [0], [0], [1], [0, 0, 1, 1], [], []>} : vector<64x8xf32>, vector<8x4xf32>, vector<64x4xf32> -> vector<64x4xf32>
    %14 = vector.broadcast %2 : vector<1x4xf32> to vector<64x4xf32>
    %15 = arith.addf %13, %14 : vector<64x4xf32>
    %c0_14 = arith.constant 0 : index
    %c1_15 = arith.constant 1 : index
    %c0_16 = arith.constant 0 : index
    %c0_17 = arith.constant 0 : index
    %16 = vector.load %arg4[%c0_14, %c1_15, %c0_16, %c0_17] : memref<1x4x64x4xf32, #tpu.memory_space<vmem>>, vector<1x1x64x4xf32>
    %17 = vector.shape_cast %16 : vector<1x1x64x4xf32> to vector<64x4xf32>
    %18 = vector.shape_cast %15 : vector<64x4xf32> to vector<1x1x64x4xf32>
    tpu.vector_store %arg4[%c0_14, %c1_15, %c0_16, %c0_17], %18 {strides = array<i32>} : memref<1x4x64x4xf32, #tpu.memory_space<vmem>>, vector<1x1x64x4xf32>,
    %c2 = arith.constant 2 : index
    %c0_18 = arith.constant 0 : index
    %c0_19 = arith.constant 0 : index
    %19 = vector.load %arg2[%c2, %c0_18, %c0_19] : memref<4x8x4xf32, #tpu.memory_space<vmem>>, vector<1x8x4xf32>
    %20 = vector.shape_cast %19 : vector<1x8x4xf32> to vector<8x4xf32>
    %cst_20 = arith.constant dense<0.000000e+00> : vector<64x4xf32>
    %21 = tpu.matmul %1, %20, %cst_20 {dimension_numbers = #tpu.dot_dimension_numbers<[1], [0], [0], [1], [0, 0, 1, 1], [], []>} : vector<64x8xf32>, vector<8x4xf32>, vector<64x4xf32> -> vector<64x4xf32>
    %22 = vector.broadcast %2 : vector<1x4xf32> to vector<64x4xf32>
    %23 = arith.addf %21, %22 : vector<64x4xf32>
    %c0_21 = arith.constant 0 : index
    %c2_22 = arith.constant 2 : index
    %c0_23 = arith.constant 0 : index
    %c0_24 = arith.constant 0 : index
    %24 = vector.load %arg4[%c0_21, %c2_22, %c0_23, %c0_24] : memref<1x4x64x4xf32, #tpu.memory_space<vmem>>, vector<1x1x64x4xf32>
    %25 = vector.shape_cast %24 : vector<1x1x64x4xf32> to vector<64x4xf32>
    %26 = vector.shape_cast %23 : vector<64x4xf32> to vector<1x1x64x4xf32>
    tpu.vector_store %arg4[%c0_21, %c2_22, %c0_23, %c0_24], %26 {strides = array<i32>} : memref<1x4x64x4xf32, #tpu.memory_space<vmem>>, vector<1x1x64x4xf32>,
    %c3 = arith.constant 3 : index
    %c0_25 = arith.constant 0 : index
    %c0_26 = arith.constant 0 : index
    %27 = vector.load %arg2[%c3, %c0_25, %c0_26] : memref<4x8x4xf32, #tpu.memory_space<vmem>>, vector<1x8x4xf32>
    %28 = vector.shape_cast %27 : vector<1x8x4xf32> to vector<8x4xf32>
    %cst_27 = arith.constant dense<0.000000e+00> : vector<64x4xf32>
    %29 = tpu.matmul %1, %28, %cst_27 {dimension_numbers = #tpu.dot_dimension_numbers<[1], [0], [0], [1], [0, 0, 1, 1], [], []>} : vector<64x8xf32>, vector<8x4xf32>, vector<64x4xf32> -> vector<64x4xf32>
    %30 = vector.broadcast %2 : vector<1x4xf32> to vector<64x4xf32>
    %31 = arith.addf %29, %30 : vector<64x4xf32>
    %c0_28 = arith.constant 0 : index
    %c3_29 = arith.constant 3 : index
    %c0_30 = arith.constant 0 : index
    %c0_31 = arith.constant 0 : index
    %32 = vector.load %arg4[%c0_28, %c3_29, %c0_30, %c0_31] : memref<1x4x64x4xf32, #tpu.memory_space<vmem>>, vector<1x1x64x4xf32>
    %33 = vector.shape_cast %32 : vector<1x1x64x4xf32> to vector<64x4xf32>
    %34 = vector.shape_cast %31 : vector<64x4xf32> to vector<1x1x64x4xf32>
    tpu.vector_store %arg4[%c0_28, %c3_29, %c0_30, %c0_31], %34 {strides = array<i32>} : memref<1x4x64x4xf32, #tpu.memory_space<vmem>>, vector<1x1x64x4xf32>,
    return
  }
  func.func @transform_0(%arg0: i32) -> (i32, i32, i32) {
    %c0_i32 = arith.constant 0 : i32
    %c0_i32_0 = arith.constant 0 : i32
    %c0_i32_1 = arith.constant 0 : i32
    return %arg0, %c0_i32, %c0_i32_0 : i32, i32, i32
  }
  func.func @transform_1(%arg0: i32) -> (i32, i32, i32) {
    %c0_i32 = arith.constant 0 : i32
    %c0_i32_0 = arith.constant 0 : i32
    %c0_i32_1 = arith.constant 0 : i32
    %c0_i32_2 = arith.constant 0 : i32
    return %c0_i32, %c0_i32_0, %c0_i32_1 : i32, i32, i32
  }
  func.func @transform_2(%arg0: i32) -> (i32, i32) {
    %c0_i32 = arith.constant 0 : i32
    %c0_i32_0 = arith.constant 0 : i32
    %c0_i32_1 = arith.constant 0 : i32
    return %c0_i32, %c0_i32_0 : i32, i32
  }
  func.func @transform_3(%arg0: i32) -> (i32, i32, i32, i32) {
    %c0_i32 = arith.constant 0 : i32
    %c0_i32_0 = arith.constant 0 : i32
    %c0_i32_1 = arith.constant 0 : i32
    %c0_i32_2 = arith.constant 0 : i32
    return %arg0, %c0_i32, %c0_i32_0, %c0_i32_1 : i32, i32, i32, i32
  }
}

module attributes {stable_mosaic.version = 11 : i64} {
  func.func @kernel(%arg0: i32, %arg1: memref<1x16x16x4xf32, #tpu.memory_space<vmem>>, %arg2: memref<1x16x16x4xf32, #tpu.memory_space<vmem>>, %arg3: memref<9x8x4xf32, #tpu.memory_space<vmem>>, %arg4: memref<1x4xf32, #tpu.memory_space<vmem>>, %arg5: memref<9x4x4xf32, #tpu.memory_space<vmem>>, %arg6: memref<4x1xf32, #tpu.memory_space<vmem>>, %arg7: memref<1x4x256xf32, #tpu.memory_space<vmem>>, %arg8: memref<18x18x8xf32, #tpu.memory_space<vmem>>, %arg9: memref<18x18x4xf32, #tpu.memory_space<vmem>>) attributes {dimension_semantics = [#tpu.dimension_semantics<parallel>], iteration_bounds = array<i64: 2>, scalar_prefetch = 0 : i64, scratch_operands = 2 : i64, tpu.core_type = #tpu.core_type<tc>, window_params = [{transform_indices = @transform_0, window_bounds = array<i64: 1, 16, 16, 4>}, {transform_indices = @transform_1, window_bounds = array<i64: 1, 16, 16, 4>}, {pipeline_mode = #tpu.pipeline_mode<synchronous>, transform_indices = @transform_2, window_bounds = array<i64: 9, 8, 4>}, {pipeline_mode = #tpu.pipeline_mode<synchronous>, transform_indices = @transform_3, window_bounds = array<i64: 1, 4>}, {pipeline_mode = #tpu.pipeline_mode<synchronous>, transform_indices = @transform_4, window_bounds = array<i64: 9, 4, 4>}, {pipeline_mode = #tpu.pipeline_mode<synchronous>, transform_indices = @transform_5, window_bounds = array<i64: 4, 1>}, {transform_indices = @transform_6, window_bounds = array<i64: 1, 4, 256>}]} {
    %cst = arith.constant 0.000000e+00 : f32
    %0 = vector.broadcast %cst : f32 to vector<18x18x8xf32>
    %c0 = arith.constant 0 : index
    %c0_0 = arith.constant 0 : index
    %c0_1 = arith.constant 0 : index
    %1 = vector.load %arg8[%c0, %c0_0, %c0_1] : memref<18x18x8xf32, #tpu.memory_space<vmem>>, vector<18x18x8xf32>
    tpu.vector_store %arg8[%c0, %c0_0, %c0_1], %0 {strides = array<i32>} : memref<18x18x8xf32, #tpu.memory_space<vmem>>, vector<18x18x8xf32>,
    %cst_2 = arith.constant 0.000000e+00 : f32
    %2 = vector.broadcast %cst_2 : f32 to vector<18x18x4xf32>
    %c0_3 = arith.constant 0 : index
    %c0_4 = arith.constant 0 : index
    %c0_5 = arith.constant 0 : index
    %3 = vector.load %arg9[%c0_3, %c0_4, %c0_5] : memref<18x18x4xf32, #tpu.memory_space<vmem>>, vector<18x18x4xf32>
    tpu.vector_store %arg9[%c0_3, %c0_4, %c0_5], %2 {strides = array<i32>} : memref<18x18x4xf32, #tpu.memory_space<vmem>>, vector<18x18x4xf32>,
    %c0_6 = arith.constant 0 : index
    %c0_7 = arith.constant 0 : index
    %c0_8 = arith.constant 0 : index
    %c0_9 = arith.constant 0 : index
    %4 = vector.load %arg1[%c0_6, %c0_7, %c0_8, %c0_9] : memref<1x16x16x4xf32, #tpu.memory_space<vmem>>, vector<1x16x16x4xf32>
    %5 = vector.shape_cast %4 : vector<1x16x16x4xf32> to vector<16x16x4xf32>
    %c1 = arith.constant 1 : index
    %c1_10 = arith.constant 1 : index
    %c0_11 = arith.constant 0 : index
    %6 = vector.load %arg8[%c1, %c1_10, %c0_11] : memref<18x18x8xf32, #tpu.memory_space<vmem>>, vector<16x16x4xf32>
    tpu.vector_store %arg8[%c1, %c1_10, %c0_11], %5 {strides = array<i32>} : memref<18x18x8xf32, #tpu.memory_space<vmem>>, vector<16x16x4xf32>,
    %c0_12 = arith.constant 0 : index
    %c0_13 = arith.constant 0 : index
    %c0_14 = arith.constant 0 : index
    %c0_15 = arith.constant 0 : index
    %7 = vector.load %arg2[%c0_12, %c0_13, %c0_14, %c0_15] : memref<1x16x16x4xf32, #tpu.memory_space<vmem>>, vector<1x16x16x4xf32>
    %8 = vector.shape_cast %7 : vector<1x16x16x4xf32> to vector<16x16x4xf32>
    %c1_16 = arith.constant 1 : index
    %c1_17 = arith.constant 1 : index
    %c4 = arith.constant 4 : index
    %9 = vector.load %arg8[%c1_16, %c1_17, %c4] : memref<18x18x8xf32, #tpu.memory_space<vmem>>, vector<16x16x4xf32>
    tpu.vector_store %arg8[%c1_16, %c1_17, %c4], %8 {strides = array<i32>} : memref<18x18x8xf32, #tpu.memory_space<vmem>>, vector<16x16x4xf32>,
    %cst_18 = arith.constant 0.000000e+00 : f32
    %10 = vector.broadcast %cst_18 : f32 to vector<256x4xf32>
    %c0_19 = arith.constant 0 : index
    %c0_20 = arith.constant 0 : index
    %c0_21 = arith.constant 0 : index
    %11 = vector.load %arg8[%c0_19, %c0_20, %c0_21] : memref<18x18x8xf32, #tpu.memory_space<vmem>>, vector<16x16x8xf32>
    %12 = vector.shape_cast %11 : vector<16x16x8xf32> to vector<256x8xf32>
    %c0_22 = arith.constant 0 : index
    %c0_23 = arith.constant 0 : index
    %c0_24 = arith.constant 0 : index
    %13 = vector.load %arg3[%c0_22, %c0_23, %c0_24] : memref<9x8x4xf32, #tpu.memory_space<vmem>>, vector<1x8x4xf32>
    %14 = vector.shape_cast %13 : vector<1x8x4xf32> to vector<8x4xf32>
    %cst_25 = arith.constant dense<0.000000e+00> : vector<256x4xf32>
    %15 = tpu.matmul %12, %14, %cst_25 {dimension_numbers = #tpu.dot_dimension_numbers<[1], [0], [0], [1], [0, 0, 1, 1], [], []>} : vector<256x8xf32>, vector<8x4xf32>, vector<256x4xf32> -> vector<256x4xf32>
    %16 = arith.addf %10, %15 : vector<256x4xf32>
    %c0_26 = arith.constant 0 : index
    %c1_27 = arith.constant 1 : index
    %c0_28 = arith.constant 0 : index
    %17 = vector.load %arg8[%c0_26, %c1_27, %c0_28] : memref<18x18x8xf32, #tpu.memory_space<vmem>>, vector<16x16x8xf32>
    %18 = vector.shape_cast %17 : vector<16x16x8xf32> to vector<256x8xf32>
    %c1_29 = arith.constant 1 : index
    %c0_30 = arith.constant 0 : index
    %c0_31 = arith.constant 0 : index
    %19 = vector.load %arg3[%c1_29, %c0_30, %c0_31] : memref<9x8x4xf32, #tpu.memory_space<vmem>>, vector<1x8x4xf32>
    %20 = vector.shape_cast %19 : vector<1x8x4xf32> to vector<8x4xf32>
    %cst_32 = arith.constant dense<0.000000e+00> : vector<256x4xf32>
    %21 = tpu.matmul %18, %20, %cst_32 {dimension_numbers = #tpu.dot_dimension_numbers<[1], [0], [0], [1], [0, 0, 1, 1], [], []>} : vector<256x8xf32>, vector<8x4xf32>, vector<256x4xf32> -> vector<256x4xf32>
    %22 = arith.addf %16, %21 : vector<256x4xf32>
    %c0_33 = arith.constant 0 : index
    %c2 = arith.constant 2 : index
    %c0_34 = arith.constant 0 : index
    %23 = vector.load %arg8[%c0_33, %c2, %c0_34] : memref<18x18x8xf32, #tpu.memory_space<vmem>>, vector<16x16x8xf32>
    %24 = vector.shape_cast %23 : vector<16x16x8xf32> to vector<256x8xf32>
    %c2_35 = arith.constant 2 : index
    %c0_36 = arith.constant 0 : index
    %c0_37 = arith.constant 0 : index
    %25 = vector.load %arg3[%c2_35, %c0_36, %c0_37] : memref<9x8x4xf32, #tpu.memory_space<vmem>>, vector<1x8x4xf32>
    %26 = vector.shape_cast %25 : vector<1x8x4xf32> to vector<8x4xf32>
    %cst_38 = arith.constant dense<0.000000e+00> : vector<256x4xf32>
    %27 = tpu.matmul %24, %26, %cst_38 {dimension_numbers = #tpu.dot_dimension_numbers<[1], [0], [0], [1], [0, 0, 1, 1], [], []>} : vector<256x8xf32>, vector<8x4xf32>, vector<256x4xf32> -> vector<256x4xf32>
    %28 = arith.addf %22, %27 : vector<256x4xf32>
    %c1_39 = arith.constant 1 : index
    %c0_40 = arith.constant 0 : index
    %c0_41 = arith.constant 0 : index
    %29 = vector.load %arg8[%c1_39, %c0_40, %c0_41] : memref<18x18x8xf32, #tpu.memory_space<vmem>>, vector<16x16x8xf32>
    %30 = vector.shape_cast %29 : vector<16x16x8xf32> to vector<256x8xf32>
    %c3 = arith.constant 3 : index
    %c0_42 = arith.constant 0 : index
    %c0_43 = arith.constant 0 : index
    %31 = vector.load %arg3[%c3, %c0_42, %c0_43] : memref<9x8x4xf32, #tpu.memory_space<vmem>>, vector<1x8x4xf32>
    %32 = vector.shape_cast %31 : vector<1x8x4xf32> to vector<8x4xf32>
    %cst_44 = arith.constant dense<0.000000e+00> : vector<256x4xf32>
    %33 = tpu.matmul %30, %32, %cst_44 {dimension_numbers = #tpu.dot_dimension_numbers<[1], [0], [0], [1], [0, 0, 1, 1], [], []>} : vector<256x8xf32>, vector<8x4xf32>, vector<256x4xf32> -> vector<256x4xf32>
    %34 = arith.addf %28, %33 : vector<256x4xf32>
    %c1_45 = arith.constant 1 : index
    %c1_46 = arith.constant 1 : index
    %c0_47 = arith.constant 0 : index
    %35 = vector.load %arg8[%c1_45, %c1_46, %c0_47] : memref<18x18x8xf32, #tpu.memory_space<vmem>>, vector<16x16x8xf32>
    %36 = vector.shape_cast %35 : vector<16x16x8xf32> to vector<256x8xf32>
    %c4_48 = arith.constant 4 : index
    %c0_49 = arith.constant 0 : index
    %c0_50 = arith.constant 0 : index
    %37 = vector.load %arg3[%c4_48, %c0_49, %c0_50] : memref<9x8x4xf32, #tpu.memory_space<vmem>>, vector<1x8x4xf32>
    %38 = vector.shape_cast %37 : vector<1x8x4xf32> to vector<8x4xf32>
    %cst_51 = arith.constant dense<0.000000e+00> : vector<256x4xf32>
    %39 = tpu.matmul %36, %38, %cst_51 {dimension_numbers = #tpu.dot_dimension_numbers<[1], [0], [0], [1], [0, 0, 1, 1], [], []>} : vector<256x8xf32>, vector<8x4xf32>, vector<256x4xf32> -> vector<256x4xf32>
    %40 = arith.addf %34, %39 : vector<256x4xf32>
    %c1_52 = arith.constant 1 : index
    %c2_53 = arith.constant 2 : index
    %c0_54 = arith.constant 0 : index
    %41 = vector.load %arg8[%c1_52, %c2_53, %c0_54] : memref<18x18x8xf32, #tpu.memory_space<vmem>>, vector<16x16x8xf32>
    %42 = vector.shape_cast %41 : vector<16x16x8xf32> to vector<256x8xf32>
    %c5 = arith.constant 5 : index
    %c0_55 = arith.constant 0 : index
    %c0_56 = arith.constant 0 : index
    %43 = vector.load %arg3[%c5, %c0_55, %c0_56] : memref<9x8x4xf32, #tpu.memory_space<vmem>>, vector<1x8x4xf32>
    %44 = vector.shape_cast %43 : vector<1x8x4xf32> to vector<8x4xf32>
    %cst_57 = arith.constant dense<0.000000e+00> : vector<256x4xf32>
    %45 = tpu.matmul %42, %44, %cst_57 {dimension_numbers = #tpu.dot_dimension_numbers<[1], [0], [0], [1], [0, 0, 1, 1], [], []>} : vector<256x8xf32>, vector<8x4xf32>, vector<256x4xf32> -> vector<256x4xf32>
    %46 = arith.addf %40, %45 : vector<256x4xf32>
    %c2_58 = arith.constant 2 : index
    %c0_59 = arith.constant 0 : index
    %c0_60 = arith.constant 0 : index
    %47 = vector.load %arg8[%c2_58, %c0_59, %c0_60] : memref<18x18x8xf32, #tpu.memory_space<vmem>>, vector<16x16x8xf32>
    %48 = vector.shape_cast %47 : vector<16x16x8xf32> to vector<256x8xf32>
    %c6 = arith.constant 6 : index
    %c0_61 = arith.constant 0 : index
    %c0_62 = arith.constant 0 : index
    %49 = vector.load %arg3[%c6, %c0_61, %c0_62] : memref<9x8x4xf32, #tpu.memory_space<vmem>>, vector<1x8x4xf32>
    %50 = vector.shape_cast %49 : vector<1x8x4xf32> to vector<8x4xf32>
    %cst_63 = arith.constant dense<0.000000e+00> : vector<256x4xf32>
    %51 = tpu.matmul %48, %50, %cst_63 {dimension_numbers = #tpu.dot_dimension_numbers<[1], [0], [0], [1], [0, 0, 1, 1], [], []>} : vector<256x8xf32>, vector<8x4xf32>, vector<256x4xf32> -> vector<256x4xf32>
    %52 = arith.addf %46, %51 : vector<256x4xf32>
    %c2_64 = arith.constant 2 : index
    %c1_65 = arith.constant 1 : index
    %c0_66 = arith.constant 0 : index
    %53 = vector.load %arg8[%c2_64, %c1_65, %c0_66] : memref<18x18x8xf32, #tpu.memory_space<vmem>>, vector<16x16x8xf32>
    %54 = vector.shape_cast %53 : vector<16x16x8xf32> to vector<256x8xf32>
    %c7 = arith.constant 7 : index
    %c0_67 = arith.constant 0 : index
    %c0_68 = arith.constant 0 : index
    %55 = vector.load %arg3[%c7, %c0_67, %c0_68] : memref<9x8x4xf32, #tpu.memory_space<vmem>>, vector<1x8x4xf32>
    %56 = vector.shape_cast %55 : vector<1x8x4xf32> to vector<8x4xf32>
    %cst_69 = arith.constant dense<0.000000e+00> : vector<256x4xf32>
    %57 = tpu.matmul %54, %56, %cst_69 {dimension_numbers = #tpu.dot_dimension_numbers<[1], [0], [0], [1], [0, 0, 1, 1], [], []>} : vector<256x8xf32>, vector<8x4xf32>, vector<256x4xf32> -> vector<256x4xf32>
    %58 = arith.addf %52, %57 : vector<256x4xf32>
    %c2_70 = arith.constant 2 : index
    %c2_71 = arith.constant 2 : index
    %c0_72 = arith.constant 0 : index
    %59 = vector.load %arg8[%c2_70, %c2_71, %c0_72] : memref<18x18x8xf32, #tpu.memory_space<vmem>>, vector<16x16x8xf32>
    %60 = vector.shape_cast %59 : vector<16x16x8xf32> to vector<256x8xf32>
    %c8 = arith.constant 8 : index
    %c0_73 = arith.constant 0 : index
    %c0_74 = arith.constant 0 : index
    %61 = vector.load %arg3[%c8, %c0_73, %c0_74] : memref<9x8x4xf32, #tpu.memory_space<vmem>>, vector<1x8x4xf32>
    %62 = vector.shape_cast %61 : vector<1x8x4xf32> to vector<8x4xf32>
    %cst_75 = arith.constant dense<0.000000e+00> : vector<256x4xf32>
    %63 = tpu.matmul %60, %62, %cst_75 {dimension_numbers = #tpu.dot_dimension_numbers<[1], [0], [0], [1], [0, 0, 1, 1], [], []>} : vector<256x8xf32>, vector<8x4xf32>, vector<256x4xf32> -> vector<256x4xf32>
    %64 = arith.addf %58, %63 : vector<256x4xf32>
    %c0_76 = arith.constant 0 : index
    %c0_77 = arith.constant 0 : index
    %65 = vector.load %arg4[%c0_76, %c0_77] : memref<1x4xf32, #tpu.memory_space<vmem>>, vector<1x4xf32>
    %66 = vector.broadcast %65 : vector<1x4xf32> to vector<256x4xf32>
    %67 = arith.addf %64, %66 : vector<256x4xf32>
    %cst_78 = arith.constant 0.000000e+00 : f32
    %68 = vector.broadcast %cst_78 : f32 to vector<256x4xf32>
    %69 = arith.maximumf %67, %68 : vector<256x4xf32>
    %70 = vector.shape_cast %69 : vector<256x4xf32> to vector<16x16x4xf32>
    %c1_79 = arith.constant 1 : index
    %c1_80 = arith.constant 1 : index
    %c0_81 = arith.constant 0 : index
    %71 = vector.load %arg9[%c1_79, %c1_80, %c0_81] : memref<18x18x4xf32, #tpu.memory_space<vmem>>, vector<16x16x4xf32>
    tpu.vector_store %arg9[%c1_79, %c1_80, %c0_81], %70 {strides = array<i32>} : memref<18x18x4xf32, #tpu.memory_space<vmem>>, vector<16x16x4xf32>,
    %cst_82 = arith.constant 0.000000e+00 : f32
    %72 = vector.broadcast %cst_82 : f32 to vector<4x256xf32>
    %c0_83 = arith.constant 0 : index
    %c0_84 = arith.constant 0 : index
    %c0_85 = arith.constant 0 : index
    %73 = vector.load %arg9[%c0_83, %c0_84, %c0_85] : memref<18x18x4xf32, #tpu.memory_space<vmem>>, vector<16x16x4xf32>
    %74 = vector.shape_cast %73 : vector<16x16x4xf32> to vector<256x4xf32>
    %c0_86 = arith.constant 0 : index
    %c0_87 = arith.constant 0 : index
    %c0_88 = arith.constant 0 : index
    %75 = vector.load %arg5[%c0_86, %c0_87, %c0_88] : memref<9x4x4xf32, #tpu.memory_space<vmem>>, vector<1x4x4xf32>
    %76 = vector.shape_cast %75 : vector<1x4x4xf32> to vector<4x4xf32>
    %cst_89 = arith.constant dense<0.000000e+00> : vector<4x256xf32>
    %77 = tpu.matmul %76, %74, %cst_89 {dimension_numbers = #tpu.dot_dimension_numbers<[1], [1], [0], [0], [0, 0, 1, 0], [], []>} : vector<4x4xf32>, vector<256x4xf32>, vector<4x256xf32> -> vector<4x256xf32>
    %78 = arith.addf %72, %77 : vector<4x256xf32>
    %c0_90 = arith.constant 0 : index
    %c1_91 = arith.constant 1 : index
    %c0_92 = arith.constant 0 : index
    %79 = vector.load %arg9[%c0_90, %c1_91, %c0_92] : memref<18x18x4xf32, #tpu.memory_space<vmem>>, vector<16x16x4xf32>
    %80 = vector.shape_cast %79 : vector<16x16x4xf32> to vector<256x4xf32>
    %c1_93 = arith.constant 1 : index
    %c0_94 = arith.constant 0 : index
    %c0_95 = arith.constant 0 : index
    %81 = vector.load %arg5[%c1_93, %c0_94, %c0_95] : memref<9x4x4xf32, #tpu.memory_space<vmem>>, vector<1x4x4xf32>
    %82 = vector.shape_cast %81 : vector<1x4x4xf32> to vector<4x4xf32>
    %cst_96 = arith.constant dense<0.000000e+00> : vector<4x256xf32>
    %83 = tpu.matmul %82, %80, %cst_96 {dimension_numbers = #tpu.dot_dimension_numbers<[1], [1], [0], [0], [0, 0, 1, 0], [], []>} : vector<4x4xf32>, vector<256x4xf32>, vector<4x256xf32> -> vector<4x256xf32>
    %84 = arith.addf %78, %83 : vector<4x256xf32>
    %c0_97 = arith.constant 0 : index
    %c2_98 = arith.constant 2 : index
    %c0_99 = arith.constant 0 : index
    %85 = vector.load %arg9[%c0_97, %c2_98, %c0_99] : memref<18x18x4xf32, #tpu.memory_space<vmem>>, vector<16x16x4xf32>
    %86 = vector.shape_cast %85 : vector<16x16x4xf32> to vector<256x4xf32>
    %c2_100 = arith.constant 2 : index
    %c0_101 = arith.constant 0 : index
    %c0_102 = arith.constant 0 : index
    %87 = vector.load %arg5[%c2_100, %c0_101, %c0_102] : memref<9x4x4xf32, #tpu.memory_space<vmem>>, vector<1x4x4xf32>
    %88 = vector.shape_cast %87 : vector<1x4x4xf32> to vector<4x4xf32>
    %cst_103 = arith.constant dense<0.000000e+00> : vector<4x256xf32>
    %89 = tpu.matmul %88, %86, %cst_103 {dimension_numbers = #tpu.dot_dimension_numbers<[1], [1], [0], [0], [0, 0, 1, 0], [], []>} : vector<4x4xf32>, vector<256x4xf32>, vector<4x256xf32> -> vector<4x256xf32>
    %90 = arith.addf %84, %89 : vector<4x256xf32>
    %c1_104 = arith.constant 1 : index
    %c0_105 = arith.constant 0 : index
    %c0_106 = arith.constant 0 : index
    %91 = vector.load %arg9[%c1_104, %c0_105, %c0_106] : memref<18x18x4xf32, #tpu.memory_space<vmem>>, vector<16x16x4xf32>
    %92 = vector.shape_cast %91 : vector<16x16x4xf32> to vector<256x4xf32>
    %c3_107 = arith.constant 3 : index
    %c0_108 = arith.constant 0 : index
    %c0_109 = arith.constant 0 : index
    %93 = vector.load %arg5[%c3_107, %c0_108, %c0_109] : memref<9x4x4xf32, #tpu.memory_space<vmem>>, vector<1x4x4xf32>
    %94 = vector.shape_cast %93 : vector<1x4x4xf32> to vector<4x4xf32>
    %cst_110 = arith.constant dense<0.000000e+00> : vector<4x256xf32>
    %95 = tpu.matmul %94, %92, %cst_110 {dimension_numbers = #tpu.dot_dimension_numbers<[1], [1], [0], [0], [0, 0, 1, 0], [], []>} : vector<4x4xf32>, vector<256x4xf32>, vector<4x256xf32> -> vector<4x256xf32>
    %96 = arith.addf %90, %95 : vector<4x256xf32>
    %c1_111 = arith.constant 1 : index
    %c1_112 = arith.constant 1 : index
    %c0_113 = arith.constant 0 : index
    %97 = vector.load %arg9[%c1_111, %c1_112, %c0_113] : memref<18x18x4xf32, #tpu.memory_space<vmem>>, vector<16x16x4xf32>
    %98 = vector.shape_cast %97 : vector<16x16x4xf32> to vector<256x4xf32>
    %c4_114 = arith.constant 4 : index
    %c0_115 = arith.constant 0 : index
    %c0_116 = arith.constant 0 : index
    %99 = vector.load %arg5[%c4_114, %c0_115, %c0_116] : memref<9x4x4xf32, #tpu.memory_space<vmem>>, vector<1x4x4xf32>
    %100 = vector.shape_cast %99 : vector<1x4x4xf32> to vector<4x4xf32>
    %cst_117 = arith.constant dense<0.000000e+00> : vector<4x256xf32>
    %101 = tpu.matmul %100, %98, %cst_117 {dimension_numbers = #tpu.dot_dimension_numbers<[1], [1], [0], [0], [0, 0, 1, 0], [], []>} : vector<4x4xf32>, vector<256x4xf32>, vector<4x256xf32> -> vector<4x256xf32>
    %102 = arith.addf %96, %101 : vector<4x256xf32>
    %c1_118 = arith.constant 1 : index
    %c2_119 = arith.constant 2 : index
    %c0_120 = arith.constant 0 : index
    %103 = vector.load %arg9[%c1_118, %c2_119, %c0_120] : memref<18x18x4xf32, #tpu.memory_space<vmem>>, vector<16x16x4xf32>
    %104 = vector.shape_cast %103 : vector<16x16x4xf32> to vector<256x4xf32>
    %c5_121 = arith.constant 5 : index
    %c0_122 = arith.constant 0 : index
    %c0_123 = arith.constant 0 : index
    %105 = vector.load %arg5[%c5_121, %c0_122, %c0_123] : memref<9x4x4xf32, #tpu.memory_space<vmem>>, vector<1x4x4xf32>
    %106 = vector.shape_cast %105 : vector<1x4x4xf32> to vector<4x4xf32>
    %cst_124 = arith.constant dense<0.000000e+00> : vector<4x256xf32>
    %107 = tpu.matmul %106, %104, %cst_124 {dimension_numbers = #tpu.dot_dimension_numbers<[1], [1], [0], [0], [0, 0, 1, 0], [], []>} : vector<4x4xf32>, vector<256x4xf32>, vector<4x256xf32> -> vector<4x256xf32>
    %108 = arith.addf %102, %107 : vector<4x256xf32>
    %c2_125 = arith.constant 2 : index
    %c0_126 = arith.constant 0 : index
    %c0_127 = arith.constant 0 : index
    %109 = vector.load %arg9[%c2_125, %c0_126, %c0_127] : memref<18x18x4xf32, #tpu.memory_space<vmem>>, vector<16x16x4xf32>
    %110 = vector.shape_cast %109 : vector<16x16x4xf32> to vector<256x4xf32>
    %c6_128 = arith.constant 6 : index
    %c0_129 = arith.constant 0 : index
    %c0_130 = arith.constant 0 : index
    %111 = vector.load %arg5[%c6_128, %c0_129, %c0_130] : memref<9x4x4xf32, #tpu.memory_space<vmem>>, vector<1x4x4xf32>
    %112 = vector.shape_cast %111 : vector<1x4x4xf32> to vector<4x4xf32>
    %cst_131 = arith.constant dense<0.000000e+00> : vector<4x256xf32>
    %113 = tpu.matmul %112, %110, %cst_131 {dimension_numbers = #tpu.dot_dimension_numbers<[1], [1], [0], [0], [0, 0, 1, 0], [], []>} : vector<4x4xf32>, vector<256x4xf32>, vector<4x256xf32> -> vector<4x256xf32>
    %114 = arith.addf %108, %113 : vector<4x256xf32>
    %c2_132 = arith.constant 2 : index
    %c1_133 = arith.constant 1 : index
    %c0_134 = arith.constant 0 : index
    %115 = vector.load %arg9[%c2_132, %c1_133, %c0_134] : memref<18x18x4xf32, #tpu.memory_space<vmem>>, vector<16x16x4xf32>
    %116 = vector.shape_cast %115 : vector<16x16x4xf32> to vector<256x4xf32>
    %c7_135 = arith.constant 7 : index
    %c0_136 = arith.constant 0 : index
    %c0_137 = arith.constant 0 : index
    %117 = vector.load %arg5[%c7_135, %c0_136, %c0_137] : memref<9x4x4xf32, #tpu.memory_space<vmem>>, vector<1x4x4xf32>
    %118 = vector.shape_cast %117 : vector<1x4x4xf32> to vector<4x4xf32>
    %cst_138 = arith.constant dense<0.000000e+00> : vector<4x256xf32>
    %119 = tpu.matmul %118, %116, %cst_138 {dimension_numbers = #tpu.dot_dimension_numbers<[1], [1], [0], [0], [0, 0, 1, 0], [], []>} : vector<4x4xf32>, vector<256x4xf32>, vector<4x256xf32> -> vector<4x256xf32>
    %120 = arith.addf %114, %119 : vector<4x256xf32>
    %c2_139 = arith.constant 2 : index
    %c2_140 = arith.constant 2 : index
    %c0_141 = arith.constant 0 : index
    %121 = vector.load %arg9[%c2_139, %c2_140, %c0_141] : memref<18x18x4xf32, #tpu.memory_space<vmem>>, vector<16x16x4xf32>
    %122 = vector.shape_cast %121 : vector<16x16x4xf32> to vector<256x4xf32>
    %c8_142 = arith.constant 8 : index
    %c0_143 = arith.constant 0 : index
    %c0_144 = arith.constant 0 : index
    %123 = vector.load %arg5[%c8_142, %c0_143, %c0_144] : memref<9x4x4xf32, #tpu.memory_space<vmem>>, vector<1x4x4xf32>
    %124 = vector.shape_cast %123 : vector<1x4x4xf32> to vector<4x4xf32>
    %cst_145 = arith.constant dense<0.000000e+00> : vector<4x256xf32>
    %125 = tpu.matmul %124, %122, %cst_145 {dimension_numbers = #tpu.dot_dimension_numbers<[1], [1], [0], [0], [0, 0, 1, 0], [], []>} : vector<4x4xf32>, vector<256x4xf32>, vector<4x256xf32> -> vector<4x256xf32>
    %126 = arith.addf %120, %125 : vector<4x256xf32>
    %c0_146 = arith.constant 0 : index
    %c0_147 = arith.constant 0 : index
    %127 = vector.load %arg6[%c0_146, %c0_147] : memref<4x1xf32, #tpu.memory_space<vmem>>, vector<4x1xf32>
    %128 = vector.broadcast %127 : vector<4x1xf32> to vector<4x256xf32>
    %129 = arith.addf %126, %128 : vector<4x256xf32>
    %cst_148 = arith.constant 0.000000e+00 : f32
    %130 = vector.broadcast %cst_148 : f32 to vector<4x256xf32>
    %131 = arith.maximumf %129, %130 : vector<4x256xf32>
    %c0_149 = arith.constant 0 : index
    %c0_150 = arith.constant 0 : index
    %c0_151 = arith.constant 0 : index
    %132 = vector.load %arg7[%c0_149, %c0_150, %c0_151] : memref<1x4x256xf32, #tpu.memory_space<vmem>>, vector<1x4x256xf32>
    %133 = vector.shape_cast %132 : vector<1x4x256xf32> to vector<4x256xf32>
    %134 = vector.shape_cast %131 : vector<4x256xf32> to vector<1x4x256xf32>
    tpu.vector_store %arg7[%c0_149, %c0_150, %c0_151], %134 {strides = array<i32>} : memref<1x4x256xf32, #tpu.memory_space<vmem>>, vector<1x4x256xf32>,
    return
  }
  func.func @transform_0(%arg0: i32) -> (i32, i32, i32, i32) {
    %c0_i32 = arith.constant 0 : i32
    %c0_i32_0 = arith.constant 0 : i32
    %c0_i32_1 = arith.constant 0 : i32
    %c0_i32_2 = arith.constant 0 : i32
    return %arg0, %c0_i32, %c0_i32_0, %c0_i32_1 : i32, i32, i32, i32
  }
  func.func @transform_1(%arg0: i32) -> (i32, i32, i32, i32) {
    %c0_i32 = arith.constant 0 : i32
    %c0_i32_0 = arith.constant 0 : i32
    %c0_i32_1 = arith.constant 0 : i32
    %c0_i32_2 = arith.constant 0 : i32
    return %arg0, %c0_i32, %c0_i32_0, %c0_i32_1 : i32, i32, i32, i32
  }
  func.func @transform_2(%arg0: i32) -> (i32, i32, i32) {
    %c0_i32 = arith.constant 0 : i32
    %c0_i32_0 = arith.constant 0 : i32
    %c0_i32_1 = arith.constant 0 : i32
    %c0_i32_2 = arith.constant 0 : i32
    return %c0_i32, %c0_i32_0, %c0_i32_1 : i32, i32, i32
  }
  func.func @transform_3(%arg0: i32) -> (i32, i32) {
    %c0_i32 = arith.constant 0 : i32
    %c0_i32_0 = arith.constant 0 : i32
    %c0_i32_1 = arith.constant 0 : i32
    return %c0_i32, %c0_i32_0 : i32, i32
  }
  func.func @transform_4(%arg0: i32) -> (i32, i32, i32) {
    %c0_i32 = arith.constant 0 : i32
    %c0_i32_0 = arith.constant 0 : i32
    %c0_i32_1 = arith.constant 0 : i32
    %c0_i32_2 = arith.constant 0 : i32
    return %c0_i32, %c0_i32_0, %c0_i32_1 : i32, i32, i32
  }
  func.func @transform_5(%arg0: i32) -> (i32, i32) {
    %c0_i32 = arith.constant 0 : i32
    %c0_i32_0 = arith.constant 0 : i32
    %c0_i32_1 = arith.constant 0 : i32
    return %c0_i32, %c0_i32_0 : i32, i32
  }
  func.func @transform_6(%arg0: i32) -> (i32, i32, i32) {
    %c0_i32 = arith.constant 0 : i32
    %c0_i32_0 = arith.constant 0 : i32
    %c0_i32_1 = arith.constant 0 : i32
    return %arg0, %c0_i32, %c0_i32_0 : i32, i32, i32
  }
}

</mosaic_0001>

<bundles_post_ra>
// kernel: _forward.2
= control target key start
LH: loop header
LB: loop body
LE: loop exit
PB: predicated region body
PF: predicated region fallthrough
CT: control target
= control target key end

     0   :  { %s930_s12 = smov 0   ;;  %s1098_s0 = inlined_call_operand.vmem [shape: f32[2,64,8], index: 0, kind: input, shape index: {}]   ;;  %s1099_s1 = inlined_call_operand.vmem [shape: f32[4,8,4], index: 1, kind: input, shape index: {}]   ;;  %s1100_s2 = inlined_call_operand.vmem [shape: f32[1,4], index: 2, kind: input, shape index: {}]   ;;  %s1101_s3 = inlined_call_operand.vmem [shape: f32[2,4,64,4], index: 3, kind: output, shape index: {}]  }
   0x1 LB: > { %s729_s13 = sadd.s32 4294967295, %s908_s12   ;;  %p733_p0 = scmp.ge.s32.totalorder %s908_s12, 1  ;;  %s908_s12 = sphi %s930_s12, %s13_s12  }
   0x2   : > { %p137_p1 = scmp.lt.s32.totalorder %s908_s12, 3 }
   0x4   : > { %p138_p2 = pnand %p733_p0, %p137_p1 }
   0x5   : > { %v180_v0 = vld [vmem:[%s1099_s1] sm:$0xff] (!%p138_p2)  ;;  %v747_v1 = vld [vmem:[%s1099_s1 + $0x8] sm:$0xff] (!%p138_p2)  ;;  %p161_p3 = scmp.lt.s32.totalorder (!%p138_p2), %s729_s13, 1  ;;  %v764_v2 = vld [vmem:[%s1099_s1 + $0x10] sm:$0xff] (!%p138_p2)  ;;  %vm187_vm0 = vcmask (!%p138_p2), 64512   ;;  %vm317_vm1 = vcmask (!%p138_p2), 31744  }
   0x6   : > { %141 = sbr.rel (%p138_p2) target bundleno = 262 (0x106), region = 32  ;;  %838 = vmatprep.subr.mxu0 (!%p138_p2), %v180_v0  ;;  %852 = vmatprep.subr.mxu1 (!%p138_p2), %v747_v1  ;;  %v781_v3 = vld [vmem:[%s1099_s1 + $0x18] sm:$0xff] (!%p138_p2)  ;;  %v992_v12 = vld [vmem:[%s1100_s2] ss:$0 sm:$0xff] (!%p138_p2) }
   0x7   : > { %839 = vmatpush3.msra.mxu0 (!%p138_p2), %v180_v0  ;;  %853 = vmatpush3.msra.mxu1 (!%p138_p2), %v747_v1 }
   0x8   : > { %866 = vmatprep.subr.mxu0 (!%p138_p2), %v764_v2  ;;  %880 = vmatprep.subr.mxu1 (!%p138_p2), %v781_v3 }
   0xd   : > { %s1103_s13 = smov (!%p161_p3, %s729_s13), 1 }
   0xe   : > { %s800_s22 = sshll.u32 %s1103_s13, 6  ;;  %s801_s26 = sshll.u32 %s1103_s13, 8 }
   0xf   : > { %s165_s25 = scalar_lea.vmem %s1098_s0, %s800_s22  ;;  %s997_s4 = scalar_lea.vmem %s1101_s3, %s801_s26 }
  0x10   : > { %v171_v4 = vld [vmem:[%s165_s25] sm:$0xff]  ;;  %v172_v5 = vld [vmem:[%s165_s25 + $0x8] sm:$0xff]  ;;  %v173_v6 = vld [vmem:[%s165_s25 + $0x10] sm:$0xff] }
  0x11   : > { %840 = vmatprep.mubr.msk.f32.mxu0 %vm187_vm0, %v171_v4  ;;  %854 = vmatprep.mubr.msk.f32.mxu1 %vm187_vm0, %v171_v4  ;;  %v174_v7 = vld [vmem:[%s165_s25 + $0x18] sm:$0xff]  ;;  %v175_v8 = vld [vmem:[%s165_s25 + $0x20] sm:$0xff]  ;;  %v176_v9 = vld [vmem:[%s165_s25 + $0x28] sm:$0xff] }
  0x12   : > { %841 = vmatmul.mubr.msk.f32.vlgmr.msra.gmra.mrb[0].mxu0 %vm187_vm0, %v172_v5  ;;  %855 = vmatmul.mubr.msk.f32.vlgmr.msra.gmra.mrb[0].mxu1 %vm187_vm0, %v172_v5  ;;  %v177_v10 = vld [vmem:[%s165_s25 + $0x30] sm:$0xff]  ;;  %v178_v11 = vld [vmem:[%s165_s25 + $0x38] sm:$0xff] }
  0x13   : > { %867 = vmatpush3.msra.mxu0 %v764_v2  ;;  %881 = vmatpush3.msra.mxu1 %v781_v3 }
  0x14   : > { %843 = vmatprep.mubr.msk.f32.mxu0 %vm187_vm0, %v173_v6  ;;  %857 = vmatprep.mubr.msk.f32.mxu1 %vm187_vm0, %v173_v6 }
  0x16   : > { %844 = vmatmul.mubr.msk.f32.gmra.mrb[2].mxu0 %vm187_vm0, %v174_v7  ;;  %858 = vmatmul.mubr.msk.f32.gmra.mrb[2].mxu1 %vm187_vm0, %v174_v7 }
  0x17   : > { %846 = vmatprep.mubr.msk.f32.mxu0 %vm187_vm0, %v175_v8  ;;  %860 = vmatprep.mubr.msk.f32.mxu1 %vm187_vm0, %v175_v8 }
  0x1a   : > { %847 = vmatmul.mubr.msk.f32.gmra.mrb[4].mxu0 %vm187_vm0, %v176_v9  ;;  %861 = vmatmul.mubr.msk.f32.gmra.mrb[4].mxu1 %vm187_vm0, %v176_v9 }
  0x1b   : > { %849 = vmatprep.mubr.msk.f32.mxu0 %vm187_vm0, %v177_v10  ;;  %863 = vmatprep.mubr.msk.f32.mxu1 %vm187_vm0, %v177_v10 }
  0x1e   : > { %850 = vmatmul.mubr.msk.f32.gmra.mrb[6].mxu0 %vm187_vm0, %v178_v11  ;;  %864 = vmatmul.mubr.msk.f32.gmra.mrb[6].mxu1 %vm187_vm0, %v178_v11 }
  0x1f   : > { %868 = vmatprep.mubr.msk.f32.mxu0 %vm187_vm0, %v171_v4  ;;  %882 = vmatprep.mubr.msk.f32.mxu1 %vm187_vm0, %v171_v4 }
  0x22   : > { %869 = vmatmul.mubr.msk.f32.vlgmr.msra.gmra.mrb[8].mxu0 %vm187_vm0, %v172_v5  ;;  %883 = vmatmul.mubr.msk.f32.vlgmr.msra.gmra.mrb[8].mxu1 %vm187_vm0, %v172_v5 }
  0x23   : > { %871 = vmatprep.mubr.msk.f32.mxu0 %vm187_vm0, %v173_v6  ;;  %885 = vmatprep.mubr.msk.f32.mxu1 %vm187_vm0, %v173_v6 }
  0x26   : > { %872 = vmatmul.mubr.msk.f32.gmra.mrb[10].mxu0 %vm187_vm0, %v174_v7  ;;  %886 = vmatmul.mubr.msk.f32.gmra.mrb[10].mxu1 %vm187_vm0, %v174_v7 }
  0x27   : > { %874 = vmatprep.mubr.msk.f32.mxu0 %vm187_vm0, %v175_v8  ;;  %888 = vmatprep.mubr.msk.f32.mxu1 %vm187_vm0, %v175_v8 }
  0x2a   : > { %875 = vmatmul.mubr.msk.f32.gmra.mrb[12].mxu0 %vm187_vm0, %v176_v9  ;;  %889 = vmatmul.mubr.msk.f32.gmra.mrb[12].mxu1 %vm187_vm0, %v176_v9 }
  0x2b   : > { %877 = vmatprep.mubr.msk.f32.mxu0 %vm187_vm0, %v177_v10  ;;  %891 = vmatprep.mubr.msk.f32.mxu1 %vm187_vm0, %v177_v10 }
  0x2e   : > { %878 = vmatmul.mubr.msk.f32.gmra.mrb[14].mxu0 %vm187_vm0, %v178_v11  ;;  %892 = vmatmul.mubr.msk.f32.gmra.mrb[14].mxu1 %vm187_vm0, %v178_v11 }
  0xe5   : > { %v842_v13 = vpop.f32.mrb[0].mxu0  ;;  %v856_v14 = vpop.f32.mrb[0].mxu1 }
  0xe6   : > { %v284_v15 = vadd.f32 %v842_v13, %v992_v12  ;;  %v400_v16 = vadd.f32 %v856_v14, %v992_v12  ;;  %v278_v17 = vpop.f32.mrb[1].mxu0  ;;  %v394_v18 = vpop.f32.mrb[1].mxu1 }
  0xe7   : > { %v279_v19 = vadd.f32 %v992_v12, %v278_v17  ;;  %v395_v20 = vadd.f32 %v992_v12, %v394_v18 }
  0xe8   : > { %319 = vst.msk [vmem:[%s997_s4 + $0x8] sm:$0xff] %vm317_vm1, %v284_v15  ;;  %757 = vst.msk [vmem:[%s997_s4 + $0x48] sm:$0xff] %vm317_vm1, %v400_v16 }
  0xe9   : > { %318 = vst.msk [vmem:[%s997_s4] sm:$0xff] %vm317_vm1, %v279_v19  ;;  %756 = vst.msk [vmem:[%s997_s4 + $0x40] sm:$0xff] %vm317_vm1, %v395_v20  ;;  %v845_v21 = vpop.f32.mrb[2].mxu0  ;;  %v859_v22 = vpop.f32.mrb[2].mxu1 }
  0xea   : > { %v294_v23 = vadd.f32 %v845_v21, %v992_v12  ;;  %v410_v24 = vadd.f32 %v859_v22, %v992_v12  ;;  %v288_v25 = vpop.f32.mrb[3].mxu0  ;;  %v404_v26 = vpop.f32.mrb[3].mxu1 }
  0xeb   : > { %v289_v27 = vadd.f32 %v992_v12, %v288_v25  ;;  %v405_v28 = vadd.f32 %v992_v12, %v404_v26 }
  0xec   : > { %321 = vst.msk [vmem:[%s997_s4 + $0x18] sm:$0xff] %vm317_vm1, %v294_v23  ;;  %759 = vst.msk [vmem:[%s997_s4 + $0x58] sm:$0xff] %vm317_vm1, %v410_v24 }
  0xed   : > { %320 = vst.msk [vmem:[%s997_s4 + $0x10] sm:$0xff] %vm317_vm1, %v289_v27  ;;  %758 = vst.msk [vmem:[%s997_s4 + $0x50] sm:$0xff] %vm317_vm1, %v405_v28  ;;  %v848_v29 = vpop.f32.mrb[4].mxu0  ;;  %v862_v30 = vpop.f32.mrb[4].mxu1 }
  0xee   : > { %v304_v31 = vadd.f32 %v848_v29, %v992_v12  ;;  %v420_v32 = vadd.f32 %v862_v30, %v992_v12  ;;  %v298_v33 = vpop.f32.mrb[5].mxu0  ;;  %v414_v34 = vpop.f32.mrb[5].mxu1 }
  0xef   : > { %v299_v35 = vadd.f32 %v992_v12, %v298_v33  ;;  %v415_v36 = vadd.f32 %v992_v12, %v414_v34 }
  0xf0   : > { %323 = vst.msk [vmem:[%s997_s4 + $0x28] sm:$0xff] %vm317_vm1, %v304_v31  ;;  %761 = vst.msk [vmem:[%s997_s4 + $0x68] sm:$0xff] %vm317_vm1, %v420_v32 }
  0xf1   : > { %322 = vst.msk [vmem:[%s997_s4 + $0x20] sm:$0xff] %vm317_vm1, %v299_v35  ;;  %760 = vst.msk [vmem:[%s997_s4 + $0x60] sm:$0xff] %vm317_vm1, %v415_v36  ;;  %v851_v37 = vpop.f32.mrb[6].mxu0  ;;  %v865_v38 = vpop.f32.mrb[6].mxu1 }
  0xf2   : > { %v314_v39 = vadd.f32 %v851_v37, %v992_v12  ;;  %v430_v40 = vadd.f32 %v865_v38, %v992_v12  ;;  %v308_v41 = vpop.f32.mrb[7].mxu0  ;;  %v424_v42 = vpop.f32.mrb[7].mxu1 }
  0xf3   : > { %v309_v43 = vadd.f32 %v992_v12, %v308_v41  ;;  %v425_v44 = vadd.f32 %v992_v12, %v424_v42 }
  0xf4   : > { %325 = vst.msk [vmem:[%s997_s4 + $0x38] sm:$0xff] %vm317_vm1, %v314_v39  ;;  %763 = vst.msk [vmem:[%s997_s4 + $0x78] sm:$0xff] %vm317_vm1, %v430_v40 }
  0xf5   : > { %324 = vst.msk [vmem:[%s997_s4 + $0x30] sm:$0xff] %vm317_vm1, %v309_v43  ;;  %762 = vst.msk [vmem:[%s997_s4 + $0x70] sm:$0xff] %vm317_vm1, %v425_v44  ;;  %v870_v45 = vpop.f32.mrb[8].mxu0  ;;  %v884_v46 = vpop.f32.mrb[8].mxu1 }
  0xf6   : > { %v516_v47 = vadd.f32 %v870_v45, %v992_v12  ;;  %v632_v48 = vadd.f32 %v884_v46, %v992_v12  ;;  %v510_v49 = vpop.f32.mrb[9].mxu0  ;;  %v626_v50 = vpop.f32.mrb[9].mxu1 }
  0xf7   : > { %v511_v51 = vadd.f32 %v992_v12, %v510_v49  ;;  %v627_v52 = vadd.f32 %v992_v12, %v626_v50 }
  0xf8   : > { %774 = vst.msk [vmem:[%s997_s4 + $0x88] sm:$0xff] %vm317_vm1, %v516_v47  ;;  %791 = vst.msk [vmem:[%s997_s4 + $0xc8] sm:$0xff] %vm317_vm1, %v632_v48 }
  0xf9   : > { %773 = vst.msk [vmem:[%s997_s4 + $0x80] sm:$0xff] %vm317_vm1, %v511_v51  ;;  %790 = vst.msk [vmem:[%s997_s4 + $0xc0] sm:$0xff] %vm317_vm1, %v627_v52  ;;  %v873_v53 = vpop.f32.mrb[10].mxu0  ;;  %v887_v54 = vpop.f32.mrb[10].mxu1 }
  0xfa   : > { %v526_v55 = vadd.f32 %v873_v53, %v992_v12  ;;  %v642_v56 = vadd.f32 %v887_v54, %v992_v12  ;;  %v520_v57 = vpop.f32.mrb[11].mxu0  ;;  %v636_v58 = vpop.f32.mrb[11].mxu1 }
  0xfb   : > { %v521_v59 = vadd.f32 %v992_v12, %v520_v57  ;;  %v637_v60 = vadd.f32 %v992_v12, %v636_v58 }
  0xfc   : > { %776 = vst.msk [vmem:[%s997_s4 + $0x98] sm:$0xff] %vm317_vm1, %v526_v55  ;;  %793 = vst.msk [vmem:[%s997_s4 + $0xd8] sm:$0xff] %vm317_vm1, %v642_v56 }
  0xfd   : > { %775 = vst.msk [vmem:[%s997_s4 + $0x90] sm:$0xff] %vm317_vm1, %v521_v59  ;;  %792 = vst.msk [vmem:[%s997_s4 + $0xd0] sm:$0xff] %vm317_vm1, %v637_v60  ;;  %v876_v61 = vpop.f32.mrb[12].mxu0  ;;  %v890_v62 = vpop.f32.mrb[12].mxu1 }
  0xfe   : > { %v536_v63 = vadd.f32 %v876_v61, %v992_v12  ;;  %v652_v0 = vadd.f32 %v890_v62, %v992_v12  ;;  %v530_v1 = vpop.f32.mrb[13].mxu0  ;;  %v646_v2 = vpop.f32.mrb[13].mxu1 }
  0xff   : > { %v531_v3 = vadd.f32 %v992_v12, %v530_v1  ;;  %v647_v4 = vadd.f32 %v992_v12, %v646_v2 }
 0x100   : > { %778 = vst.msk [vmem:[%s997_s4 + $0xa8] sm:$0xff] %vm317_vm1, %v536_v63  ;;  %795 = vst.msk [vmem:[%s997_s4 + $0xe8] sm:$0xff] %vm317_vm1, %v652_v0 }
 0x101   : > { %777 = vst.msk [vmem:[%s997_s4 + $0xa0] sm:$0xff] %vm317_vm1, %v531_v3  ;;  %794 = vst.msk [vmem:[%s997_s4 + $0xe0] sm:$0xff] %vm317_vm1, %v647_v4  ;;  %v879_v5 = vpop.f32.mrb[14].mxu0  ;;  %v893_v6 = vpop.f32.mrb[14].mxu1 }
 0x102   : > { %v546_v7 = vadd.f32 %v879_v5, %v992_v12  ;;  %v662_v8 = vadd.f32 %v893_v6, %v992_v12  ;;  %v540_v9 = vpop.f32.mrb[15].mxu0  ;;  %v656_v10 = vpop.f32.mrb[15].mxu1 }
 0x103   : > { %v541_v11 = vadd.f32 %v992_v12, %v540_v9  ;;  %v657_v13 = vadd.f32 %v992_v12, %v656_v10 }
 0x104   : > { %780 = vst.msk [vmem:[%s997_s4 + $0xb8] sm:$0xff] %vm317_vm1, %v546_v7  ;;  %797 = vst.msk [vmem:[%s997_s4 + $0xf8] sm:$0xff] %vm317_vm1, %v662_v8 }
 0x105   : > { %779 = vst.msk [vmem:[%s997_s4 + $0xb0] sm:$0xff] %vm317_vm1, %v541_v11  ;;  %796 = vst.msk [vmem:[%s997_s4 + $0xf0] sm:$0xff] %vm317_vm1, %v657_v13 }
 0x106 PF: > { %s13_s12 = sadd.s32 1, %s908_s12  }
 0x107   : > { %p10_p4 = scmp.ge.s32.totalorder %s13_s12, 4  }
 0x109   :  { %12 = sbr.rel (!%p10_p4) target bundleno = 1 (0x1), region = 68 }

// kernel: _forward.3
= control target key start
LH: loop header
LB: loop body
LE: loop exit
PB: predicated region body
PF: predicated region fallthrough
CT: control target
= control target key end

     0   :  { %s8530_s21 = smov 0   ;;  %s10376_s0 = inlined_call_operand.vmem [shape: f32[2,16,16,4], index: 0, kind: input, shape index: {}]   ;;  %s10377_s1 = inlined_call_operand.vmem [shape: f32[2,16,16,4], index: 1, kind: input, shape index: {}]   ;;  %s10378_s2 = inlined_call_operand.vmem [shape: f32[9,8,4], index: 2, kind: input, shape index: {}]   ;;  %s10379_s3 = inlined_call_operand.vmem [shape: f32[1,4], index: 3, kind: input, shape index: {}]   ;;  %s10380_s4 = inlined_call_operand.vmem [shape: f32[9,4,4], index: 4, kind: input, shape index: {}]   ;;  %s10381_s5 = inlined_call_operand.vmem [shape: f32[4,1], index: 5, kind: input, shape index: {}]   ;;  %s10382_s6 = inlined_call_operand.vmem [shape: f32[2,4,256], index: 6, kind: output, shape index: {}]  }
   0x1 LB: > { %s6097_s22 = sadd.s32 4294967295, %s8490_s21   ;;  %p6101_p0 = scmp.ge.s32.totalorder %s8490_s21, 1  ;;  %s8490_s21 = sphi %s8530_s21, %s16_s21  }
   0x2   : > { %p222_p1 = scmp.lt.s32.totalorder %s8490_s21, 3 }
   0x4   : > { %p223_p2 = pnand %p6101_p0, %p222_p1 }
   0x6   : > { %226 = sbr.rel (%p223_p2) target bundleno = 1705 (0x6a9), region = 44 }
   0xd   : > { %p8540_p3 = scmp.lt.s32.totalorder %s6097_s22, 1  ;;  %vm272_vm0 = vcmask 64512   ;;  %vm328_vm1 = vcmask 31744   ;;  %v10383_v0 = vmov 0.0   ;;  %vm275_vm2 = vcmask 58368   ;;  %v6108_v1 = vld [vmem:[%s10378_s2 + $0x8] sm:$0xff] }
   0xe   : > { %280 = vst.msk [vmem:[#allocation2 + $0x30] sm:$0xff] %vm272_vm0, %v10383_v0  ;;  %281 = vst.msk [vmem:[#allocation2 + $0x38] sm:$0xff] %vm272_vm0, %v10383_v0  ;;  %v674_v2 = vld [vmem:[%s10378_s2] sm:$0xff]  ;;  %7318 = vmatprep.subr.mxu0 %v6108_v1  ;;  %s8493_s8 = smov 4   ;;  %vm609_vm3 = vcmask 64544   ;;  %vm331_vm4 = vcmask 25600  }
   0xf   : > { %273 = vst.msk [vmem:[#allocation2] sm:$0xff] %vm272_vm0, %v10383_v0  ;;  %274 = vst.msk [vmem:[#allocation2 + $0x8] sm:$0xff] %vm272_vm0, %v10383_v0  ;;  %s10516_s22 = smov (!%p8540_p3, %s6097_s22), 1  ;;  %7319 = vmatpush3.msra.mxu0 %v6108_v1 }
  0x10   : > { %277 = vst.msk [vmem:[#allocation2 + $0x18] sm:$0xff] %vm272_vm0, %v10383_v0  ;;  %278 = vst.msk [vmem:[#allocation2 + $0x20] sm:$0xff] %vm272_vm0, %v10383_v0  ;;  %s6712_s28 = sshll.u32 %s10516_s22, 8  ;;  %7368 = vmatprep.subr.mxu0 %v674_v2 }
  0x11   : > { %283 = vst.msk [vmem:[#allocation2 + $0x48] sm:$0xff] %vm272_vm0, %v10383_v0  ;;  %284 = vst.msk [vmem:[#allocation2 + $0x50] sm:$0xff] %vm272_vm0, %v10383_v0  ;;  %s8740_s7 = scalar_lea.vmem %s10377_s1, %s6712_s28  ;;  %s8756_s11 = scalar_lea.vmem %s10376_s0, %s6712_s28 }
  0x12   : > { %286 = vst.msk [vmem:[#allocation2 + $0x60] sm:$0xff] %vm272_vm0, %v10383_v0  ;;  %287 = vst.msk [vmem:[#allocation2 + $0x68] sm:$0xff] %vm272_vm0, %v10383_v0  ;;  %v451_v3 = vld [vmem:[%s8740_s7 + $0x10] sm:$0xff]  ;;  %v449_v4 = vld [vmem:[%s8740_s7] sm:$0xff]  ;;  %s6714_s28 = sshll.u32 %s10516_s22, 3 }
  0x13   : > { %289 = vst.msk [vmem:[#allocation2 + $0x78] sm:$0xff] %vm272_vm0, %v10383_v0  ;;  %290 = vst.msk [vmem:[#allocation2 + $0x80] sm:$0xff] %vm272_vm0, %v10383_v0  ;;  %517 = vrot.lane.b32.xlu1 %v451_v3, %s8493_s8  ;;  %513 = vrot.lane.b32.xlu0 %v449_v4, %s8493_s8  ;;  %v452_v5 = vld [vmem:[%s8740_s7 + $0x18] sm:$0xff]  ;;  %v450_v6 = vld [vmem:[%s8740_s7 + $0x8] sm:$0xff] }
  0x14   : > { %292 = vst.msk [vmem:[#allocation2 + $0x90] sm:$0xff] %vm272_vm0, %v10383_v0  ;;  %293 = vst.msk [vmem:[#allocation2 + $0x98] sm:$0xff] %vm272_vm0, %v10383_v0  ;;  %v454_v8 = vld [vmem:[%s8740_s7 + $0x28] sm:$0xff]  ;;  %v453_v9 = vld [vmem:[%s8740_s7 + $0x20] sm:$0xff] }
  0x15   : > { %295 = vst.msk [vmem:[#allocation2 + $0xa8] sm:$0xff] %vm272_vm0, %v10383_v0  ;;  %296 = vst.msk [vmem:[#allocation2 + $0xb0] sm:$0xff] %vm272_vm0, %v10383_v0  ;;  %v456_v11 = vld [vmem:[%s8740_s7 + $0x38] sm:$0xff]  ;;  %v455_v12 = vld [vmem:[%s8740_s7 + $0x30] sm:$0xff] }
  0x16   : > { %298 = vst.msk [vmem:[#allocation2 + $0xc0] sm:$0xff] %vm272_vm0, %v10383_v0  ;;  %299 = vst.msk [vmem:[#allocation2 + $0xc8] sm:$0xff] %vm272_vm0, %v10383_v0  ;;  %v675_v7 = vld [vmem:[#allocation2 + $0x1] sm:$0xff]  ;;  %v386_v13 = vld [vmem:[%s8756_s11 + $0x10] sm:$0xff] }
  0x17   : > { %301 = vst.msk [vmem:[#allocation2 + $0xd8] sm:$0xff] %vm272_vm0, %v10383_v0  ;;  %302 = vst.msk [vmem:[#allocation2 + $0xe0] sm:$0xff] %vm272_vm0, %v10383_v0  ;;  %519 = vrot.lane.b32.xlu1 %v452_v5, %s8493_s8  ;;  %515 = vrot.lane.b32.xlu0 %v450_v6, %s8493_s8  ;;  %v384_v14 = vld [vmem:[%s8756_s11] sm:$0xff]  ;;  %v387_v15 = vld [vmem:[%s8756_s11 + $0x18] sm:$0xff] }
  0x18   : > { %304 = vst.msk [vmem:[#allocation2 + $0xf0] sm:$0xff] %vm272_vm0, %v10383_v0  ;;  %305 = vst.msk [vmem:[#allocation2 + $0xf8] sm:$0xff] %vm272_vm0, %v10383_v0  ;;  %7320 = vmatprep.mubr.msk.f32.mxu0 %vm272_vm0, %v675_v7  ;;  %v458_v16 = vld [vmem:[%s8740_s7 + $0x48] sm:$0xff]  ;;  %v457_v17 = vld [vmem:[%s8740_s7 + $0x40] sm:$0xff] }
  0x19   : > { %307 = vst.msk [vmem:[#allocation2 + $0x108] sm:$0xff] %vm272_vm0, %v10383_v0  ;;  %308 = vst.msk [vmem:[#allocation2 + $0x110] sm:$0xff] %vm272_vm0, %v10383_v0  ;;  %v385_v18 = vld [vmem:[%s8756_s11 + $0x8] sm:$0xff]  ;;  %v388_v20 = vld [vmem:[%s8756_s11 + $0x20] sm:$0xff] }
  0x1a   : > { %310 = vst.msk [vmem:[#allocation2 + $0x120] sm:$0xff] %vm272_vm0, %v10383_v0  ;;  %311 = vst.msk [vmem:[#allocation2 + $0x128] sm:$0xff] %vm272_vm0, %v10383_v0  ;;  %v389_v19 = vld [vmem:[%s8756_s11 + $0x28] sm:$0xff]  ;;  %v391_v21 = vld [vmem:[%s8756_s11 + $0x38] sm:$0xff] }
  0x1b   : > { %313 = vst.msk [vmem:[#allocation2 + $0x138] sm:$0xff] %vm272_vm0, %v10383_v0  ;;  %314 = vst.msk [vmem:[#allocation2 + $0x140] sm:$0xff] %vm272_vm0, %v10383_v0  ;;  %523 = vrot.lane.b32.xlu1 %v454_v8, %s8493_s8  ;;  %521 = vrot.lane.b32.xlu0 %v453_v9, %s8493_s8  ;;  %v390_v22 = vld [vmem:[%s8756_s11 + $0x30] sm:$0xff]  ;;  %v393_v23 = vld [vmem:[%s8756_s11 + $0x48] sm:$0xff] }
  0x1c   : > { %316 = vst.msk [vmem:[#allocation2 + $0x150] sm:$0xff] %vm272_vm0, %v10383_v0  ;;  %317 = vst.msk [vmem:[#allocation2 + $0x158] sm:$0xff] %vm272_vm0, %v10383_v0  ;;  %v392_v24 = vld [vmem:[%s8756_s11 + $0x40] sm:$0xff]  ;;  %v395_v25 = vld [vmem:[%s8756_s11 + $0x58] sm:$0xff] }
  0x1d   : > { %319 = vst.msk [vmem:[#allocation2 + $0x168] sm:$0xff] %vm272_vm0, %v10383_v0  ;;  %320 = vst.msk [vmem:[#allocation2 + $0x170] sm:$0xff] %vm272_vm0, %v10383_v0  ;;  %v394_v26 = vld [vmem:[%s8756_s11 + $0x50] sm:$0xff]  ;;  %v397_v27 = vld [vmem:[%s8756_s11 + $0x68] sm:$0xff] }
  0x1e   : > { %322 = vst.msk [vmem:[#allocation2 + $0x180] sm:$0xff] %vm272_vm0, %v10383_v0  ;;  %323 = vst.msk [vmem:[#allocation2 + $0x188] sm:$0xff] %vm272_vm0, %v10383_v0  ;;  %v396_v28 = vld [vmem:[%s8756_s11 + $0x60] sm:$0xff]  ;;  %v399_v29 = vld [vmem:[%s8756_s11 + $0x78] sm:$0xff] }
  0x1f   : > { %325 = vst.msk [vmem:[#allocation2 + $0x198] sm:$0xff] %vm272_vm0, %v10383_v0  ;;  %326 = vst.msk [vmem:[#allocation2 + $0x1a0] sm:$0xff] %vm272_vm0, %v10383_v0  ;;  %527 = vrot.lane.b32.xlu1 %v456_v11, %s8493_s8  ;;  %525 = vrot.lane.b32.xlu0 %v455_v12, %s8493_s8  ;;  %v398_v30 = vld [vmem:[%s8756_s11 + $0x70] sm:$0xff]  ;;  %v460_v31 = vld [vmem:[%s8740_s7 + $0x58] sm:$0xff] }
  0x20   : > { %329 = vst.msk [vmem:[#allocation3] sm:$0xff] %vm328_vm1, %v10383_v0  ;;  %330 = vst.msk [vmem:[#allocation3 + $0x8] sm:$0xff] %vm328_vm1, %v10383_v0  ;;  %v459_v32 = vld [vmem:[%s8740_s7 + $0x50] sm:$0xff]  ;;  %v401_v33 = vld [vmem:[%s8756_s11 + $0x88] sm:$0xff] }
  0x21   : > { %333 = vst.msk [vmem:[#allocation3 + $0x18] sm:$0xff] %vm328_vm1, %v10383_v0  ;;  %334 = vst.msk [vmem:[#allocation3 + $0x20] sm:$0xff] %vm328_vm1, %v10383_v0  ;;  %v400_v34 = vld [vmem:[%s8756_s11 + $0x80] sm:$0xff]  ;;  %v462_v35 = vld [vmem:[%s8740_s7 + $0x68] sm:$0xff] }
  0x22   : > { %336 = vst.msk [vmem:[#allocation3 + $0x30] sm:$0xff] %vm328_vm1, %v10383_v0  ;;  %337 = vst.msk [vmem:[#allocation3 + $0x38] sm:$0xff] %vm328_vm1, %v10383_v0  ;;  %v461_v36 = vld [vmem:[%s8740_s7 + $0x60] sm:$0xff]  ;;  %v403_v37 = vld [vmem:[%s8756_s11 + $0x98] sm:$0xff] }
  0x23   : > { %339 = vst.msk [vmem:[#allocation3 + $0x48] sm:$0xff] %vm328_vm1, %v10383_v0  ;;  %340 = vst.msk [vmem:[#allocation3 + $0x50] sm:$0xff] %vm328_vm1, %v10383_v0  ;;  %531 = vrot.lane.b32.xlu1 %v458_v16, %s8493_s8  ;;  %529 = vrot.lane.b32.xlu0 %v457_v17, %s8493_s8  ;;  %v402_v38 = vld [vmem:[%s8756_s11 + $0x90] sm:$0xff]  ;;  %v464_v39 = vld [vmem:[%s8740_s7 + $0x78] sm:$0xff] }
  0x24   : > { %342 = vst.msk [vmem:[#allocation3 + $0x60] sm:$0xff] %vm328_vm1, %v10383_v0  ;;  %343 = vst.msk [vmem:[#allocation3 + $0x68] sm:$0xff] %vm328_vm1, %v10383_v0  ;;  %v463_v40 = vld [vmem:[%s8740_s7 + $0x70] sm:$0xff]  ;;  %v405_v41 = vld [vmem:[%s8756_s11 + $0xa8] sm:$0xff] }
  0x25   : > { %345 = vst.msk [vmem:[#allocation3 + $0x78] sm:$0xff] %vm328_vm1, %v10383_v0  ;;  %346 = vst.msk [vmem:[#allocation3 + $0x80] sm:$0xff] %vm328_vm1, %v10383_v0  ;;  %v404_v42 = vld [vmem:[%s8756_s11 + $0xa0] sm:$0xff]  ;;  %v466_v43 = vld [vmem:[%s8740_s7 + $0x88] sm:$0xff] }
  0x26   : > { %348 = vst.msk [vmem:[#allocation3 + $0x90] sm:$0xff] %vm328_vm1, %v10383_v0  ;;  %349 = vst.msk [vmem:[#allocation3 + $0x98] sm:$0xff] %vm328_vm1, %v10383_v0  ;;  %v465_v44 = vld [vmem:[%s8740_s7 + $0x80] sm:$0xff]  ;;  %v407_v45 = vld [vmem:[%s8756_s11 + $0xb8] sm:$0xff] }
  0x27   : > { %351 = vst.msk [vmem:[#allocation3 + $0xa8] sm:$0xff] %vm328_vm1, %v10383_v0  ;;  %352 = vst.msk [vmem:[#allocation3 + $0xb0] sm:$0xff] %vm328_vm1, %v10383_v0  ;;  %535 = vrot.lane.b32.xlu1 %v460_v31, %s8493_s8  ;;  %533 = vrot.lane.b32.xlu0 %v459_v32, %s8493_s8  ;;  %v406_v46 = vld [vmem:[%s8756_s11 + $0xb0] sm:$0xff]  ;;  %v468_v47 = vld [vmem:[%s8740_s7 + $0x98] sm:$0xff] }
  0x28   : > { %354 = vst.msk [vmem:[#allocation3 + $0xc0] sm:$0xff] %vm328_vm1, %v10383_v0  ;;  %355 = vst.msk [vmem:[#allocation3 + $0xc8] sm:$0xff] %vm328_vm1, %v10383_v0  ;;  %v467_v48 = vld [vmem:[%s8740_s7 + $0x90] sm:$0xff]  ;;  %v409_v49 = vld [vmem:[%s8756_s11 + $0xc8] sm:$0xff] }
  0x29   : > { %357 = vst.msk [vmem:[#allocation3 + $0xd8] sm:$0xff] %vm328_vm1, %v10383_v0  ;;  %358 = vst.msk [vmem:[#allocation3 + $0xe0] sm:$0xff] %vm328_vm1, %v10383_v0  ;;  %v408_v50 = vld [vmem:[%s8756_s11 + $0xc0] sm:$0xff]  ;;  %v470_v51 = vld [vmem:[%s8740_s7 + $0xa8] sm:$0xff] }
  0x2a   : > { %360 = vst.msk [vmem:[#allocation3 + $0xf0] sm:$0xff] %vm328_vm1, %v10383_v0  ;;  %361 = vst.msk [vmem:[#allocation3 + $0xf8] sm:$0xff] %vm328_vm1, %v10383_v0  ;;  %v469_v52 = vld [vmem:[%s8740_s7 + $0xa0] sm:$0xff]  ;;  %v411_v53 = vld [vmem:[%s8756_s11 + $0xd8] sm:$0xff] }
  0x2b   : > { %363 = vst.msk [vmem:[#allocation3 + $0x108] sm:$0xff] %vm328_vm1, %v10383_v0  ;;  %364 = vst.msk [vmem:[#allocation3 + $0x110] sm:$0xff] %vm328_vm1, %v10383_v0  ;;  %539 = vrot.lane.b32.xlu1 %v462_v35, %s8493_s8  ;;  %537 = vrot.lane.b32.xlu0 %v461_v36, %s8493_s8  ;;  %v410_v54 = vld [vmem:[%s8756_s11 + $0xd0] sm:$0xff]  ;;  %v472_v55 = vld [vmem:[%s8740_s7 + $0xb8] sm:$0xff] }
  0x2c   : > { %366 = vst.msk [vmem:[#allocation3 + $0x120] sm:$0xff] %vm328_vm1, %v10383_v0  ;;  %367 = vst.msk [vmem:[#allocation3 + $0x128] sm:$0xff] %vm328_vm1, %v10383_v0  ;;  %v471_v56 = vld [vmem:[%s8740_s7 + $0xb0] sm:$0xff]  ;;  %v413_v57 = vld [vmem:[%s8756_s11 + $0xe8] sm:$0xff] }
  0x2d   : > { %369 = vst.msk [vmem:[#allocation3 + $0x138] sm:$0xff] %vm328_vm1, %v10383_v0  ;;  %370 = vst.msk [vmem:[#allocation3 + $0x140] sm:$0xff] %vm328_vm1, %v10383_v0  ;;  %v412_v58 = vld [vmem:[%s8756_s11 + $0xe0] sm:$0xff]  ;;  %v474_v59 = vld [vmem:[%s8740_s7 + $0xc8] sm:$0xff] }
  0x2e   : > { %372 = vst.msk [vmem:[#allocation3 + $0x150] sm:$0xff] %vm328_vm1, %v10383_v0  ;;  %373 = vst.msk [vmem:[#allocation3 + $0x158] sm:$0xff] %vm328_vm1, %v10383_v0  ;;  %v473_v60 = vld [vmem:[%s8740_s7 + $0xc0] sm:$0xff]  ;;  %v476_v61 = vld [vmem:[%s8740_s7 + $0xd8] sm:$0xff] }
  0x2f   : > { %375 = vst.msk [vmem:[#allocation3 + $0x168] sm:$0xff] %vm328_vm1, %v10383_v0  ;;  %376 = vst.msk [vmem:[#allocation3 + $0x170] sm:$0xff] %vm328_vm1, %v10383_v0  ;;  %543 = vrot.lane.b32.xlu1 %v464_v39, %s8493_s8  ;;  %541 = vrot.lane.b32.xlu0 %v463_v40, %s8493_s8  ;;  %v475_v62 = vld [vmem:[%s8740_s7 + $0xd0] sm:$0xff]  ;;  %v478_v63 = vld [vmem:[%s8740_s7 + $0xe8] sm:$0xff] }
  0x30   : > { %378 = vst.msk [vmem:[#allocation3 + $0x180] sm:$0xff] %vm328_vm1, %v10383_v0  ;;  %379 = vst.msk [vmem:[#allocation3 + $0x188] sm:$0xff] %vm328_vm1, %v10383_v0  ;;  %v477_v1 = vld [vmem:[%s8740_s7 + $0xe0] sm:$0xff]  ;;  %v480_v7 = vld [vmem:[%s8740_s7 + $0xf8] sm:$0xff] }
  0x31   : > { %381 = vst.msk [vmem:[#allocation3 + $0x198] sm:$0xff] %vm328_vm1, %v10383_v0  ;;  %382 = vst.msk [vmem:[#allocation3 + $0x1a0] sm:$0xff] %vm328_vm1, %v10383_v0  ;;  %v479_v8 = vld [vmem:[%s8740_s7 + $0xf0] sm:$0xff]  ;;  %s271_s7 = scalar_lea.vmem %s10382_s6, %s6714_s28 }
  0x32   : > { %282 = vst.msk [vmem:[#allocation2 + $0x40] sm:$0x3] %vm275_vm2, %v10383_v0  ;;  %276 = vst.msk [vmem:[#allocation2 + $0x10] sm:$0x3] %vm275_vm2, %v10383_v0 }
  0x33   : > { %279 = vst.msk [vmem:[#allocation2 + $0x28] sm:$0x3] %vm275_vm2, %v10383_v0  ;;  %285 = vst.msk [vmem:[#allocation2 + $0x58] sm:$0x3] %vm275_vm2, %v10383_v0  ;;  %547 = vrot.lane.b32.xlu1 %v466_v43, %s8493_s8  ;;  %545 = vrot.lane.b32.xlu0 %v465_v44, %s8493_s8 }
  0x34   : > { %288 = vst.msk [vmem:[#allocation2 + $0x70] sm:$0x3] %vm275_vm2, %v10383_v0  ;;  %291 = vst.msk [vmem:[#allocation2 + $0x88] sm:$0x3] %vm275_vm2, %v10383_v0 }
  0x35   : > { %294 = vst.msk [vmem:[#allocation2 + $0xa0] sm:$0x3] %vm275_vm2, %v10383_v0  ;;  %297 = vst.msk [vmem:[#allocation2 + $0xb8] sm:$0x3] %vm275_vm2, %v10383_v0 }
  0x36   : > { %300 = vst.msk [vmem:[#allocation2 + $0xd0] sm:$0x3] %vm275_vm2, %v10383_v0  ;;  %303 = vst.msk [vmem:[#allocation2 + $0xe8] sm:$0x3] %vm275_vm2, %v10383_v0 }
  0x37   : > { %306 = vst.msk [vmem:[#allocation2 + $0x100] sm:$0x3] %vm275_vm2, %v10383_v0  ;;  %309 = vst.msk [vmem:[#allocation2 + $0x118] sm:$0x3] %vm275_vm2, %v10383_v0  ;;  %551 = vrot.lane.b32.xlu1 %v468_v47, %s8493_s8  ;;  %549 = vrot.lane.b32.xlu0 %v467_v48, %s8493_s8 }
  0x38   : > { %312 = vst.msk [vmem:[#allocation2 + $0x130] sm:$0x3] %vm275_vm2, %v10383_v0  ;;  %315 = vst.msk [vmem:[#allocation2 + $0x148] sm:$0x3] %vm275_vm2, %v10383_v0 }
  0x39   : > { %318 = vst.msk [vmem:[#allocation2 + $0x160] sm:$0x3] %vm275_vm2, %v10383_v0  ;;  %321 = vst.msk [vmem:[#allocation2 + $0x178] sm:$0x3] %vm275_vm2, %v10383_v0  ;;  %v676_v10 = vld [vmem:[#allocation2 + $0x9] sm:$0xff] }
  0x3a   : > { %324 = vst.msk [vmem:[#allocation2 + $0x190] sm:$0x3] %vm275_vm2, %v10383_v0  ;;  %327 = vst.msk [vmem:[#allocation2 + $0x1a8] sm:$0x3] %vm275_vm2, %v10383_v0  ;;  %7321 = vmatmul.mubr.msk.f32.vlgmr.msra.gmra.mrb[0].mxu0 %vm272_vm0, %v676_v10  ;;  %v9168_v0 = vld [vmem:[%s10378_s2 + $0x20] sm:$0xff] }
  0x3b   : > { %7369 = vmatpush3.msra.mxu0 %v674_v2  ;;  %419 = vst.msk [vmem:[#allocation2 + $0x31] sm:$0xff] %vm328_vm1, %v386_v13  ;;  %417 = vst.msk [vmem:[#allocation2 + $0x19] sm:$0xff] %vm328_vm1, %v384_v14  ;;  %555 = vrot.lane.b32.xlu1 %v470_v51, %s8493_s8  ;;  %v8872_v2 = vld [vmem:[%s10378_s2 + $0x10] sm:$0xff] }
  0x3c   : > { %420 = vst.msk [vmem:[#allocation2 + $0x39] sm:$0xff] %vm328_vm1, %v387_v15  ;;  %418 = vst.msk [vmem:[#allocation2 + $0x21] sm:$0xff] %vm328_vm1, %v385_v18  ;;  %553 = vrot.lane.b32.xlu0 %v469_v52, %s8493_s8  ;;  %7418 = vmatprep.subr.mxu0 %v8872_v2 }
  0x3d   : > { %422 = vst.msk [vmem:[#allocation2 + $0x51] sm:$0xff] %vm328_vm1, %v389_v19  ;;  %421 = vst.msk [vmem:[#allocation2 + $0x49] sm:$0xff] %vm328_vm1, %v388_v20 }
  0x3e   : > { %424 = vst.msk [vmem:[#allocation2 + $0x69] sm:$0xff] %vm328_vm1, %v391_v21  ;;  %423 = vst.msk [vmem:[#allocation2 + $0x61] sm:$0xff] %vm328_vm1, %v390_v22 }
  0x3f   : > { %426 = vst.msk [vmem:[#allocation2 + $0x81] sm:$0xff] %vm328_vm1, %v393_v23  ;;  %425 = vst.msk [vmem:[#allocation2 + $0x79] sm:$0xff] %vm328_vm1, %v392_v24  ;;  %559 = vrot.lane.b32.xlu1 %v472_v55, %s8493_s8 }
  0x40   : > { %428 = vst.msk [vmem:[#allocation2 + $0x99] sm:$0xff] %vm328_vm1, %v395_v25  ;;  %427 = vst.msk [vmem:[#allocation2 + $0x91] sm:$0xff] %vm328_vm1, %v394_v26  ;;  %557 = vrot.lane.b32.xlu0 %v471_v56, %s8493_s8 }
  0x41   : > { %430 = vst.msk [vmem:[#allocation2 + $0xb1] sm:$0xff] %vm328_vm1, %v397_v27  ;;  %429 = vst.msk [vmem:[#allocation2 + $0xa9] sm:$0xff] %vm328_vm1, %v396_v28 }
  0x42   : > { %432 = vst.msk [vmem:[#allocation2 + $0xc9] sm:$0xff] %vm328_vm1, %v399_v29  ;;  %431 = vst.msk [vmem:[#allocation2 + $0xc1] sm:$0xff] %vm328_vm1, %v398_v30 }
  0x43   : > { %434 = vst.msk [vmem:[#allocation2 + $0xe1] sm:$0xff] %vm328_vm1, %v401_v33  ;;  %433 = vst.msk [vmem:[#allocation2 + $0xd9] sm:$0xff] %vm328_vm1, %v400_v34  ;;  %563 = vrot.lane.b32.xlu1 %v474_v59, %s8493_s8 }
  0x44   : > { %436 = vst.msk [vmem:[#allocation2 + $0xf9] sm:$0xff] %vm328_vm1, %v403_v37  ;;  %435 = vst.msk [vmem:[#allocation2 + $0xf1] sm:$0xff] %vm328_vm1, %v402_v38  ;;  %561 = vrot.lane.b32.xlu0 %v473_v60, %s8493_s8 }
  0x45   : > { %438 = vst.msk [vmem:[#allocation2 + $0x111] sm:$0xff] %vm328_vm1, %v405_v41  ;;  %437 = vst.msk [vmem:[#allocation2 + $0x109] sm:$0xff] %vm328_vm1, %v404_v42 }
  0x46   : > { %440 = vst.msk [vmem:[#allocation2 + $0x129] sm:$0xff] %vm328_vm1, %v407_v45  ;;  %439 = vst.msk [vmem:[#allocation2 + $0x121] sm:$0xff] %vm328_vm1, %v406_v46 }
  0x47   : > { %442 = vst.msk [vmem:[#allocation2 + $0x141] sm:$0xff] %vm328_vm1, %v409_v49  ;;  %441 = vst.msk [vmem:[#allocation2 + $0x139] sm:$0xff] %vm328_vm1, %v408_v50  ;;  %567 = vrot.lane.b32.xlu1 %v476_v61, %s8493_s8 }
  0x48   : > { %444 = vst.msk [vmem:[#allocation2 + $0x159] sm:$0xff] %vm328_vm1, %v411_v53  ;;  %443 = vst.msk [vmem:[#allocation2 + $0x151] sm:$0xff] %vm328_vm1, %v410_v54  ;;  %565 = vrot.lane.b32.xlu0 %v475_v62, %s8493_s8 }
  0x49   : > { %446 = vst.msk [vmem:[#allocation2 + $0x171] sm:$0xff] %vm328_vm1, %v413_v57  ;;  %445 = vst.msk [vmem:[#allocation2 + $0x169] sm:$0xff] %vm328_vm1, %v412_v58 }
  0x4a   : > { %vm9772_vm5 = vmpackc.low %vm328_vm1, %vm328_vm1 }
  0x4b   : > { %571 = vrot.lane.b32.xlu1 %v478_v63, %s8493_s8 }
  0x4c   : > { %569 = vrot.lane.b32.xlu0 %v477_v1, %s8493_s8 }
  0x4f   : > { %575 = vrot.lane.b32.xlu1 %v480_v7, %s8493_s8 }
  0x50   : > { %573 = vrot.lane.b32.xlu0 %v479_v8, %s8493_s8 }
  0x85   : > { %v518_v3 = vpop.permute.xlu1 %517  ;;  %v514_v4 = vpop.permute.xlu0 %513 }
  0x86   : > { %612 = vst.msk [vmem:[#allocation2 + $0x31] sm:$0xff] %vm609_vm3, %v518_v3  ;;  %610 = vst.msk [vmem:[#allocation2 + $0x19] sm:$0xff] %vm609_vm3, %v514_v4  ;;  %v642_v3 = vld [vmem:[#allocation2] sm:$0xff]  ;;  %v643_v4 = vld [vmem:[#allocation2 + $0x8] sm:$0xff] }
  0x89   : > { %v520_v5 = vpop.permute.xlu1 %519  ;;  %v516_v6 = vpop.permute.xlu0 %515 }
  0x8a   : > { %613 = vst.msk [vmem:[#allocation2 + $0x39] sm:$0xff] %vm609_vm3, %v520_v5  ;;  %611 = vst.msk [vmem:[#allocation2 + $0x21] sm:$0xff] %vm609_vm3, %v516_v6  ;;  %v9033_v5 = vld [vmem:[%s10378_s2 + $0x18] sm:$0xff] }
  0x8d   : > { %v8883_v9 = vld [vmem:[#allocation2 + $0x19] sm:$0xff]  ;;  %v524_v10 = vpop.permute.xlu1 %523  ;;  %v522_v11 = vpop.permute.xlu0 %521  ;;  %v8889_v12 = vld [vmem:[#allocation2 + $0x31] sm:$0xff] }
  0x8e   : > { %7323 = vmatprep.mubr.msk.f32.mxu0 %vm272_vm0, %v8883_v9  ;;  %615 = vst.msk [vmem:[#allocation2 + $0x51] sm:$0xff] %vm609_vm3, %v524_v10  ;;  %614 = vst.msk [vmem:[#allocation2 + $0x49] sm:$0xff] %vm609_vm3, %v522_v11  ;;  %v9036_v6 = vld [vmem:[#allocation2 + $0x18] sm:$0xff]  ;;  %v9046_v8 = vld [vmem:[#allocation2 + $0x30] sm:$0xff] }
  0x91   : > { %v8891_v13 = vld [vmem:[#allocation2 + $0x21] sm:$0xff]  ;;  %v528_v14 = vpop.permute.xlu1 %527  ;;  %v526_v15 = vpop.permute.xlu0 %525  ;;  %v8899_v16 = vld [vmem:[#allocation2 + $0x39] sm:$0xff] }
  0x92   : > { %7324 = vmatmul.mubr.msk.f32.gmra.mrb[2].mxu0 %vm272_vm0, %v8891_v13  ;;  %617 = vst.msk [vmem:[#allocation2 + $0x69] sm:$0xff] %vm609_vm3, %v528_v14  ;;  %616 = vst.msk [vmem:[#allocation2 + $0x61] sm:$0xff] %vm609_vm3, %v526_v15  ;;  %v9042_v7 = vld [vmem:[#allocation2 + $0x20] sm:$0xff]  ;;  %v9050_v10 = vld [vmem:[#allocation2 + $0x38] sm:$0xff] }
  0x93   : > { %7326 = vmatprep.mubr.msk.f32.mxu0 %vm272_vm0, %v8889_v12 }
  0x95   : > { %v532_v17 = vpop.permute.xlu1 %531  ;;  %v530_v18 = vpop.permute.xlu0 %529  ;;  %v8901_v19 = vld [vmem:[#allocation2 + $0x49] sm:$0xff]  ;;  %v8909_v20 = vld [vmem:[#allocation2 + $0x51] sm:$0xff] }
  0x96   : > { %7327 = vmatmul.mubr.msk.f32.gmra.mrb[4].mxu0 %vm272_vm0, %v8899_v16  ;;  %619 = vst.msk [vmem:[#allocation2 + $0x81] sm:$0xff] %vm609_vm3, %v532_v17  ;;  %618 = vst.msk [vmem:[#allocation2 + $0x79] sm:$0xff] %vm609_vm3, %v530_v18  ;;  %v9058_v11 = vld [vmem:[#allocation2 + $0x50] sm:$0xff] }
  0x97   : > { %7329 = vmatprep.mubr.msk.f32.mxu0 %vm272_vm0, %v8901_v19 }
  0x99   : > { %v536_v21 = vpop.permute.xlu1 %535  ;;  %v534_v22 = vpop.permute.xlu0 %533  ;;  %v8911_v23 = vld [vmem:[#allocation2 + $0x61] sm:$0xff]  ;;  %v8919_v24 = vld [vmem:[#allocation2 + $0x69] sm:$0xff] }
  0x9a   : > { %7330 = vmatmul.mubr.msk.f32.gmra.mrb[6].mxu0 %vm272_vm0, %v8909_v20  ;;  %621 = vst.msk [vmem:[#allocation2 + $0x99] sm:$0xff] %vm609_vm3, %v536_v21  ;;  %620 = vst.msk [vmem:[#allocation2 + $0x91] sm:$0xff] %vm609_vm3, %v534_v22  ;;  %v9062_v14 = vld [vmem:[#allocation2 + $0x60] sm:$0xff]  ;;  %v9066_v15 = vld [vmem:[#allocation2 + $0x68] sm:$0xff] }
  0x9b   : > { %7332 = vmatprep.mubr.msk.f32.mxu0 %vm272_vm0, %v8911_v23 }
  0x9d   : > { %v540_v25 = vpop.permute.xlu1 %539  ;;  %v538_v26 = vpop.permute.xlu0 %537  ;;  %v8921_v27 = vld [vmem:[#allocation2 + $0x79] sm:$0xff]  ;;  %v8929_v28 = vld [vmem:[#allocation2 + $0x81] sm:$0xff] }
  0x9e   : > { %7333 = vmatmul.mubr.msk.f32.gmra.mrb[8].mxu0 %vm272_vm0, %v8919_v24  ;;  %623 = vst.msk [vmem:[#allocation2 + $0xb1] sm:$0xff] %vm609_vm3, %v540_v25  ;;  %622 = vst.msk [vmem:[#allocation2 + $0xa9] sm:$0xff] %vm609_vm3, %v538_v26  ;;  %v9070_v17 = vld [vmem:[#allocation2 + $0x78] sm:$0xff]  ;;  %v9074_v18 = vld [vmem:[#allocation2 + $0x80] sm:$0xff] }
  0x9f   : > { %7335 = vmatprep.mubr.msk.f32.mxu0 %vm272_vm0, %v8921_v27 }
  0xa1   : > { %v544_v29 = vpop.permute.xlu1 %543  ;;  %v542_v30 = vpop.permute.xlu0 %541  ;;  %v8931_v31 = vld [vmem:[#allocation2 + $0x91] sm:$0xff]  ;;  %v8939_v32 = vld [vmem:[#allocation2 + $0x99] sm:$0xff] }
  0xa2   : > { %7336 = vmatmul.mubr.msk.f32.gmra.mrb[10].mxu0 %vm272_vm0, %v8929_v28  ;;  %625 = vst.msk [vmem:[#allocation2 + $0xc9] sm:$0xff] %vm609_vm3, %v544_v29  ;;  %624 = vst.msk [vmem:[#allocation2 + $0xc1] sm:$0xff] %vm609_vm3, %v542_v30  ;;  %v9078_v21 = vld [vmem:[#allocation2 + $0x90] sm:$0xff]  ;;  %v9082_v22 = vld [vmem:[#allocation2 + $0x98] sm:$0xff] }
  0xa3   : > { %7338 = vmatprep.mubr.msk.f32.mxu0 %vm272_vm0, %v8931_v31 }
  0xa5   : > { %v548_v33 = vpop.permute.xlu1 %547  ;;  %v546_v34 = vpop.permute.xlu0 %545  ;;  %v8941_v35 = vld [vmem:[#allocation2 + $0xa9] sm:$0xff]  ;;  %v8949_v36 = vld [vmem:[#allocation2 + $0xb1] sm:$0xff] }
  0xa6   : > { %7339 = vmatmul.mubr.msk.f32.gmra.mrb[12].mxu0 %vm272_vm0, %v8939_v32  ;;  %627 = vst.msk [vmem:[#allocation2 + $0xe1] sm:$0xff] %vm609_vm3, %v548_v33  ;;  %626 = vst.msk [vmem:[#allocation2 + $0xd9] sm:$0xff] %vm609_vm3, %v546_v34  ;;  %v9086_v25 = vld [vmem:[#allocation2 + $0xa8] sm:$0xff]  ;;  %v9090_v26 = vld [vmem:[#allocation2 + $0xb0] sm:$0xff] }
  0xa7   : > { %7341 = vmatprep.mubr.msk.f32.mxu0 %vm272_vm0, %v8941_v35 }
  0xa9   : > { %v552_v37 = vpop.permute.xlu1 %551  ;;  %v550_v38 = vpop.permute.xlu0 %549  ;;  %v8951_v39 = vld [vmem:[#allocation2 + $0xc1] sm:$0xff]  ;;  %v8959_v40 = vld [vmem:[#allocation2 + $0xc9] sm:$0xff] }
  0xaa   : > { %7342 = vmatmul.mubr.msk.f32.gmra.mrb[14].mxu0 %vm272_vm0, %v8949_v36  ;;  %629 = vst.msk [vmem:[#allocation2 + $0xf9] sm:$0xff] %vm609_vm3, %v552_v37  ;;  %628 = vst.msk [vmem:[#allocation2 + $0xf1] sm:$0xff] %vm609_vm3, %v550_v38  ;;  %v9094_v29 = vld [vmem:[#allocation2 + $0xc0] sm:$0xff]  ;;  %v9098_v30 = vld [vmem:[#allocation2 + $0xc8] sm:$0xff] }
  0xab   : > { %7344 = vmatprep.mubr.msk.f32.mxu0 %vm272_vm0, %v8951_v39 }
  0xad   : > { %v556_v41 = vpop.permute.xlu1 %555  ;;  %v8961_v43 = vld [vmem:[#allocation2 + $0xd9] sm:$0xff]  ;;  %v8969_v44 = vld [vmem:[#allocation2 + $0xe1] sm:$0xff] }
  0xae   : > { %v554_v42 = vpop.permute.xlu0 %553  ;;  %7345 = vmatmul.mubr.msk.f32.gmra.mrb[16].mxu0 %vm272_vm0, %v8959_v40  ;;  %631 = vst.msk [vmem:[#allocation2 + $0x111] sm:$0xff] %vm609_vm3, %v556_v41  ;;  %v9102_v33 = vld [vmem:[#allocation2 + $0xd8] sm:$0xff]  ;;  %v9106_v34 = vld [vmem:[#allocation2 + $0xe0] sm:$0xff] }
  0xaf   : > { %630 = vst.msk [vmem:[#allocation2 + $0x109] sm:$0xff] %vm609_vm3, %v554_v42  ;;  %7347 = vmatprep.mubr.msk.f32.mxu0 %vm272_vm0, %v8961_v43 }
  0xb1   : > { %v560_v45 = vpop.permute.xlu1 %559  ;;  %v8971_v47 = vld [vmem:[#allocation2 + $0xf1] sm:$0xff]  ;;  %v8979_v48 = vld [vmem:[#allocation2 + $0xf9] sm:$0xff] }
  0xb2   : > { %v558_v46 = vpop.permute.xlu0 %557  ;;  %7348 = vmatmul.mubr.msk.f32.gmra.mrb[18].mxu0 %vm272_vm0, %v8969_v44  ;;  %633 = vst.msk [vmem:[#allocation2 + $0x129] sm:$0xff] %vm609_vm3, %v560_v45  ;;  %v9110_v37 = vld [vmem:[#allocation2 + $0xf0] sm:$0xff]  ;;  %v9114_v38 = vld [vmem:[#allocation2 + $0xf8] sm:$0xff] }
  0xb3   : > { %632 = vst.msk [vmem:[#allocation2 + $0x121] sm:$0xff] %vm609_vm3, %v558_v46  ;;  %7350 = vmatprep.mubr.msk.f32.mxu0 %vm272_vm0, %v8971_v47 }
  0xb5   : > { %v564_v49 = vpop.permute.xlu1 %563  ;;  %v8989_v52 = vld [vmem:[#allocation2 + $0x111] sm:$0xff] }
  0xb6   : > { %v562_v50 = vpop.permute.xlu0 %561  ;;  %v8981_v51 = vld [vmem:[#allocation2 + $0x109] sm:$0xff]  ;;  %7351 = vmatmul.mubr.msk.f32.gmra.mrb[20].mxu0 %vm272_vm0, %v8979_v48  ;;  %635 = vst.msk [vmem:[#allocation2 + $0x141] sm:$0xff] %vm609_vm3, %v564_v49 }
  0xb7   : > { %634 = vst.msk [vmem:[#allocation2 + $0x139] sm:$0xff] %vm609_vm3, %v562_v50  ;;  %7353 = vmatprep.mubr.msk.f32.mxu0 %vm272_vm0, %v8981_v51  ;;  %v9118_v41 = vld [vmem:[#allocation2 + $0x108] sm:$0xff]  ;;  %v9122_v42 = vld [vmem:[#allocation2 + $0x110] sm:$0xff] }
  0xb9   : > { %v568_v53 = vpop.permute.xlu1 %567  ;;  %v8999_v56 = vld [vmem:[#allocation2 + $0x129] sm:$0xff] }
  0xba   : > { %v566_v54 = vpop.permute.xlu0 %565  ;;  %v8991_v55 = vld [vmem:[#allocation2 + $0x121] sm:$0xff]  ;;  %7354 = vmatmul.mubr.msk.f32.gmra.mrb[22].mxu0 %vm272_vm0, %v8989_v52  ;;  %637 = vst.msk [vmem:[#allocation2 + $0x159] sm:$0xff] %vm609_vm3, %v568_v53  ;;  %v415_v53 = vld [vmem:[%s8756_s11 + $0xf8] sm:$0xff] }
  0xbb   : > { %636 = vst.msk [vmem:[#allocation2 + $0x151] sm:$0xff] %vm609_vm3, %v566_v54  ;;  %7356 = vmatprep.mubr.msk.f32.mxu0 %vm272_vm0, %v8991_v55  ;;  %v9126_v45 = vld [vmem:[#allocation2 + $0x120] sm:$0xff]  ;;  %v9130_v46 = vld [vmem:[#allocation2 + $0x128] sm:$0xff] }
  0xbc   : > { %448 = vst.msk [vmem:[#allocation2 + $0x189] sm:$0xff] %vm328_vm1, %v415_v53 }
  0xbd   : > { %v572_v57 = vpop.permute.xlu1 %571  ;;  %v9009_v60 = vld [vmem:[#allocation2 + $0x141] sm:$0xff] }
  0xbe   : > { %v570_v58 = vpop.permute.xlu0 %569  ;;  %v9001_v59 = vld [vmem:[#allocation2 + $0x139] sm:$0xff]  ;;  %7357 = vmatmul.mubr.msk.f32.gmra.mrb[24].mxu0 %vm272_vm0, %v8999_v56  ;;  %639 = vst.msk [vmem:[#allocation2 + $0x171] sm:$0xff] %vm609_vm3, %v572_v57  ;;  %v414_v57 = vld [vmem:[%s8756_s11 + $0xf0] sm:$0xff] }
  0xbf   : > { %638 = vst.msk [vmem:[#allocation2 + $0x169] sm:$0xff] %vm609_vm3, %v570_v58  ;;  %7359 = vmatprep.mubr.msk.f32.mxu0 %vm272_vm0, %v9001_v59  ;;  %v9134_v49 = vld [vmem:[#allocation2 + $0x138] sm:$0xff]  ;;  %v9142_v58 = vld [vmem:[#allocation2 + $0x140] sm:$0xff] }
  0xc0   : > { %447 = vst.msk [vmem:[#allocation2 + $0x181] sm:$0xff] %vm328_vm1, %v414_v57  ;;  %v1352_v57 = vld [vmem:[#allocation2 + $0xa] sm:$0xff] }
  0xc1   : > { %v9017_v62 = vld [vmem:[#allocation2 + $0x159] sm:$0xff]  ;;  %v576_v50 = vpop.permute.xlu1 %575 }
  0xc2   : > { %v9011_v61 = vld [vmem:[#allocation2 + $0x151] sm:$0xff]  ;;  %7360 = vmatmul.mubr.msk.f32.gmra.mrb[26].mxu0 %vm272_vm0, %v9009_v60  ;;  %v574_v54 = vpop.permute.xlu0 %573  ;;  %641 = vst.msk [vmem:[#allocation2 + $0x189] sm:$0xff] %vm609_vm3, %v576_v50  ;;  %v1351_v50 = vld [vmem:[#allocation2 + $0x2] sm:$0xff] }
  0xc3   : > { %7362 = vmatprep.mubr.msk.f32.mxu0 %vm272_vm0, %v9011_v61  ;;  %640 = vst.msk [vmem:[#allocation2 + $0x181] sm:$0xff] %vm609_vm3, %v574_v54 }
  0xc5   : > { %v9025_v1 = vld [vmem:[#allocation2 + $0x171] sm:$0xff] }
  0xc6   : > { %v9019_v63 = vld [vmem:[#allocation2 + $0x169] sm:$0xff]  ;;  %7363 = vmatmul.mubr.msk.f32.gmra.mrb[28].mxu0 %vm272_vm0, %v9017_v62  ;;  %10442 = vst [vmem:[#allocation5_spill] sm:$0xff] %v9025_v1 }
  0xc7   : > { %10441 = vst [vmem:[#allocation4_spill] sm:$0xff] %v9019_v63  ;;  %7365 = vmatprep.mubr.msk.f32.mxu0 %vm272_vm0, %v9019_v63  ;;  %v9156_v53 = vld [vmem:[#allocation2 + $0x168] sm:$0xff]  ;;  %v9160_v54 = vld [vmem:[#allocation2 + $0x170] sm:$0xff] }
  0xc8   : > { %v9177_v63 = vld [vmem:[#allocation2 + $0x22] sm:$0xff] }
  0xc9   : > { %10444 = vst [vmem:[#allocation7_spill] sm:$0xff] %v9177_v63 }
  0xca   : > { %7366 = vmatmul.mubr.msk.f32.gmra.mrb[30].mxu0 %vm272_vm0, %v9025_v1  ;;  %v9171_v1 = vld [vmem:[#allocation2 + $0x1a] sm:$0xff] }
  0xcb   : > { %7370 = vmatprep.mubr.msk.f32.mxu0 %vm272_vm0, %v642_v3  ;;  %v9148_v3 = vld [vmem:[#allocation2 + $0x150] sm:$0xff]  ;;  %10443 = vst [vmem:[#allocation6_spill] sm:$0xff] %v9171_v1 }
  0xce   : > { %7371 = vmatmul.mubr.msk.f32.vlgmr.msra.gmra.mrb[0].mxu0 %vm272_vm0, %v643_v4  ;;  %v9152_v4 = vld [vmem:[#allocation2 + $0x158] sm:$0xff] }
  0xcf   : > { %7419 = vmatpush3.msra.mxu0 %v8872_v2  ;;  %7373 = vmatprep.mubr.msk.f32.mxu0 %vm272_vm0, %v9036_v6  ;;  %v9054_v2 = vld [vmem:[#allocation2 + $0x48] sm:$0xff] }
  0xd0   : > { %7468 = vmatprep.subr.mxu0 %v9033_v5 }
  0xd2   : > { %7374 = vmatmul.mubr.msk.f32.gmra.mrb[2].mxu0 %vm272_vm0, %v9042_v7 }
  0xd3   : > { %7376 = vmatprep.mubr.msk.f32.mxu0 %vm272_vm0, %v9046_v8 }
  0xd6   : > { %7377 = vmatmul.mubr.msk.f32.gmra.mrb[4].mxu0 %vm272_vm0, %v9050_v10 }
  0xd7   : > { %7379 = vmatprep.mubr.msk.f32.mxu0 %vm272_vm0, %v9054_v2 }
  0xda   : > { %7380 = vmatmul.mubr.msk.f32.gmra.mrb[6].mxu0 %vm272_vm0, %v9058_v11 }
  0xdb   : > { %7382 = vmatprep.mubr.msk.f32.mxu0 %vm272_vm0, %v9062_v14 }
  0xde   : > { %7383 = vmatmul.mubr.msk.f32.gmra.mrb[8].mxu0 %vm272_vm0, %v9066_v15 }
  0xdf   : > { %7385 = vmatprep.mubr.msk.f32.mxu0 %vm272_vm0, %v9070_v17 }
  0xe2   : > { %7386 = vmatmul.mubr.msk.f32.gmra.mrb[10].mxu0 %vm272_vm0, %v9074_v18 }
  0xe3   : > { %7388 = vmatprep.mubr.msk.f32.mxu0 %vm272_vm0, %v9078_v21 }
  0xe6   : > { %7389 = vmatmul.mubr.msk.f32.gmra.mrb[12].mxu0 %vm272_vm0, %v9082_v22 }
  0xe7   : > { %7391 = vmatprep.mubr.msk.f32.mxu0 %vm272_vm0, %v9086_v25 }
  0xea   : > { %7392 = vmatmul.mubr.msk.f32.gmra.mrb[14].mxu0 %vm272_vm0, %v9090_v26 }
  0xeb   : > { %7394 = vmatprep.mubr.msk.f32.mxu0 %vm272_vm0, %v9094_v29 }
  0xee   : > { %7395 = vmatmul.mubr.msk.f32.gmra.mrb[16].mxu0 %vm272_vm0, %v9098_v30 }
  0xef   : > { %7397 = vmatprep.mubr.msk.f32.mxu0 %vm272_vm0, %v9102_v33 }
  0xf2   : > { %7398 = vmatmul.mubr.msk.f32.gmra.mrb[18].mxu0 %vm272_vm0, %v9106_v34 }
  0xf3   : > { %7400 = vmatprep.mubr.msk.f32.mxu0 %vm272_vm0, %v9110_v37 }
  0xf6   : > { %7401 = vmatmul.mubr.msk.f32.gmra.mrb[20].mxu0 %vm272_vm0, %v9114_v38 }
  0xf7   : > { %7403 = vmatprep.mubr.msk.f32.mxu0 %vm272_vm0, %v9118_v41 }
  0xfa   : > { %7404 = vmatmul.mubr.msk.f32.gmra.mrb[22].mxu0 %vm272_vm0, %v9122_v42 }
  0xfb   : > { %7406 = vmatprep.mubr.msk.f32.mxu0 %vm272_vm0, %v9126_v45 }
  0xfe   : > { %7407 = vmatmul.mubr.msk.f32.gmra.mrb[24].mxu0 %vm272_vm0, %v9130_v46 }
  0xff   : > { %7409 = vmatprep.mubr.msk.f32.mxu0 %vm272_vm0, %v9134_v49 }
 0x102   : > { %7410 = vmatmul.mubr.msk.f32.gmra.mrb[26].mxu0 %vm272_vm0, %v9142_v58 }
 0x103   : > { %7412 = vmatprep.mubr.msk.f32.mxu0 %vm272_vm0, %v9148_v3 }
 0x106   : > { %7413 = vmatmul.mubr.msk.f32.gmra.mrb[28].mxu0 %vm272_vm0, %v9152_v4 }
 0x107   : > { %7415 = vmatprep.mubr.msk.f32.mxu0 %vm272_vm0, %v9156_v53 }
 0x10a   : > { %7416 = vmatmul.mubr.msk.f32.gmra.mrb[30].mxu0 %vm272_vm0, %v9160_v54 }
 0x10b   : > { %7420 = vmatprep.mubr.msk.f32.mxu0 %vm272_vm0, %v1351_v50  ;;  %v9181_v50 = vld [vmem:[#allocation2 + $0x32] sm:$0xff] }
 0x10c   : > { %10445 = vst [vmem:[#allocation8_spill] sm:$0xff] %v9181_v50 }
 0x10e   : > { %7421 = vmatmul.mubr.msk.f32.vlgmr.msra.gmra.mrb[0].mxu0 %vm272_vm0, %v1352_v57  ;;  %v9185_v57 = vld [vmem:[#allocation2 + $0x3a] sm:$0xff] }
 0x10f   : > { %7469 = vmatpush3.msra.mxu0 %v9033_v5  ;;  %7423 = vmatprep.mubr.msk.f32.mxu0 %vm272_vm0, %v9171_v1  ;;  %10446 = vst [vmem:[#allocation9_spill] sm:$0xff] %v9185_v57  ;;  %v9189_v5 = vld [vmem:[#allocation2 + $0x4a] sm:$0xff]  ;;  %v9193_v1 = vld [vmem:[#allocation2 + $0x52] sm:$0xff] }
 0x110   : > { %7518 = vmatprep.subr.mxu0 %v9168_v0  ;;  %10447 = vst [vmem:[#allocation10_spill] sm:$0xff] %v9189_v5  ;;  %10448 = vst [vmem:[#allocation11_spill] sm:$0xff] %v9193_v1 }
 0x112   : > { %7424 = vmatmul.mubr.msk.f32.gmra.mrb[2].mxu0 %vm272_vm0, %v9177_v63  ;;  %v9197_v63 = vld [vmem:[#allocation2 + $0x62] sm:$0xff] }
 0x113   : > { %7426 = vmatprep.mubr.msk.f32.mxu0 %vm272_vm0, %v9181_v50  ;;  %10449 = vst [vmem:[#allocation12_spill] sm:$0xff] %v9197_v63  ;;  %v9201_v50 = vld [vmem:[#allocation2 + $0x6a] sm:$0xff] }
 0x114   : > { %10450 = vst [vmem:[#allocation13_spill] sm:$0xff] %v9201_v50 }
 0x116   : > { %7427 = vmatmul.mubr.msk.f32.gmra.mrb[4].mxu0 %vm272_vm0, %v9185_v57  ;;  %v9205_v57 = vld [vmem:[#allocation2 + $0x7a] sm:$0xff] }
 0x117   : > { %7429 = vmatprep.mubr.msk.f32.mxu0 %vm272_vm0, %v9189_v5  ;;  %10451 = vst [vmem:[#allocation14_spill] sm:$0xff] %v9205_v57  ;;  %v9209_v5 = vld [vmem:[#allocation2 + $0x82] sm:$0xff] }
 0x118   : > { %10452 = vst [vmem:[#allocation15_spill] sm:$0xff] %v9209_v5 }
 0x11a   : > { %7430 = vmatmul.mubr.msk.f32.gmra.mrb[6].mxu0 %vm272_vm0, %v9193_v1  ;;  %v9213_v1 = vld [vmem:[#allocation2 + $0x92] sm:$0xff] }
 0x11b   : > { %7432 = vmatprep.mubr.msk.f32.mxu0 %vm272_vm0, %v9197_v63  ;;  %10453 = vst [vmem:[#allocation16_spill] sm:$0xff] %v9213_v1  ;;  %v9217_v63 = vld [vmem:[#allocation2 + $0x9a] sm:$0xff] }
 0x11c   : > { %10454 = vst [vmem:[#allocation17_spill] sm:$0xff] %v9217_v63 }
 0x11e   : > { %7433 = vmatmul.mubr.msk.f32.gmra.mrb[8].mxu0 %vm272_vm0, %v9201_v50  ;;  %v9221_v50 = vld [vmem:[#allocation2 + $0xaa] sm:$0xff] }
 0x11f   : > { %7435 = vmatprep.mubr.msk.f32.mxu0 %vm272_vm0, %v9205_v57  ;;  %10455 = vst [vmem:[#allocation18_spill] sm:$0xff] %v9221_v50  ;;  %v9225_v57 = vld [vmem:[#allocation2 + $0xb2] sm:$0xff] }
 0x120   : > { %10456 = vst [vmem:[#allocation19_spill] sm:$0xff] %v9225_v57 }
 0x122   : > { %7436 = vmatmul.mubr.msk.f32.gmra.mrb[10].mxu0 %vm272_vm0, %v9209_v5  ;;  %v9229_v5 = vld [vmem:[#allocation2 + $0xc2] sm:$0xff] }
 0x123   : > { %7438 = vmatprep.mubr.msk.f32.mxu0 %vm272_vm0, %v9213_v1  ;;  %10457 = vst [vmem:[#allocation20_spill] sm:$0xff] %v9229_v5  ;;  %v9233_v1 = vld [vmem:[#allocation2 + $0xca] sm:$0xff] }
 0x124   : > { %10458 = vst [vmem:[#allocation21_spill] sm:$0xff] %v9233_v1 }
 0x126   : > { %7439 = vmatmul.mubr.msk.f32.gmra.mrb[12].mxu0 %vm272_vm0, %v9217_v63  ;;  %v9237_v63 = vld [vmem:[#allocation2 + $0xda] sm:$0xff] }
 0x127   : > { %7441 = vmatprep.mubr.msk.f32.mxu0 %vm272_vm0, %v9221_v50  ;;  %10459 = vst [vmem:[#allocation22_spill] sm:$0xff] %v9237_v63  ;;  %v9241_v50 = vld [vmem:[#allocation2 + $0xe2] sm:$0xff] }
 0x128   : > { %10460 = vst [vmem:[#allocation23_spill] sm:$0xff] %v9241_v50 }
 0x12a   : > { %7442 = vmatmul.mubr.msk.f32.gmra.mrb[14].mxu0 %vm272_vm0, %v9225_v57  ;;  %v9245_v57 = vld [vmem:[#allocation2 + $0xf2] sm:$0xff] }
 0x12b   : > { %7444 = vmatprep.mubr.msk.f32.mxu0 %vm272_vm0, %v9229_v5  ;;  %10461 = vst [vmem:[#allocation24_spill] sm:$0xff] %v9245_v57  ;;  %v9249_v5 = vld [vmem:[#allocation2 + $0xfa] sm:$0xff] }
 0x12c   : > { %10462 = vst [vmem:[#allocation25_spill] sm:$0xff] %v9249_v5 }
 0x12e   : > { %7445 = vmatmul.mubr.msk.f32.gmra.mrb[16].mxu0 %vm272_vm0, %v9233_v1  ;;  %v9253_v1 = vld [vmem:[#allocation2 + $0x10a] sm:$0xff] }
 0x12f   : > { %7447 = vmatprep.mubr.msk.f32.mxu0 %vm272_vm0, %v9237_v63  ;;  %10463 = vst [vmem:[#allocation26_spill] sm:$0xff] %v9253_v1  ;;  %v9257_v63 = vld [vmem:[#allocation2 + $0x112] sm:$0xff] }
 0x130   : > { %10464 = vst [vmem:[#allocation27_spill] sm:$0xff] %v9257_v63 }
 0x132   : > { %7448 = vmatmul.mubr.msk.f32.gmra.mrb[18].mxu0 %vm272_vm0, %v9241_v50  ;;  %v9261_v50 = vld [vmem:[#allocation2 + $0x122] sm:$0xff] }
 0x133   : > { %7450 = vmatprep.mubr.msk.f32.mxu0 %vm272_vm0, %v9245_v57  ;;  %10465 = vst [vmem:[#allocation28_spill] sm:$0xff] %v9261_v50  ;;  %v9265_v57 = vld [vmem:[#allocation2 + $0x12a] sm:$0xff] }
 0x134   : > { %10466 = vst [vmem:[#allocation29_spill] sm:$0xff] %v9265_v57 }
 0x136   : > { %7451 = vmatmul.mubr.msk.f32.gmra.mrb[20].mxu0 %vm272_vm0, %v9249_v5  ;;  %v9269_v5 = vld [vmem:[#allocation2 + $0x13a] sm:$0xff] }
 0x137   : > { %7453 = vmatprep.mubr.msk.f32.mxu0 %vm272_vm0, %v9253_v1  ;;  %10467 = vst [vmem:[#allocation30_spill] sm:$0xff] %v9269_v5  ;;  %v9273_v1 = vld [vmem:[#allocation2 + $0x142] sm:$0xff] }
 0x13a   : > { %7454 = vmatmul.mubr.msk.f32.gmra.mrb[22].mxu0 %vm272_vm0, %v9257_v63  ;;  %v9277_v63 = vld [vmem:[#allocation2 + $0x152] sm:$0xff] }
 0x13b   : > { %7456 = vmatprep.mubr.msk.f32.mxu0 %vm272_vm0, %v9261_v50  ;;  %10468 = vst [vmem:[#allocation31_spill] sm:$0xff] %v9277_v63  ;;  %v9281_v50 = vld [vmem:[#allocation2 + $0x15a] sm:$0xff] }
 0x13e   : > { %7457 = vmatmul.mubr.msk.f32.gmra.mrb[24].mxu0 %vm272_vm0, %v9265_v57  ;;  %v9285_v57 = vld [vmem:[#allocation2 + $0x16a] sm:$0xff] }
 0x13f   : > { %7459 = vmatprep.mubr.msk.f32.mxu0 %vm272_vm0, %v9269_v5  ;;  %10469 = vst [vmem:[#allocation32_spill] sm:$0xff] %v9285_v57  ;;  %v9289_v5 = vld [vmem:[#allocation2 + $0x172] sm:$0xff] }
 0x142   : > { %7460 = vmatmul.mubr.msk.f32.gmra.mrb[26].mxu0 %vm272_vm0, %v9273_v1 }
 0x143   : > { %7462 = vmatprep.mubr.msk.f32.mxu0 %vm272_vm0, %v9277_v63  ;;  %v6272_v63 = vld [vmem:[%s10378_s2 + $0x28] sm:$0xff] }
 0x146   : > { %7463 = vmatmul.mubr.msk.f32.gmra.mrb[28].mxu0 %vm272_vm0, %v9281_v50 }
 0x147   : > { %7465 = vmatprep.mubr.msk.f32.mxu0 %vm272_vm0, %v9285_v57 }
 0x14a   : > { %7466 = vmatmul.mubr.msk.f32.gmra.mrb[30].mxu0 %vm272_vm0, %v9289_v5 }
 0x14b   : > { %7470 = vmatprep.mubr.msk.f32.mxu0 %vm272_vm0, %v9036_v6  ;;  %v9361_v6 = vld [vmem:[#allocation2 + $0x188] sm:$0xff] }
 0x14e   : > { %7471 = vmatmul.mubr.msk.f32.vlgmr.msra.gmra.mrb[0].mxu0 %vm272_vm0, %v9042_v7  ;;  %v6305_v7 = vld [vmem:[%s10378_s2 + $0x30] sm:$0xff] }
 0x14f   : > { %7519 = vmatpush3.msra.mxu0 %v9168_v0  ;;  %7473 = vmatprep.mubr.msk.f32.mxu0 %vm272_vm0, %v9046_v8  ;;  %v9355_v0 = vld [vmem:[#allocation2 + $0x180] sm:$0xff] }
 0x150   : > { %7568 = vmatprep.subr.mxu0 %v6272_v63 }
 0x152   : > { %7474 = vmatmul.mubr.msk.f32.gmra.mrb[2].mxu0 %vm272_vm0, %v9050_v10 }
 0x153   : > { %7476 = vmatprep.mubr.msk.f32.mxu0 %vm272_vm0, %v9054_v2 }
 0x156   : > { %7477 = vmatmul.mubr.msk.f32.gmra.mrb[4].mxu0 %vm272_vm0, %v9058_v11 }
 0x157   : > { %7479 = vmatprep.mubr.msk.f32.mxu0 %vm272_vm0, %v9062_v14 }
 0x15a   : > { %7480 = vmatmul.mubr.msk.f32.gmra.mrb[6].mxu0 %vm272_vm0, %v9066_v15 }
 0x15b   : > { %7482 = vmatprep.mubr.msk.f32.mxu0 %vm272_vm0, %v9070_v17 }
 0x15e   : > { %7483 = vmatmul.mubr.msk.f32.gmra.mrb[8].mxu0 %vm272_vm0, %v9074_v18 }
 0x15f   : > { %7485 = vmatprep.mubr.msk.f32.mxu0 %vm272_vm0, %v9078_v21 }
 0x162   : > { %7486 = vmatmul.mubr.msk.f32.gmra.mrb[10].mxu0 %vm272_vm0, %v9082_v22 }
 0x163   : > { %7488 = vmatprep.mubr.msk.f32.mxu0 %vm272_vm0, %v9086_v25 }
 0x166   : > { %7489 = vmatmul.mubr.msk.f32.gmra.mrb[12].mxu0 %vm272_vm0, %v9090_v26 }
 0x167   : > { %7491 = vmatprep.mubr.msk.f32.mxu0 %vm272_vm0, %v9094_v29 }
 0x16a   : > { %7492 = vmatmul.mubr.msk.f32.gmra.mrb[14].mxu0 %vm272_vm0, %v9098_v30 }
 0x16b   : > { %7494 = vmatprep.mubr.msk.f32.mxu0 %vm272_vm0, %v9102_v33 }
 0x16e   : > { %7495 = vmatmul.mubr.msk.f32.gmra.mrb[16].mxu0 %vm272_vm0, %v9106_v34 }
 0x16f   : > { %7497 = vmatprep.mubr.msk.f32.mxu0 %vm272_vm0, %v9110_v37 }
 0x172   : > { %7498 = vmatmul.mubr.msk.f32.gmra.mrb[18].mxu0 %vm272_vm0, %v9114_v38 }
 0x173   : > { %7500 = vmatprep.mubr.msk.f32.mxu0 %vm272_vm0, %v9118_v41 }
 0x176   : > { %7501 = vmatmul.mubr.msk.f32.gmra.mrb[20].mxu0 %vm272_vm0, %v9122_v42 }
 0x177   : > { %7503 = vmatprep.mubr.msk.f32.mxu0 %vm272_vm0, %v9126_v45 }
 0x17a   : > { %7504 = vmatmul.mubr.msk.f32.gmra.mrb[22].mxu0 %vm272_vm0, %v9130_v46 }
 0x17b   : > { %7506 = vmatprep.mubr.msk.f32.mxu0 %vm272_vm0, %v9134_v49 }
 0x17e   : > { %7507 = vmatmul.mubr.msk.f32.gmra.mrb[24].mxu0 %vm272_vm0, %v9142_v58 }
 0x17f   : > { %7509 = vmatprep.mubr.msk.f32.mxu0 %vm272_vm0, %v9148_v3 }
 0x182   : > { %7510 = vmatmul.mubr.msk.f32.gmra.mrb[26].mxu0 %vm272_vm0, %v9152_v4 }
 0x183   : > { %7512 = vmatprep.mubr.msk.f32.mxu0 %vm272_vm0, %v9156_v53 }
 0x186   : > { %7513 = vmatmul.mubr.msk.f32.gmra.mrb[28].mxu0 %vm272_vm0, %v9160_v54 }
 0x187   : > { %7515 = vmatprep.mubr.msk.f32.mxu0 %vm272_vm0, %v9355_v0 }
 0x18a   : > { %7516 = vmatmul.mubr.msk.f32.gmra.mrb[30].mxu0 %vm272_vm0, %v9361_v6 }
 0x18b   : > { %7520 = vmatprep.mubr.msk.f32.mxu0 %vm272_vm0, %v8883_v9  ;;  %v10470_v9 = vld [vmem:[#allocation4_spill] sm:$0xff] }
 0x18e   : > { %7521 = vmatmul.mubr.msk.f32.vlgmr.msra.gmra.mrb[0].mxu0 %vm272_vm0, %v8891_v13  ;;  %v9428_v13 = vld [vmem:[#allocation2 + $0x181] sm:$0xff] }
 0x18f   : > { %7569 = vmatpush3.msra.mxu0 %v6272_v63  ;;  %7523 = vmatprep.mubr.msk.f32.mxu0 %vm272_vm0, %v8889_v12  ;;  %v10471_v12 = vld [vmem:[#allocation5_spill] sm:$0xff] }
 0x190   : > { %7618 = vmatprep.subr.mxu0 %v6305_v7  ;;  %v10483_v63 = vld [vmem:[#allocation17_spill] sm:$0xff] }
 0x192   : > { %7524 = vmatmul.mubr.msk.f32.gmra.mrb[2].mxu0 %vm272_vm0, %v8899_v16  ;;  %v9432_v16 = vld [vmem:[#allocation2 + $0x189] sm:$0xff] }
 0x193   : > { %7526 = vmatprep.mubr.msk.f32.mxu0 %vm272_vm0, %v8901_v19  ;;  %v10472_v19 = vld [vmem:[#allocation6_spill] sm:$0xff] }
 0x196   : > { %7527 = vmatmul.mubr.msk.f32.gmra.mrb[4].mxu0 %vm272_vm0, %v8909_v20  ;;  %v6338_v20 = vld [vmem:[%s10378_s2 + $0x38] sm:$0xff] }
 0x197   : > { %7529 = vmatprep.mubr.msk.f32.mxu0 %vm272_vm0, %v8911_v23  ;;  %v10473_v23 = vld [vmem:[#allocation7_spill] sm:$0xff] }
 0x19a   : > { %7530 = vmatmul.mubr.msk.f32.gmra.mrb[6].mxu0 %vm272_vm0, %v8919_v24  ;;  %v10474_v24 = vld [vmem:[#allocation8_spill] sm:$0xff] }
 0x19b   : > { %7532 = vmatprep.mubr.msk.f32.mxu0 %vm272_vm0, %v8921_v27  ;;  %v10475_v27 = vld [vmem:[#allocation9_spill] sm:$0xff] }
 0x19e   : > { %7533 = vmatmul.mubr.msk.f32.gmra.mrb[8].mxu0 %vm272_vm0, %v8929_v28  ;;  %v10476_v28 = vld [vmem:[#allocation10_spill] sm:$0xff] }
 0x19f   : > { %7535 = vmatprep.mubr.msk.f32.mxu0 %vm272_vm0, %v8931_v31  ;;  %v10477_v31 = vld [vmem:[#allocation11_spill] sm:$0xff] }
 0x1a2   : > { %7536 = vmatmul.mubr.msk.f32.gmra.mrb[10].mxu0 %vm272_vm0, %v8939_v32  ;;  %v10478_v32 = vld [vmem:[#allocation12_spill] sm:$0xff] }
 0x1a3   : > { %7538 = vmatprep.mubr.msk.f32.mxu0 %vm272_vm0, %v8941_v35  ;;  %v10479_v35 = vld [vmem:[#allocation13_spill] sm:$0xff] }
 0x1a6   : > { %7539 = vmatmul.mubr.msk.f32.gmra.mrb[12].mxu0 %vm272_vm0, %v8949_v36  ;;  %v10480_v36 = vld [vmem:[#allocation14_spill] sm:$0xff] }
 0x1a7   : > { %7541 = vmatprep.mubr.msk.f32.mxu0 %vm272_vm0, %v8951_v39  ;;  %v10481_v39 = vld [vmem:[#allocation15_spill] sm:$0xff] }
 0x1aa   : > { %7542 = vmatmul.mubr.msk.f32.gmra.mrb[14].mxu0 %vm272_vm0, %v8959_v40  ;;  %v10482_v40 = vld [vmem:[#allocation16_spill] sm:$0xff] }
 0x1ab   : > { %7544 = vmatprep.mubr.msk.f32.mxu0 %vm272_vm0, %v8961_v43 }
 0x1ae   : > { %7545 = vmatmul.mubr.msk.f32.gmra.mrb[16].mxu0 %vm272_vm0, %v8969_v44 }
 0x1af   : > { %7547 = vmatprep.mubr.msk.f32.mxu0 %vm272_vm0, %v8971_v47 }
 0x1b2   : > { %7548 = vmatmul.mubr.msk.f32.gmra.mrb[18].mxu0 %vm272_vm0, %v8979_v48 }
 0x1b3   : > { %7550 = vmatprep.mubr.msk.f32.mxu0 %vm272_vm0, %v8981_v51 }
 0x1b6   : > { %7551 = vmatmul.mubr.msk.f32.gmra.mrb[20].mxu0 %vm272_vm0, %v8989_v52 }
 0x1b7   : > { %7553 = vmatprep.mubr.msk.f32.mxu0 %vm272_vm0, %v8991_v55 }
 0x1ba   : > { %7554 = vmatmul.mubr.msk.f32.gmra.mrb[22].mxu0 %vm272_vm0, %v8999_v56 }
 0x1bb   : > { %7556 = vmatprep.mubr.msk.f32.mxu0 %vm272_vm0, %v9001_v59 }
 0x1be   : > { %7557 = vmatmul.mubr.msk.f32.gmra.mrb[24].mxu0 %vm272_vm0, %v9009_v60 }
 0x1bf   : > { %7559 = vmatprep.mubr.msk.f32.mxu0 %vm272_vm0, %v9011_v61 }
 0x1c2   : > { %7560 = vmatmul.mubr.msk.f32.gmra.mrb[26].mxu0 %vm272_vm0, %v9017_v62 }
 0x1c3   : > { %7562 = vmatprep.mubr.msk.f32.mxu0 %vm272_vm0, %v10470_v9 }
 0x1c6   : > { %7563 = vmatmul.mubr.msk.f32.gmra.mrb[28].mxu0 %vm272_vm0, %v10471_v12 }
 0x1c7   : > { %7565 = vmatprep.mubr.msk.f32.mxu0 %vm272_vm0, %v9428_v13 }
 0x1ca   : > { %7566 = vmatmul.mubr.msk.f32.gmra.mrb[30].mxu0 %vm272_vm0, %v9432_v16 }
 0x1cb   : > { %7570 = vmatprep.mubr.msk.f32.mxu0 %vm272_vm0, %v10472_v19  ;;  %v10485_v19 = vld [vmem:[#allocation19_spill] sm:$0xff] }
 0x1ce   : > { %7571 = vmatmul.mubr.msk.f32.vlgmr.msra.gmra.mrb[0].mxu0 %vm272_vm0, %v10473_v23  ;;  %v10486_v23 = vld [vmem:[#allocation20_spill] sm:$0xff] }
 0x1cf   : > { %7619 = vmatpush3.msra.mxu0 %v6305_v7  ;;  %7573 = vmatprep.mubr.msk.f32.mxu0 %vm272_vm0, %v10474_v24  ;;  %v10484_v7 = vld [vmem:[#allocation18_spill] sm:$0xff] }
 0x1d0   : > { %7668 = vmatprep.subr.mxu0 %v6338_v20 }
 0x1d2   : > { %7574 = vmatmul.mubr.msk.f32.gmra.mrb[2].mxu0 %vm272_vm0, %v10475_v27 }
 0x1d3   : > { %7576 = vmatprep.mubr.msk.f32.mxu0 %vm272_vm0, %v10476_v28 }
 0x1d6   : > { %7577 = vmatmul.mubr.msk.f32.gmra.mrb[4].mxu0 %vm272_vm0, %v10477_v31 }
 0x1d7   : > { %7579 = vmatprep.mubr.msk.f32.mxu0 %vm272_vm0, %v10478_v32 }
 0x1da   : > { %7580 = vmatmul.mubr.msk.f32.gmra.mrb[6].mxu0 %vm272_vm0, %v10479_v35  ;;  %v10487_v35 = vld [vmem:[#allocation21_spill] sm:$0xff] }
 0x1db   : > { %7582 = vmatprep.mubr.msk.f32.mxu0 %vm272_vm0, %v10480_v36  ;;  %v10488_v36 = vld [vmem:[#allocation22_spill] sm:$0xff] }
 0x1de   : > { %7583 = vmatmul.mubr.msk.f32.gmra.mrb[8].mxu0 %vm272_vm0, %v10481_v39  ;;  %v10489_v39 = vld [vmem:[#allocation23_spill] sm:$0xff] }
 0x1df   : > { %7585 = vmatprep.mubr.msk.f32.mxu0 %vm272_vm0, %v10482_v40  ;;  %v10490_v40 = vld [vmem:[#allocation24_spill] sm:$0xff] }
 0x1e2   : > { %7586 = vmatmul.mubr.msk.f32.gmra.mrb[10].mxu0 %vm272_vm0, %v10483_v63  ;;  %v10491_v63 = vld [vmem:[#allocation25_spill] sm:$0xff] }
 0x1e3   : > { %7588 = vmatprep.mubr.msk.f32.mxu0 %vm272_vm0, %v10484_v7  ;;  %v10492_v7 = vld [vmem:[#allocation26_spill] sm:$0xff] }
 0x1e6   : > { %7589 = vmatmul.mubr.msk.f32.gmra.mrb[12].mxu0 %vm272_vm0, %v10485_v19  ;;  %v10493_v19 = vld [vmem:[#allocation27_spill] sm:$0xff] }
 0x1e7   : > { %7591 = vmatprep.mubr.msk.f32.mxu0 %vm272_vm0, %v10486_v23  ;;  %v10494_v23 = vld [vmem:[#allocation28_spill] sm:$0xff] }
 0x1ea   : > { %7592 = vmatmul.mubr.msk.f32.gmra.mrb[14].mxu0 %vm272_vm0, %v10487_v35  ;;  %v10495_v35 = vld [vmem:[#allocation29_spill] sm:$0xff] }
 0x1eb   : > { %7594 = vmatprep.mubr.msk.f32.mxu0 %vm272_vm0, %v10488_v36  ;;  %v10496_v36 = vld [vmem:[#allocation30_spill] sm:$0xff] }
 0x1ee   : > { %7595 = vmatmul.mubr.msk.f32.gmra.mrb[16].mxu0 %vm272_vm0, %v10489_v39 }
 0x1ef   : > { %7597 = vmatprep.mubr.msk.f32.mxu0 %vm272_vm0, %v10490_v40  ;;  %v10497_v40 = vld [vmem:[#allocation31_spill] sm:$0xff] }
 0x1f2   : > { %7598 = vmatmul.mubr.msk.f32.gmra.mrb[18].mxu0 %vm272_vm0, %v10491_v63 }
 0x1f3   : > { %7600 = vmatprep.mubr.msk.f32.mxu0 %vm272_vm0, %v10492_v7 }
 0x1f6   : > { %7601 = vmatmul.mubr.msk.f32.gmra.mrb[20].mxu0 %vm272_vm0, %v10493_v19 }
 0x1f7   : > { %7603 = vmatprep.mubr.msk.f32.mxu0 %vm272_vm0, %v10494_v23  ;;  %v9499_v23 = vld [vmem:[#allocation2 + $0x182] sm:$0xff] }
 0x1fa   : > { %7604 = vmatmul.mubr.msk.f32.gmra.mrb[22].mxu0 %vm272_vm0, %v10495_v35 }
 0x1fb   : > { %7606 = vmatprep.mubr.msk.f32.mxu0 %vm272_vm0, %v10496_v36  ;;  %v9503_v36 = vld [vmem:[#allocation2 + $0x18a] sm:$0xff] }
 0x1fe   : > { %7607 = vmatmul.mubr.msk.f32.gmra.mrb[24].mxu0 %vm272_vm0, %v9273_v1 }
 0x1ff   : > { %7609 = vmatprep.mubr.msk.f32.mxu0 %vm272_vm0, %v10497_v40 }
 0x202   : > { %7610 = vmatmul.mubr.msk.f32.gmra.mrb[26].mxu0 %vm272_vm0, %v9281_v50 }
 0x203   : > { %7612 = vmatprep.mubr.msk.f32.mxu0 %vm272_vm0, %v9285_v57  ;;  %v6371_v57 = vld [vmem:[%s10378_s2 + $0x40] sm:$0xff] }
 0x206   : > { %7613 = vmatmul.mubr.msk.f32.gmra.mrb[28].mxu0 %vm272_vm0, %v9289_v5 }
 0x207   : > { %7615 = vmatprep.mubr.msk.f32.mxu0 %vm272_vm0, %v9499_v23 }
 0x20a   : > { %7616 = vmatmul.mubr.msk.f32.gmra.mrb[30].mxu0 %vm272_vm0, %v9503_v36 }
 0x20b   : > { %7620 = vmatprep.mubr.msk.f32.mxu0 %vm272_vm0, %v9046_v8  ;;  %v2930_v8 = vld [vmem:[#allocation2 + $0x198] sm:$0xff] }
 0x20e   : > { %7621 = vmatmul.mubr.msk.f32.vlgmr.msra.gmra.mrb[0].mxu0 %vm272_vm0, %v9050_v10  ;;  %v2931_v10 = vld [vmem:[#allocation2 + $0x1a0] sm:$0xff] }
 0x20f   : > { %7669 = vmatpush3.msra.mxu0 %v6338_v20  ;;  %7623 = vmatprep.mubr.msk.f32.mxu0 %vm272_vm0, %v9054_v2  ;;  %v3287_v2 = vld [vmem:[#allocation2 + $0x31] sm:$0xff] }
 0x210   : > { %7718 = vmatprep.subr.mxu0 %v6371_v57 }
 0x212   : > { %7624 = vmatmul.mubr.msk.f32.gmra.mrb[2].mxu0 %vm272_vm0, %v9058_v11  ;;  %v10498_v11 = vmov 0.0  }
 0x213   : > { %7626 = vmatprep.mubr.msk.f32.mxu0 %vm272_vm0, %v9062_v14  ;;  %335 = vst.msk [vmem:[#allocation3 + $0x28] sm:$0x3] %vm331_vm4, %v10498_v11  ;;  %332 = vst.msk [vmem:[#allocation3 + $0x10] sm:$0x3] %vm331_vm4, %v10498_v11  ;;  %v3288_v14 = vld [vmem:[#allocation2 + $0x39] sm:$0xff] }
 0x214   : > { %338 = vst.msk [vmem:[#allocation3 + $0x40] sm:$0x3] %vm331_vm4, %v10498_v11  ;;  %341 = vst.msk [vmem:[#allocation3 + $0x58] sm:$0x3] %vm331_vm4, %v10498_v11 }
 0x215   : > { %344 = vst.msk [vmem:[#allocation3 + $0x70] sm:$0x3] %vm331_vm4, %v10498_v11  ;;  %347 = vst.msk [vmem:[#allocation3 + $0x88] sm:$0x3] %vm331_vm4, %v10498_v11 }
 0x216   : > { %7627 = vmatmul.mubr.msk.f32.gmra.mrb[4].mxu0 %vm272_vm0, %v9066_v15  ;;  %350 = vst.msk [vmem:[#allocation3 + $0xa0] sm:$0x3] %vm331_vm4, %v10498_v11  ;;  %353 = vst.msk [vmem:[#allocation3 + $0xb8] sm:$0x3] %vm331_vm4, %v10498_v11  ;;  %v3289_v15 = vld [vmem:[#allocation2 + $0x49] sm:$0xff] }
 0x217   : > { %7629 = vmatprep.mubr.msk.f32.mxu0 %vm272_vm0, %v9070_v17  ;;  %356 = vst.msk [vmem:[#allocation3 + $0xd0] sm:$0x3] %vm331_vm4, %v10498_v11  ;;  %359 = vst.msk [vmem:[#allocation3 + $0xe8] sm:$0x3] %vm331_vm4, %v10498_v11  ;;  %v3290_v17 = vld [vmem:[#allocation2 + $0x51] sm:$0xff] }
 0x218   : > { %362 = vst.msk [vmem:[#allocation3 + $0x100] sm:$0x3] %vm331_vm4, %v10498_v11  ;;  %365 = vst.msk [vmem:[#allocation3 + $0x118] sm:$0x3] %vm331_vm4, %v10498_v11 }
 0x219   : > { %368 = vst.msk [vmem:[#allocation3 + $0x130] sm:$0x3] %vm331_vm4, %v10498_v11  ;;  %371 = vst.msk [vmem:[#allocation3 + $0x148] sm:$0x3] %vm331_vm4, %v10498_v11 }
 0x21a   : > { %7630 = vmatmul.mubr.msk.f32.gmra.mrb[6].mxu0 %vm272_vm0, %v9074_v18  ;;  %374 = vst.msk [vmem:[#allocation3 + $0x160] sm:$0x3] %vm331_vm4, %v10498_v11  ;;  %377 = vst.msk [vmem:[#allocation3 + $0x178] sm:$0x3] %vm331_vm4, %v10498_v11  ;;  %v3291_v18 = vld [vmem:[#allocation2 + $0x61] sm:$0xff] }
 0x21b   : > { %7632 = vmatprep.mubr.msk.f32.mxu0 %vm272_vm0, %v9078_v21  ;;  %380 = vst.msk [vmem:[#allocation3 + $0x190] sm:$0x3] %vm331_vm4, %v10498_v11  ;;  %383 = vst.msk [vmem:[#allocation3 + $0x1a8] sm:$0x3] %vm331_vm4, %v10498_v11  ;;  %v3292_v21 = vld [vmem:[#allocation2 + $0x69] sm:$0xff] }
 0x21e   : > { %7633 = vmatmul.mubr.msk.f32.gmra.mrb[8].mxu0 %vm272_vm0, %v9082_v22  ;;  %v3293_v22 = vld [vmem:[#allocation2 + $0x79] sm:$0xff] }
 0x21f   : > { %7635 = vmatprep.mubr.msk.f32.mxu0 %vm272_vm0, %v9086_v25  ;;  %v3294_v25 = vld [vmem:[#allocation2 + $0x81] sm:$0xff] }
 0x222   : > { %7636 = vmatmul.mubr.msk.f32.gmra.mrb[10].mxu0 %vm272_vm0, %v9090_v26  ;;  %v3295_v26 = vld [vmem:[#allocation2 + $0x91] sm:$0xff] }
 0x223   : > { %7638 = vmatprep.mubr.msk.f32.mxu0 %vm272_vm0, %v9094_v29  ;;  %v3296_v29 = vld [vmem:[#allocation2 + $0x99] sm:$0xff] }
 0x226   : > { %7639 = vmatmul.mubr.msk.f32.gmra.mrb[12].mxu0 %vm272_vm0, %v9098_v30  ;;  %v3297_v30 = vld [vmem:[#allocation2 + $0xa9] sm:$0xff] }
 0x227   : > { %7641 = vmatprep.mubr.msk.f32.mxu0 %vm272_vm0, %v9102_v33  ;;  %v3298_v33 = vld [vmem:[#allocation2 + $0xb1] sm:$0xff] }
 0x22a   : > { %7642 = vmatmul.mubr.msk.f32.gmra.mrb[14].mxu0 %vm272_vm0, %v9106_v34  ;;  %v3299_v34 = vld [vmem:[#allocation2 + $0xc1] sm:$0xff] }
 0x22b   : > { %7644 = vmatprep.mubr.msk.f32.mxu0 %vm272_vm0, %v9110_v37  ;;  %v3300_v37 = vld [vmem:[#allocation2 + $0xc9] sm:$0xff] }
 0x22e   : > { %7645 = vmatmul.mubr.msk.f32.gmra.mrb[16].mxu0 %vm272_vm0, %v9114_v38  ;;  %v10509_v38 = vld [vmem:[#allocation24_spill] sm:$0xff] }
 0x22f   : > { %7647 = vmatprep.mubr.msk.f32.mxu0 %vm272_vm0, %v9118_v41  ;;  %v10510_v41 = vld [vmem:[#allocation28_spill] sm:$0xff] }
 0x232   : > { %7648 = vmatmul.mubr.msk.f32.gmra.mrb[18].mxu0 %vm272_vm0, %v9122_v42  ;;  %v10511_v42 = vld [vmem:[#allocation30_spill] sm:$0xff] }
 0x233   : > { %7650 = vmatprep.mubr.msk.f32.mxu0 %vm272_vm0, %v9126_v45  ;;  %v10512_v45 = vld [vmem:[#allocation32_spill] sm:$0xff] }
 0x236   : > { %7651 = vmatmul.mubr.msk.f32.gmra.mrb[20].mxu0 %vm272_vm0, %v9130_v46  ;;  %v3704_v46 = vld [vmem:[#allocation2 + $0x19a] sm:$0xff] }
 0x237   : > { %7653 = vmatprep.mubr.msk.f32.mxu0 %vm272_vm0, %v9134_v49  ;;  %v9721_v49 = vld [vmem:[%s10380_s4 + $0x4] sm:$0xf] }
 0x238   : > { %7044 = vmatprep.mubr.msk.f32.mxu1 %vm328_vm1, %v9721_v49 }
 0x23a   : > { %7654 = vmatmul.mubr.msk.f32.gmra.mrb[22].mxu0 %vm272_vm0, %v9142_v58  ;;  %v9728_v58 = vld [vmem:[%s10379_s3] ss:$0 sm:$0xff] }
 0x23b   : > { %7656 = vmatprep.mubr.msk.f32.mxu0 %vm272_vm0, %v9148_v3 }
 0x23e   : > { %7657 = vmatmul.mubr.msk.f32.gmra.mrb[24].mxu0 %vm272_vm0, %v9152_v4 }
 0x23f   : > { %7659 = vmatprep.mubr.msk.f32.mxu0 %vm272_vm0, %v9156_v53 }
 0x242   : > { %7660 = vmatmul.mubr.msk.f32.gmra.mrb[26].mxu0 %vm272_vm0, %v9160_v54 }
 0x243   : > { %7662 = vmatprep.mubr.msk.f32.mxu0 %vm272_vm0, %v9355_v0 }
 0x246   : > { %7663 = vmatmul.mubr.msk.f32.gmra.mrb[28].mxu0 %vm272_vm0, %v9361_v6 }
 0x247   : > { %7665 = vmatprep.mubr.msk.f32.mxu0 %vm272_vm0, %v2930_v8 }
 0x24a   : > { %7666 = vmatmul.mubr.msk.f32.gmra.mrb[30].mxu0 %vm272_vm0, %v2931_v10 }
 0x24b   : > { %7670 = vmatprep.mubr.msk.f32.mxu0 %vm272_vm0, %v3287_v2 }
 0x24e   : > { %7671 = vmatmul.mubr.msk.f32.vlgmr.msra.gmra.mrb[0].mxu0 %vm272_vm0, %v3288_v14 }
 0x24f   : > { %7719 = vmatpush3.msra.mxu0 %v6371_v57  ;;  %7673 = vmatprep.mubr.msk.f32.mxu0 %vm272_vm0, %v3289_v15 }
 0x252   : > { %7674 = vmatmul.mubr.msk.f32.gmra.mrb[2].mxu0 %vm272_vm0, %v3290_v17 }
 0x253   : > { %7676 = vmatprep.mubr.msk.f32.mxu0 %vm272_vm0, %v3291_v18 }
 0x256   : > { %7677 = vmatmul.mubr.msk.f32.gmra.mrb[4].mxu0 %vm272_vm0, %v3292_v21 }
 0x257   : > { %7679 = vmatprep.mubr.msk.f32.mxu0 %vm272_vm0, %v3293_v22 }
 0x25a   : > { %7680 = vmatmul.mubr.msk.f32.gmra.mrb[6].mxu0 %vm272_vm0, %v3294_v25 }
 0x25b   : > { %7682 = vmatprep.mubr.msk.f32.mxu0 %vm272_vm0, %v3295_v26 }
 0x25e   : > { %7683 = vmatmul.mubr.msk.f32.gmra.mrb[8].mxu0 %vm272_vm0, %v3296_v29 }
 0x25f   : > { %7685 = vmatprep.mubr.msk.f32.mxu0 %vm272_vm0, %v3297_v30 }
 0x262   : > { %7686 = vmatmul.mubr.msk.f32.gmra.mrb[10].mxu0 %vm272_vm0, %v3298_v33 }
 0x263   : > { %7688 = vmatprep.mubr.msk.f32.mxu0 %vm272_vm0, %v3299_v34 }
 0x266   : > { %7689 = vmatmul.mubr.msk.f32.gmra.mrb[12].mxu0 %vm272_vm0, %v3300_v37 }
 0x267   : > { %7691 = vmatprep.mubr.msk.f32.mxu0 %vm272_vm0, %v8961_v43  ;;  %v3317_v43 = vld [vmem:[#allocation2 + $0x199] sm:$0xff] }
 0x26a   : > { %7692 = vmatmul.mubr.msk.f32.gmra.mrb[14].mxu0 %vm272_vm0, %v8969_v44  ;;  %v3318_v44 = vld [vmem:[#allocation2 + $0x1a1] sm:$0xff] }
 0x26b   : > { %7694 = vmatprep.mubr.msk.f32.mxu0 %vm272_vm0, %v8971_v47  ;;  %v10499_v47 = vld [vmem:[#allocation13_spill] sm:$0xff] }
 0x26e   : > { %7695 = vmatmul.mubr.msk.f32.gmra.mrb[16].mxu0 %vm272_vm0, %v8979_v48  ;;  %v10500_v48 = vld [vmem:[#allocation14_spill] sm:$0xff] }
 0x26f   : > { %7697 = vmatprep.mubr.msk.f32.mxu0 %vm272_vm0, %v8981_v51  ;;  %v10501_v51 = vld [vmem:[#allocation15_spill] sm:$0xff] }
 0x272   : > { %7698 = vmatmul.mubr.msk.f32.gmra.mrb[18].mxu0 %vm272_vm0, %v8989_v52  ;;  %v10502_v52 = vld [vmem:[#allocation16_spill] sm:$0xff] }
 0x273   : > { %7700 = vmatprep.mubr.msk.f32.mxu0 %vm272_vm0, %v8991_v55  ;;  %v10503_v55 = vld [vmem:[#allocation17_spill] sm:$0xff] }
 0x276   : > { %7701 = vmatmul.mubr.msk.f32.gmra.mrb[20].mxu0 %vm272_vm0, %v8999_v56  ;;  %v10504_v56 = vld [vmem:[#allocation18_spill] sm:$0xff] }
 0x277   : > { %7703 = vmatprep.mubr.msk.f32.mxu0 %vm272_vm0, %v9001_v59  ;;  %v10505_v59 = vld [vmem:[#allocation19_spill] sm:$0xff] }
 0x27a   : > { %7704 = vmatmul.mubr.msk.f32.gmra.mrb[22].mxu0 %vm272_vm0, %v9009_v60  ;;  %v10506_v60 = vld [vmem:[#allocation20_spill] sm:$0xff] }
 0x27b   : > { %7706 = vmatprep.mubr.msk.f32.mxu0 %vm272_vm0, %v9011_v61  ;;  %v10507_v61 = vld [vmem:[#allocation21_spill] sm:$0xff] }
 0x27e   : > { %7707 = vmatmul.mubr.msk.f32.gmra.mrb[24].mxu0 %vm272_vm0, %v9017_v62  ;;  %v10508_v62 = vld [vmem:[#allocation22_spill] sm:$0xff] }
 0x27f   : > { %7709 = vmatprep.mubr.msk.f32.mxu0 %vm272_vm0, %v10470_v9 }
 0x282   : > { %7710 = vmatmul.mubr.msk.f32.gmra.mrb[26].mxu0 %vm272_vm0, %v10471_v12 }
 0x283   : > { %7712 = vmatprep.mubr.msk.f32.mxu0 %vm272_vm0, %v9428_v13 }
 0x286   : > { %7713 = vmatmul.mubr.msk.f32.gmra.mrb[28].mxu0 %vm272_vm0, %v9432_v16 }
 0x287   : > { %7715 = vmatprep.mubr.msk.f32.mxu0 %vm272_vm0, %v3317_v43 }
 0x28a   : > { %7716 = vmatmul.mubr.msk.f32.gmra.mrb[30].mxu0 %vm272_vm0, %v3318_v44 }
 0x28b   : > { %7720 = vmatprep.mubr.msk.f32.mxu0 %vm272_vm0, %v10474_v24 }
 0x28e   : > { %7721 = vmatmul.mubr.msk.f32.vlgmr.msra.gmra.mrb[0].mxu0 %vm272_vm0, %v10475_v27 }
 0x28f   : > { %7723 = vmatprep.mubr.msk.f32.mxu0 %vm272_vm0, %v10476_v28 }
 0x292   : > { %7724 = vmatmul.mubr.msk.f32.gmra.mrb[2].mxu0 %vm272_vm0, %v10477_v31 }
 0x293   : > { %7726 = vmatprep.mubr.msk.f32.mxu0 %vm272_vm0, %v10478_v32 }
 0x296   : > { %7727 = vmatmul.mubr.msk.f32.gmra.mrb[4].mxu0 %vm272_vm0, %v10499_v47 }
 0x297   : > { %7729 = vmatprep.mubr.msk.f32.mxu0 %vm272_vm0, %v10500_v48 }
 0x29a   : > { %7730 = vmatmul.mubr.msk.f32.gmra.mrb[6].mxu0 %vm272_vm0, %v10501_v51 }
 0x29b   : > { %7732 = vmatprep.mubr.msk.f32.mxu0 %vm272_vm0, %v10502_v52 }
 0x29e   : > { %7733 = vmatmul.mubr.msk.f32.gmra.mrb[8].mxu0 %vm272_vm0, %v10503_v55 }
 0x29f   : > { %7735 = vmatprep.mubr.msk.f32.mxu0 %vm272_vm0, %v10504_v56 }
 0x2a2   : > { %7736 = vmatmul.mubr.msk.f32.gmra.mrb[10].mxu0 %vm272_vm0, %v10505_v59 }
 0x2a3   : > { %7738 = vmatprep.mubr.msk.f32.mxu0 %vm272_vm0, %v10506_v60 }
 0x2a6   : > { %7739 = vmatmul.mubr.msk.f32.gmra.mrb[12].mxu0 %vm272_vm0, %v10507_v61 }
 0x2a7   : > { %7741 = vmatprep.mubr.msk.f32.mxu0 %vm272_vm0, %v10508_v62 }
 0x2aa   : > { %7742 = vmatmul.mubr.msk.f32.gmra.mrb[14].mxu0 %vm272_vm0, %v10489_v39 }
 0x2ab   : > { %7744 = vmatprep.mubr.msk.f32.mxu0 %vm272_vm0, %v10509_v38 }
 0x2ae   : > { %7745 = vmatmul.mubr.msk.f32.gmra.mrb[16].mxu0 %vm272_vm0, %v10491_v63 }
 0x2af   : > { %7747 = vmatprep.mubr.msk.f32.mxu0 %vm272_vm0, %v10492_v7 }
 0x2b2   : > { %7748 = vmatmul.mubr.msk.f32.gmra.mrb[18].mxu0 %vm272_vm0, %v10493_v19 }
 0x2b3   : > { %7750 = vmatprep.mubr.msk.f32.mxu0 %vm272_vm0, %v10510_v41 }
 0x2b6   : > { %7751 = vmatmul.mubr.msk.f32.gmra.mrb[20].mxu0 %vm272_vm0, %v10495_v35 }
 0x2b7   : > { %7753 = vmatprep.mubr.msk.f32.mxu0 %vm272_vm0, %v10511_v42  ;;  %v4198_v42 = vld [vmem:[#allocation3 + $0x1] sm:$0xff] }
 0x2ba   : > { %7754 = vmatmul.mubr.msk.f32.gmra.mrb[22].mxu0 %vm272_vm0, %v9273_v1  ;;  %v3705_v1 = vld [vmem:[#allocation2 + $0x1a2] sm:$0xff] }
 0x2bb   : > { %7756 = vmatprep.mubr.msk.f32.mxu0 %vm272_vm0, %v10497_v40 }
 0x2be   : > { %7757 = vmatmul.mubr.msk.f32.gmra.mrb[24].mxu0 %vm272_vm0, %v9281_v50 }
 0x2bf   : > { %7759 = vmatprep.mubr.msk.f32.mxu0 %vm272_vm0, %v10512_v45  ;;  %v4199_v45 = vld [vmem:[#allocation3 + $0x9] sm:$0xff] }
 0x2c2   : > { %7760 = vmatmul.mubr.msk.f32.gmra.mrb[26].mxu0 %vm272_vm0, %v9289_v5 }
 0x2c3   : > { %7762 = vmatprep.mubr.msk.f32.mxu0 %vm272_vm0, %v9499_v23 }
 0x2c6   : > { %7763 = vmatmul.mubr.msk.f32.gmra.mrb[28].mxu0 %vm272_vm0, %v9503_v36 }
 0x2c7   : > { %7765 = vmatprep.mubr.msk.f32.mxu0 %vm272_vm0, %v3704_v46 }
 0x2ca   : > { %7766 = vmatmul.mubr.msk.f32.gmra.mrb[30].mxu0 %vm272_vm0, %v3705_v1 }
 0x361   : > { %v7722_v3 = vpop.f32.mrb[0].mxu0 }
 0x362   : > { %v4069_v4 = vadd.f32 %v7722_v3, %v9728_v58  ;;  %v3870_v53 = vpop.f32.mrb[1].mxu0 }
 0x363   : > { %v4068_v54 = vadd.f32 %v9728_v58, %v3870_v53 }
 0x364   : > { %v4101_v50 = vmax.f32 %v4069_v4, 0.0 }
 0x365   : > { %v4100_v57 = vmax.f32 %v4068_v54, 0.0  ;;  %v7725_v5 = vpop.f32.mrb[2].mxu0 }
 0x366   : > { %4134 = vst.msk [vmem:[#allocation3 + $0x21] sm:$0xff] %vm328_vm1, %v4101_v50  ;;  %v4071_v0 = vadd.f32 %v7725_v5, %v9728_v58  ;;  %v3880_v6 = vpop.f32.mrb[3].mxu0  ;;  %v7771_v5 = vpack.c.bf16 %v4199_v45, %v4198_v42 }
 0x367   : > { %4133 = vst.msk [vmem:[#allocation3 + $0x19] sm:$0xff] %vm328_vm1, %v4100_v57  ;;  %v4070_v9 = vadd.f32 %v9728_v58, %v3880_v6 }
 0x368   : > { %v4103_v12 = vmax.f32 %v4071_v0, 0.0 }
 0x369   : > { %v4102_v13 = vmax.f32 %v4070_v9, 0.0  ;;  %v7728_v16 = vpop.f32.mrb[4].mxu0 }
 0x36a   : > { %4136 = vst.msk [vmem:[#allocation3 + $0x39] sm:$0xff] %vm328_vm1, %v4103_v12  ;;  %v4073_v20 = vadd.f32 %v7728_v16, %v9728_v58  ;;  %v3890_v24 = vpop.f32.mrb[5].mxu0 }
 0x36b   : > { %4135 = vst.msk [vmem:[#allocation3 + $0x31] sm:$0xff] %vm328_vm1, %v4102_v13  ;;  %v4072_v27 = vadd.f32 %v9728_v58, %v3890_v24 }
 0x36c   : > { %v4105_v28 = vmax.f32 %v4073_v20, 0.0 }
 0x36d   : > { %v4104_v31 = vmax.f32 %v4072_v27, 0.0  ;;  %v7731_v32 = vpop.f32.mrb[6].mxu0 }
 0x36e   : > { %4138 = vst.msk [vmem:[#allocation3 + $0x51] sm:$0xff] %vm328_vm1, %v4105_v28  ;;  %v4075_v35 = vadd.f32 %v7731_v32, %v9728_v58  ;;  %v3900_v36 = vpop.f32.mrb[7].mxu0 }
 0x36f   : > { %4137 = vst.msk [vmem:[#allocation3 + $0x49] sm:$0xff] %vm328_vm1, %v4104_v31  ;;  %v4074_v39 = vadd.f32 %v9728_v58, %v3900_v36 }
 0x370   : > { %v4107_v40 = vmax.f32 %v4075_v35, 0.0 }
 0x371   : > { %v4106_v63 = vmax.f32 %v4074_v39, 0.0  ;;  %v7734_v7 = vpop.f32.mrb[8].mxu0  ;;  %v4200_v39 = vld [vmem:[#allocation3 + $0x19] sm:$0xff] }
 0x372   : > { %4140 = vst.msk [vmem:[#allocation3 + $0x69] sm:$0xff] %vm328_vm1, %v4107_v40  ;;  %v4077_v19 = vadd.f32 %v7734_v7, %v9728_v58  ;;  %v3910_v23 = vpop.f32.mrb[9].mxu0  ;;  %v4201_v40 = vld [vmem:[#allocation3 + $0x21] sm:$0xff] }
 0x373   : > { %4139 = vst.msk [vmem:[#allocation3 + $0x61] sm:$0xff] %vm328_vm1, %v4106_v63  ;;  %v4076_v8 = vadd.f32 %v9728_v58, %v3910_v23 }
 0x374   : > { %v4109_v10 = vmax.f32 %v4077_v19, 0.0 }
 0x375   : > { %v4108_v2 = vmax.f32 %v4076_v8, 0.0  ;;  %v7737_v11 = vpop.f32.mrb[10].mxu0 }
 0x376   : > { %4142 = vst.msk [vmem:[#allocation3 + $0x81] sm:$0xff] %vm328_vm1, %v4109_v10  ;;  %v4079_v14 = vadd.f32 %v7737_v11, %v9728_v58  ;;  %v3920_v15 = vpop.f32.mrb[11].mxu0 }
 0x377   : > { %4141 = vst.msk [vmem:[#allocation3 + $0x79] sm:$0xff] %vm328_vm1, %v4108_v2  ;;  %v4078_v17 = vadd.f32 %v9728_v58, %v3920_v15  ;;  %v9798_v2 = vpack.c.bf16 %v4201_v40, %v4200_v39 }
 0x378   : > { %v4111_v18 = vmax.f32 %v4079_v14, 0.0 }
 0x379   : > { %v4110_v21 = vmax.f32 %v4078_v17, 0.0  ;;  %v7740_v22 = vpop.f32.mrb[12].mxu0 }
 0x37a   : > { %4144 = vst.msk [vmem:[#allocation3 + $0x99] sm:$0xff] %vm328_vm1, %v4111_v18  ;;  %v4081_v25 = vadd.f32 %v7740_v22, %v9728_v58  ;;  %v3930_v26 = vpop.f32.mrb[13].mxu0 }
 0x37b   : > { %4143 = vst.msk [vmem:[#allocation3 + $0x91] sm:$0xff] %vm328_vm1, %v4110_v21  ;;  %v4080_v29 = vadd.f32 %v9728_v58, %v3930_v26 }
 0x37c   : > { %v4113_v30 = vmax.f32 %v4081_v25, 0.0 }
 0x37d   : > { %v4112_v33 = vmax.f32 %v4080_v29, 0.0  ;;  %v7743_v34 = vpop.f32.mrb[14].mxu0  ;;  %v4202_v29 = vld [vmem:[#allocation3 + $0x31] sm:$0xff] }
 0x37e   : > { %4146 = vst.msk [vmem:[#allocation3 + $0xb1] sm:$0xff] %vm328_vm1, %v4113_v30  ;;  %v4083_v37 = vadd.f32 %v7743_v34, %v9728_v58  ;;  %v3940_v43 = vpop.f32.mrb[15].mxu0  ;;  %v4203_v30 = vld [vmem:[#allocation3 + $0x39] sm:$0xff] }
 0x37f   : > { %4145 = vst.msk [vmem:[#allocation3 + $0xa9] sm:$0xff] %vm328_vm1, %v4112_v33  ;;  %v4082_v44 = vadd.f32 %v9728_v58, %v3940_v43 }
 0x380   : > { %v4115_v47 = vmax.f32 %v4083_v37, 0.0 }
 0x381   : > { %v4114_v48 = vmax.f32 %v4082_v44, 0.0  ;;  %v7746_v51 = vpop.f32.mrb[16].mxu0 }
 0x382   : > { %4148 = vst.msk [vmem:[#allocation3 + $0xc9] sm:$0xff] %vm328_vm1, %v4115_v47  ;;  %v4085_v52 = vadd.f32 %v7746_v51, %v9728_v58  ;;  %v3950_v55 = vpop.f32.mrb[17].mxu0 }
 0x383   : > { %4147 = vst.msk [vmem:[#allocation3 + $0xc1] sm:$0xff] %vm328_vm1, %v4114_v48  ;;  %v4084_v56 = vadd.f32 %v9728_v58, %v3950_v55  ;;  %v9816_v48 = vpack.c.bf16 %v4203_v30, %v4202_v29 }
 0x384   : > { %v4117_v59 = vmax.f32 %v4085_v52, 0.0 }
 0x385   : > { %v4116_v60 = vmax.f32 %v4084_v56, 0.0  ;;  %v7749_v61 = vpop.f32.mrb[18].mxu0  ;;  %v4213_v39 = vld [vmem:[#allocation3 + $0xb1] sm:$0xff] }
 0x386   : > { %4150 = vst.msk [vmem:[#allocation3 + $0xe1] sm:$0xff] %vm328_vm1, %v4117_v59  ;;  %v4087_v62 = vadd.f32 %v7749_v61, %v9728_v58  ;;  %v3960_v38 = vpop.f32.mrb[19].mxu0 }
 0x387   : > { %4149 = vst.msk [vmem:[#allocation3 + $0xd9] sm:$0xff] %vm328_vm1, %v4116_v60  ;;  %v4086_v41 = vadd.f32 %v9728_v58, %v3960_v38  ;;  %v4204_v38 = vld [vmem:[#allocation3 + $0x49] sm:$0xff] }
 0x388   : > { %v4119_v46 = vmax.f32 %v4087_v62, 0.0 }
 0x389   : > { %v4118_v1 = vmax.f32 %v4086_v41, 0.0  ;;  %v7752_v3 = vpop.f32.mrb[20].mxu0  ;;  %v4215_v4 = vld [vmem:[#allocation3 + $0xc9] sm:$0xff]  ;;  %v4205_v41 = vld [vmem:[#allocation3 + $0x51] sm:$0xff] }
 0x38a   : > { %4152 = vst.msk [vmem:[#allocation3 + $0xf9] sm:$0xff] %vm328_vm1, %v4119_v46  ;;  %v4089_v53 = vadd.f32 %v7752_v3, %v9728_v58  ;;  %v3970_v54 = vpop.f32.mrb[21].mxu0  ;;  %v4214_v50 = vld [vmem:[#allocation3 + $0xc1] sm:$0xff]  ;;  %v9832_v46 = vpack.c.bf16 %v4205_v41, %v4204_v38  ;;  %v4207_v3 = vld [vmem:[#allocation3 + $0x69] sm:$0xff] }
 0x38b   : > { %4151 = vst.msk [vmem:[#allocation3 + $0xf1] sm:$0xff] %vm328_vm1, %v4118_v1  ;;  %v4088_v0 = vadd.f32 %v9728_v58, %v3970_v54  ;;  %v9778_v6 = vpack.c.bf16 %v4215_v4, %v4214_v50  ;;  %v4181_v40 = vld [vmem:[#allocation3 + $0xc0] sm:$0xff] }
 0x38c   : > { %v4121_v9 = vmax.f32 %v4089_v53, 0.0 }
 0x38d   : > { %v4120_v12 = vmax.f32 %v4088_v0, 0.0  ;;  %v7755_v13 = vpop.f32.mrb[22].mxu0  ;;  %7770 = vmatprep.subr.msk.bf16.mxu1 %vm9772_vm5, %v9778_v6  ;;  %v4217_v16 = vld [vmem:[#allocation3 + $0xe1] sm:$0xff] }
 0x38e   : > { %4154 = vst.msk [vmem:[#allocation3 + $0x111] sm:$0xff] %vm328_vm1, %v4121_v9  ;;  %v4091_v20 = vadd.f32 %v7755_v13, %v9728_v58  ;;  %v3980_v24 = vpop.f32.mrb[23].mxu0  ;;  %7773 = vmatpush3.bf16.xpose.msk.msra.mxu1 %vm9772_vm5, %v7771_v5  ;;  %v4216_v27 = vld [vmem:[#allocation3 + $0xd9] sm:$0xff]  ;;  %v4209_v0 = vld [vmem:[#allocation3 + $0x81] sm:$0xff] }
 0x38f   : > { %4153 = vst.msk [vmem:[#allocation3 + $0x109] sm:$0xff] %vm328_vm1, %v4120_v12  ;;  %v4090_v28 = vadd.f32 %v9728_v58, %v3980_v24  ;;  %v9789_v31 = vpack.c.bf16 %v4217_v16, %v4216_v27  ;;  %v4208_v5 = vld [vmem:[#allocation3 + $0x79] sm:$0xff] }
 0x390   : > { %v4123_v32 = vmax.f32 %v4091_v20, 0.0  ;;  %v9852_v13 = vpack.c.bf16 %v4209_v0, %v4208_v5  ;;  %v4210_v20 = vld [vmem:[#allocation3 + $0x91] sm:$0xff]  ;;  %v4211_v24 = vld [vmem:[#allocation3 + $0x99] sm:$0xff] }
 0x391   : > { %v4122_v35 = vmax.f32 %v4090_v28, 0.0  ;;  %v7758_v36 = vpop.f32.mrb[24].mxu0  ;;  %7776 = vmatprep.subr.msk.bf16.mxu1 %vm9772_vm5, %v9789_v31  ;;  %v4219_v23 = vld [vmem:[#allocation3 + $0xf9] sm:$0xff] }
 0x392   : > { %4156 = vst.msk [vmem:[#allocation3 + $0x129] sm:$0xff] %vm328_vm1, %v4123_v32  ;;  %v4093_v63 = vadd.f32 %v7758_v36, %v9728_v58  ;;  %v3990_v7 = vpop.f32.mrb[25].mxu0  ;;  %v4218_v19 = vld [vmem:[#allocation3 + $0xf1] sm:$0xff]  ;;  %v9862_v32 = vpack.c.bf16 %v4211_v24, %v4210_v20  ;;  %v4212_v36 = vld [vmem:[#allocation3 + $0xa9] sm:$0xff] }
 0x393   : > { %4155 = vst.msk [vmem:[#allocation3 + $0x121] sm:$0xff] %vm328_vm1, %v4122_v35  ;;  %v4092_v8 = vadd.f32 %v9728_v58, %v3990_v7  ;;  %v9800_v15 = vpack.c.bf16 %v4219_v23, %v4218_v19  ;;  %v9872_v7 = vpack.c.bf16 %v4213_v39, %v4212_v36  ;;  %v4165_v23 = vld [vmem:[#allocation3] sm:$0xff]  ;;  %v4179_v36 = vld [vmem:[#allocation3 + $0xa8] sm:$0xff]  ;;  %v4180_v39 = vld [vmem:[#allocation3 + $0xb0] sm:$0xff] }
 0x394   : > { %v4125_v10 = vmax.f32 %v4093_v63, 0.0  ;;  %v4182_v63 = vld [vmem:[#allocation3 + $0xc8] sm:$0xff] }
 0x395   : > { %v4124_v11 = vmax.f32 %v4092_v8, 0.0  ;;  %v7761_v14 = vpop.f32.mrb[26].mxu0  ;;  %v4221_v43 = vld [vmem:[#allocation3 + $0x111] sm:$0xff]  ;;  %v9874_v19 = vpack.c.bf16 %v4182_v63, %v4181_v40  ;;  %v4166_v8 = vld [vmem:[#allocation3 + $0x8] sm:$0xff] }
 0x396   : > { %4158 = vst.msk [vmem:[#allocation3 + $0x141] sm:$0xff] %vm328_vm1, %v4125_v10  ;;  %v4095_v17 = vadd.f32 %v7761_v14, %v9728_v58  ;;  %v4000_v18 = vpop.f32.mrb[27].mxu0  ;;  %7779 = vmatpush3.bf16.xpose.msk.msra.mxu1 %vm9772_vm5, %v9798_v2  ;;  %v4220_v37 = vld [vmem:[#allocation3 + $0x109] sm:$0xff]  ;;  %v7819_v10 = vpack.c.bf16 %v4166_v8, %v4165_v23  ;;  %v4184_v14 = vld [vmem:[#allocation3 + $0xe0] sm:$0xff]  ;;  %v9958_v23 = vpack.c.bf16 %v4180_v39, %v4179_v36 }
 0x397   : > { %4157 = vst.msk [vmem:[#allocation3 + $0x139] sm:$0xff] %vm328_vm1, %v4124_v11  ;;  %v4094_v21 = vadd.f32 %v9728_v58, %v4000_v18  ;;  %7782 = vmatprep.subr.msk.bf16.mxu1 %vm9772_vm5, %v9800_v15  ;;  %v9818_v55 = vpack.c.bf16 %v4221_v43, %v4220_v37  ;;  %v4183_v11 = vld [vmem:[#allocation3 + $0xd8] sm:$0xff]  ;;  %v4188_v37 = vld [vmem:[#allocation3 + $0x110] sm:$0xff]  ;;  %v4588_v40 = vld [vmem:[#allocation3 + $0xc2] sm:$0xff] }
 0x398   : > { %v4127_v22 = vmax.f32 %v4095_v17, 0.0  ;;  %v9885_v17 = vld [vmem:[%s10380_s4] sm:$0xf]  ;;  %v9889_v18 = vpack.c.bf16 %v4184_v14, %v4183_v11 }
 0x399   : > { %v4126_v25 = vmax.f32 %v4094_v21, 0.0  ;;  %v7764_v26 = vpop.f32.mrb[28].mxu0  ;;  %v4223_v45 = vld [vmem:[#allocation3 + $0x129] sm:$0xff]  ;;  %v4167_v21 = vld [vmem:[#allocation3 + $0x18] sm:$0xff] }
 0x39a   : > { %4160 = vst.msk [vmem:[#allocation3 + $0x159] sm:$0xff] %vm328_vm1, %v4127_v22  ;;  %v4097_v33 = vadd.f32 %v7764_v26, %v9728_v58  ;;  %v4010_v34 = vpop.f32.mrb[29].mxu0  ;;  %v4222_v42 = vld [vmem:[#allocation3 + $0x121] sm:$0xff]  ;;  %v4186_v26 = vld [vmem:[#allocation3 + $0xf8] sm:$0xff]  ;;  %v4589_v63 = vld [vmem:[#allocation3 + $0xca] sm:$0xff] }
 0x39b   : > { %4159 = vst.msk [vmem:[#allocation3 + $0x151] sm:$0xff] %vm328_vm1, %v4126_v25  ;;  %v4096_v44 = vadd.f32 %v9728_v58, %v4010_v34  ;;  %v9834_v1 = vpack.c.bf16 %v4223_v45, %v4222_v42  ;;  %v4168_v22 = vld [vmem:[#allocation3 + $0x20] sm:$0xff]  ;;  %v4185_v25 = vld [vmem:[#allocation3 + $0xf0] sm:$0xff]  ;;  %v4187_v34 = vld [vmem:[#allocation3 + $0x108] sm:$0xff]  ;;  %v9960_v8 = vpack.c.bf16 %v4589_v63, %v4588_v40 }
 0x39c   : > { %v4129_v47 = vmax.f32 %v4097_v33, 0.0  ;;  %v9898_v29 = vpack.c.bf16 %v4168_v22, %v4167_v21  ;;  %v9900_v30 = vpack.c.bf16 %v4186_v26, %v4185_v25  ;;  %v4170_v33 = vld [vmem:[#allocation3 + $0x38] sm:$0xff]  ;;  %v4573_v11 = vld [vmem:[#allocation3 + $0xa] sm:$0xff]  ;;  %v4591_v22 = vld [vmem:[#allocation3 + $0xe2] sm:$0xff] }
 0x39d   : > { %v4128_v51 = vmax.f32 %v4096_v44, 0.0  ;;  %v7767_v52 = vpop.f32.mrb[30].mxu0  ;;  %v4225_v53 = vld [vmem:[#allocation3 + $0x141] sm:$0xff]  ;;  %v9910_v44 = vpack.c.bf16 %v4188_v37, %v4187_v34  ;;  %v6472_v25 = vld [vmem:[%s10380_s4 + $0x8] sm:$0xf] }
 0x39e   : > { %4162 = vst.msk [vmem:[#allocation3 + $0x171] sm:$0xff] %vm328_vm1, %v4129_v47  ;;  %v4099_v56 = vadd.f32 %v7767_v52, %v9728_v58  ;;  %v4020_v59 = vpop.f32.mrb[31].mxu0  ;;  %7785 = vmatpush3.bf16.xpose.msk.msra.mxu1 %vm9772_vm5, %v9816_v48  ;;  %v4224_v4 = vld [vmem:[#allocation3 + $0x139] sm:$0xff]  ;;  %v4171_v47 = vld [vmem:[#allocation3 + $0x48] sm:$0xff] }
 0x39f   : > { %4161 = vst.msk [vmem:[#allocation3 + $0x169] sm:$0xff] %vm328_vm1, %v4128_v51  ;;  %v4098_v60 = vadd.f32 %v9728_v58, %v4020_v59  ;;  %7788 = vmatprep.subr.msk.bf16.mxu1 %vm9772_vm5, %v9818_v55  ;;  %v4206_v58 = vld [vmem:[#allocation3 + $0x61] sm:$0xff]  ;;  %v9844_v50 = vpack.c.bf16 %v4225_v53, %v4224_v4  ;;  %v4172_v51 = vld [vmem:[#allocation3 + $0x50] sm:$0xff]  ;;  %v4191_v38 = vld [vmem:[#allocation3 + $0x138] sm:$0xff] }
 0x3a0   : > { %v4131_v61 = vmax.f32 %v4099_v56, 0.0  ;;  %v9842_v54 = vpack.c.bf16 %v4207_v3, %v4206_v58  ;;  %v4189_v52 = vld [vmem:[#allocation3 + $0x120] sm:$0xff]  ;;  %v4190_v56 = vld [vmem:[#allocation3 + $0x128] sm:$0xff]  ;;  %v9918_v59 = vpack.c.bf16 %v4172_v51, %v4171_v47  ;;  %v4175_v58 = vld [vmem:[#allocation3 + $0x78] sm:$0xff] }
 0x3a1   : > { %v4130_v62 = vmax.f32 %v4098_v60, 0.0  ;;  %v4227_v12 = vld [vmem:[#allocation3 + $0x159] sm:$0xff]  ;;  %v9920_v60 = vpack.c.bf16 %v4190_v56, %v4189_v52  ;;  %v4594_v56 = vld [vmem:[#allocation3 + $0x10a] sm:$0xff]  ;;  %v4599_v36 = vld [vmem:[#allocation3 + $0x142] sm:$0xff] }
 0x3a2   : > { %4164 = vst.msk [vmem:[#allocation3 + $0x189] sm:$0xff] %vm328_vm1, %v4131_v61  ;;  %v4226_v9 = vld [vmem:[#allocation3 + $0x151] sm:$0xff]  ;;  %v4173_v61 = vld [vmem:[#allocation3 + $0x60] sm:$0xff] }
 0x3a3   : > { %4163 = vst.msk [vmem:[#allocation3 + $0x181] sm:$0xff] %vm328_vm1, %v4130_v62  ;;  %v9854_v16 = vpack.c.bf16 %v4227_v12, %v4226_v9  ;;  %v4174_v62 = vld [vmem:[#allocation3 + $0x68] sm:$0xff]  ;;  %v4192_v41 = vld [vmem:[#allocation3 + $0x140] sm:$0xff]  ;;  %v4193_v4 = vld [vmem:[#allocation3 + $0x150] sm:$0xff] }
 0x3a4   : > { %v9928_v42 = vpack.c.bf16 %v4174_v62, %v4173_v61  ;;  %v9930_v45 = vpack.c.bf16 %v4192_v41, %v4191_v38  ;;  %v4176_v3 = vld [vmem:[#allocation3 + $0x80] sm:$0xff]  ;;  %v4194_v53 = vld [vmem:[#allocation3 + $0x158] sm:$0xff]  ;;  %v4177_v9 = vld [vmem:[#allocation3 + $0x90] sm:$0xff] }
 0x3a5   : > { %v4229_v28 = vld [vmem:[#allocation3 + $0x171] sm:$0xff]  ;;  %v9938_v5 = vpack.c.bf16 %v4176_v3, %v4175_v58  ;;  %v9940_v0 = vpack.c.bf16 %v4194_v53, %v4193_v4  ;;  %v4590_v21 = vld [vmem:[#allocation3 + $0xda] sm:$0xff]  ;;  %v4596_v3 = vld [vmem:[#allocation3 + $0x122] sm:$0xff] }
 0x3a6   : > { %7791 = vmatpush3.bf16.xpose.msk.msra.mxu1 %vm9772_vm5, %v9832_v46  ;;  %v4228_v27 = vld [vmem:[#allocation3 + $0x169] sm:$0xff]  ;;  %v4178_v12 = vld [vmem:[#allocation3 + $0x98] sm:$0xff]  ;;  %v9973_v26 = vpack.c.bf16 %v4591_v22, %v4590_v21 }
 0x3a7   : > { %7794 = vmatprep.subr.msk.bf16.mxu1 %vm9772_vm5, %v9834_v1  ;;  %v9864_v35 = vpack.c.bf16 %v4229_v28, %v4228_v27  ;;  %v4195_v20 = vld [vmem:[#allocation3 + $0x168] sm:$0xff]  ;;  %v4196_v24 = vld [vmem:[#allocation3 + $0x170] sm:$0xff]  ;;  %v9948_v27 = vpack.c.bf16 %v4178_v12, %v4177_v9  ;;  %v4593_v37 = vld [vmem:[#allocation3 + $0xfa] sm:$0xff] }
 0x3a8   : > { %v9950_v28 = vpack.c.bf16 %v4196_v24, %v4195_v20  ;;  %v4592_v34 = vld [vmem:[#allocation3 + $0xf2] sm:$0xff]  ;;  %v4577_v52 = vld [vmem:[#allocation3 + $0x3a] sm:$0xff]  ;;  %v4578_v41 = vld [vmem:[#allocation3 + $0x4a] sm:$0xff] }
 0x3a9   : > { %v9983_v51 = vpack.c.bf16 %v4593_v37, %v4592_v34  ;;  %v4595_v61 = vld [vmem:[#allocation3 + $0x112] sm:$0xff]  ;;  %v4597_v4 = vld [vmem:[#allocation3 + $0x12a] sm:$0xff]  ;;  %v4580_v12 = vld [vmem:[#allocation3 + $0x62] sm:$0xff] }
 0x3aa   : > { %v9993_v38 = vpack.c.bf16 %v4595_v61, %v4594_v56  ;;  %v4579_v58 = vld [vmem:[#allocation3 + $0x52] sm:$0xff]  ;;  %v10003_v9 = vpack.c.bf16 %v4597_v4, %v4596_v3  ;;  %v4581_v20 = vld [vmem:[#allocation3 + $0x6a] sm:$0xff]  ;;  %v4598_v24 = vld [vmem:[#allocation3 + $0x13a] sm:$0xff] }
 0x3ab   : > { %v10001_v53 = vpack.c.bf16 %v4579_v58, %v4578_v41  ;;  %v10011_v39 = vpack.c.bf16 %v4581_v20, %v4580_v12  ;;  %v10013_v40 = vpack.c.bf16 %v4599_v36, %v4598_v24  ;;  %v4582_v63 = vld [vmem:[#allocation3 + $0x7a] sm:$0xff]  ;;  %v4602_v34 = vld [vmem:[#allocation3 + $0x16a] sm:$0xff]  ;;  %v4603_v37 = vld [vmem:[#allocation3 + $0x172] sm:$0xff] }
 0x3ac   : > { %v4586_v56 = vld [vmem:[#allocation3 + $0xaa] sm:$0xff]  ;;  %v4587_v61 = vld [vmem:[#allocation3 + $0xb2] sm:$0xff]  ;;  %v6506_v58 = vld [vmem:[%s10380_s4 + $0xc] sm:$0xf] }
 0x3ad   : > { %v10041_v41 = vpack.c.bf16 %v4587_v61, %v4586_v56  ;;  %v6540_v4 = vld [vmem:[%s10380_s4 + $0x10] sm:$0xf]  ;;  %v6574_v20 = vld [vmem:[%s10380_s4 + $0x14] sm:$0xf]  ;;  %v6608_v36 = vld [vmem:[%s10380_s4 + $0x18] sm:$0xf] }
 0x3ae   : > { %7797 = vmatpush3.bf16.xpose.msk.msra.mxu1 %vm9772_vm5, %v9842_v54 }
 0x3af   : > { %7800 = vmatprep.subr.msk.bf16.mxu1 %vm9772_vm5, %v9844_v50 }
 0x3b6   : > { %7803 = vmatpush3.bf16.xpose.msk.msra.mxu1 %vm9772_vm5, %v9852_v13 }
 0x3b7   : > { %7806 = vmatprep.subr.msk.bf16.mxu1 %vm9772_vm5, %v9854_v16 }
 0x3be   : > { %7809 = vmatpush3.bf16.xpose.msk.msra.mxu1 %vm9772_vm5, %v9862_v32 }
 0x3bf   : > { %7812 = vmatprep.subr.msk.bf16.mxu1 %vm9772_vm5, %v9864_v35 }
 0x3c6   : > { %7815 = vmatpush3.bf16.xpose.msk.msra.mxu1 %vm9772_vm5, %v9872_v7 }
 0x3c7   : > { %7818 = vmatprep.subr.msk.bf16.mxu1 %vm9772_vm5, %v9874_v19 }
 0x3cd   : > { %7045 = vmatmul.mubr.msk.f32.vlgmr.msra.gmra.mrb[0].mxu1 %vm328_vm1, %v9721_v49  ;;  %v4169_v49 = vld [vmem:[#allocation3 + $0x30] sm:$0xff] }
 0x3ce   : > { %7821 = vmatpush3.bf16.xpose.msk.msra.mxu1 %vm9772_vm5, %v7819_v10  ;;  %7078 = vmatprep.mubr.msk.f32.mxu1 %vm328_vm1, %v9885_v17  ;;  %v9908_v43 = vpack.c.bf16 %v4170_v33, %v4169_v49  ;;  %v4572_v10 = vld [vmem:[#allocation3 + $0x2] sm:$0xff]  ;;  %v4574_v49 = vld [vmem:[#allocation3 + $0x1a] sm:$0xff] }
 0x3cf   : > { %7824 = vmatprep.subr.msk.bf16.mxu1 %vm9772_vm5, %v9889_v18  ;;  %v7867_v14 = vpack.c.bf16 %v4573_v11, %v4572_v10  ;;  %v4575_v33 = vld [vmem:[#allocation3 + $0x22] sm:$0xff]  ;;  %v4600_v11 = vld [vmem:[#allocation3 + $0x152] sm:$0xff] }
 0x3d0   : > { %v9981_v47 = vpack.c.bf16 %v4575_v33, %v4574_v49  ;;  %v4583_v10 = vld [vmem:[#allocation3 + $0x82] sm:$0xff]  ;;  %v4584_v49 = vld [vmem:[#allocation3 + $0x92] sm:$0xff]  ;;  %v4585_v33 = vld [vmem:[#allocation3 + $0x9a] sm:$0xff] }
 0x3d1   : > { %v10021_v21 = vpack.c.bf16 %v4583_v10, %v4582_v63 }
 0x3d6   : > { %7827 = vmatpush3.bf16.xpose.msk.msra.mxu1 %vm9772_vm5, %v9898_v29 }
 0x3d7   : > { %7830 = vmatprep.subr.msk.bf16.mxu1 %vm9772_vm5, %v9900_v30 }
 0x3de   : > { %7833 = vmatpush3.bf16.xpose.msk.msra.mxu1 %vm9772_vm5, %v9908_v43 }
 0x3df   : > { %7836 = vmatprep.subr.msk.bf16.mxu1 %vm9772_vm5, %v9910_v44 }
 0x3e6   : > { %7839 = vmatpush3.bf16.xpose.msk.msra.mxu1 %vm9772_vm5, %v9918_v59 }
 0x3e7   : > { %7842 = vmatprep.subr.msk.bf16.mxu1 %vm9772_vm5, %v9920_v60 }
 0x3ee   : > { %7845 = vmatpush3.bf16.xpose.msk.msra.mxu1 %vm9772_vm5, %v9928_v42 }
 0x3ef   : > { %7848 = vmatprep.subr.msk.bf16.mxu1 %vm9772_vm5, %v9930_v45 }
 0x3f6   : > { %7851 = vmatpush3.bf16.xpose.msk.msra.mxu1 %vm9772_vm5, %v9938_v5 }
 0x3f7   : > { %7854 = vmatprep.subr.msk.bf16.mxu1 %vm9772_vm5, %v9940_v0 }
 0x3fe   : > { %7857 = vmatpush3.bf16.xpose.msk.msra.mxu1 %vm9772_vm5, %v9948_v27 }
 0x3ff   : > { %7860 = vmatprep.subr.msk.bf16.mxu1 %vm9772_vm5, %v9950_v28 }
 0x406   : > { %7863 = vmatpush3.bf16.xpose.msk.msra.mxu1 %vm9772_vm5, %v9958_v23 }
 0x407   : > { %7866 = vmatprep.subr.msk.bf16.mxu1 %vm9772_vm5, %v9960_v8 }
 0x40d   : > { %7079 = vmatmul.mubr.msk.f32.vlgmr.msra.gmra.mrb[0].mxu1 %vm328_vm1, %v9885_v17  ;;  %v4576_v17 = vld [vmem:[#allocation3 + $0x32] sm:$0xff] }
 0x40e   : > { %7869 = vmatpush3.bf16.xpose.msk.msra.mxu1 %vm9772_vm5, %v7867_v14  ;;  %7112 = vmatprep.mubr.msk.f32.mxu1 %vm328_vm1, %v6472_v25  ;;  %v9991_v62 = vpack.c.bf16 %v4577_v52, %v4576_v17  ;;  %v4601_v14 = vld [vmem:[#allocation3 + $0x15a] sm:$0xff]  ;;  %v10031_v17 = vpack.c.bf16 %v4585_v33, %v4584_v49  ;;  %v10033_v52 = vpack.c.bf16 %v4603_v37, %v4602_v34 }
 0x40f   : > { %7872 = vmatprep.subr.msk.bf16.mxu1 %vm9772_vm5, %v9973_v26  ;;  %v10023_v22 = vpack.c.bf16 %v4601_v14, %v4600_v11 }
 0x416   : > { %7875 = vmatpush3.bf16.xpose.msk.msra.mxu1 %vm9772_vm5, %v9981_v47 }
 0x417   : > { %7878 = vmatprep.subr.msk.bf16.mxu1 %vm9772_vm5, %v9983_v51 }
 0x41e   : > { %7881 = vmatpush3.bf16.xpose.msk.msra.mxu1 %vm9772_vm5, %v9991_v62 }
 0x41f   : > { %7884 = vmatprep.subr.msk.bf16.mxu1 %vm9772_vm5, %v9993_v38 }
 0x426   : > { %7887 = vmatpush3.bf16.xpose.msk.msra.mxu1 %vm9772_vm5, %v10001_v53 }
 0x427   : > { %7890 = vmatprep.subr.msk.bf16.mxu1 %vm9772_vm5, %v10003_v9 }
 0x42e   : > { %7893 = vmatpush3.bf16.xpose.msk.msra.mxu1 %vm9772_vm5, %v10011_v39 }
 0x42f   : > { %7896 = vmatprep.subr.msk.bf16.mxu1 %vm9772_vm5, %v10013_v40 }
 0x436   : > { %7899 = vmatpush3.bf16.xpose.msk.msra.mxu1 %vm9772_vm5, %v10021_v21 }
 0x437   : > { %7902 = vmatprep.subr.msk.bf16.mxu1 %vm9772_vm5, %v10023_v22 }
 0x43e   : > { %7905 = vmatpush3.bf16.xpose.msk.msra.mxu1 %vm9772_vm5, %v10031_v17 }
 0x43f   : > { %7908 = vmatprep.subr.msk.bf16.mxu1 %vm9772_vm5, %v10033_v52 }
 0x446   : > { %7911 = vmatpush3.bf16.xpose.msk.msra.mxu1 %vm9772_vm5, %v10041_v41 }
 0x447   : > { %7914 = vmatprep.subr.msk.bf16.mxu1 %vm9772_vm5, %v9889_v18 }
 0x44d   : > { %7113 = vmatmul.mubr.msk.f32.vlgmr.msra.gmra.mrb[0].mxu1 %vm328_vm1, %v6472_v25  ;;  %v4809_v25 = vld [vmem:[#allocation3 + $0x188] sm:$0xff] }
 0x44e   : > { %7917 = vmatpush3.bf16.xpose.msk.msra.mxu1 %vm9772_vm5, %v9898_v29  ;;  %7146 = vmatprep.mubr.msk.f32.mxu1 %vm328_vm1, %v6506_v58  ;;  %v4808_v29 = vld [vmem:[#allocation3 + $0x180] sm:$0xff] }
 0x44f   : > { %7920 = vmatprep.subr.msk.bf16.mxu1 %vm9772_vm5, %v9900_v30  ;;  %v10090_v3 = vpack.c.bf16 %v4809_v25, %v4808_v29 }
 0x456   : > { %7923 = vmatpush3.bf16.xpose.msk.msra.mxu1 %vm9772_vm5, %v9908_v43 }
 0x457   : > { %7926 = vmatprep.subr.msk.bf16.mxu1 %vm9772_vm5, %v9910_v44 }
 0x45e   : > { %7929 = vmatpush3.bf16.xpose.msk.msra.mxu1 %vm9772_vm5, %v9918_v59 }
 0x45f   : > { %7932 = vmatprep.subr.msk.bf16.mxu1 %vm9772_vm5, %v9920_v60 }
 0x466   : > { %7935 = vmatpush3.bf16.xpose.msk.msra.mxu1 %vm9772_vm5, %v9928_v42 }
 0x467   : > { %7938 = vmatprep.subr.msk.bf16.mxu1 %vm9772_vm5, %v9930_v45 }
 0x46e   : > { %7941 = vmatpush3.bf16.xpose.msk.msra.mxu1 %vm9772_vm5, %v9938_v5 }
 0x46f   : > { %7944 = vmatprep.subr.msk.bf16.mxu1 %vm9772_vm5, %v9940_v0 }
 0x476   : > { %7947 = vmatpush3.bf16.xpose.msk.msra.mxu1 %vm9772_vm5, %v9948_v27 }
 0x477   : > { %7950 = vmatprep.subr.msk.bf16.mxu1 %vm9772_vm5, %v9950_v28 }
 0x47e   : > { %7953 = vmatpush3.bf16.xpose.msk.msra.mxu1 %vm9772_vm5, %v9958_v23 }
 0x47f   : > { %7956 = vmatprep.subr.msk.bf16.mxu1 %vm9772_vm5, %v10090_v3 }
 0x486   : > { %7959 = vmatpush3.bf16.xpose.msk.msra.mxu1 %vm9772_vm5, %v9874_v19 }
 0x487   : > { %7962 = vmatprep.subr.msk.bf16.mxu1 %vm9772_vm5, %v9789_v31  ;;  %v5014_v31 = vld [vmem:[#allocation3 + $0x181] sm:$0xff] }
 0x48d   : > { %7147 = vmatmul.mubr.msk.f32.vlgmr.msra.gmra.mrb[0].mxu1 %vm328_vm1, %v6506_v58 }
 0x48e   : > { %7965 = vmatpush3.bf16.xpose.msk.msra.mxu1 %vm9772_vm5, %v9798_v2  ;;  %7180 = vmatprep.mubr.msk.f32.mxu1 %vm328_vm1, %v6540_v4  ;;  %v5015_v2 = vld [vmem:[#allocation3 + $0x189] sm:$0xff] }
 0x48f   : > { %7968 = vmatprep.subr.msk.bf16.mxu1 %vm9772_vm5, %v9800_v15  ;;  %v10145_v12 = vpack.c.bf16 %v5015_v2, %v5014_v31 }
 0x496   : > { %7971 = vmatpush3.bf16.xpose.msk.msra.mxu1 %vm9772_vm5, %v9816_v48 }
 0x497   : > { %7974 = vmatprep.subr.msk.bf16.mxu1 %vm9772_vm5, %v9818_v55 }
 0x49e   : > { %7977 = vmatpush3.bf16.xpose.msk.msra.mxu1 %vm9772_vm5, %v9832_v46 }
 0x49f   : > { %7980 = vmatprep.subr.msk.bf16.mxu1 %vm9772_vm5, %v9834_v1 }
 0x4a6   : > { %7983 = vmatpush3.bf16.xpose.msk.msra.mxu1 %vm9772_vm5, %v9842_v54 }
 0x4a7   : > { %7986 = vmatprep.subr.msk.bf16.mxu1 %vm9772_vm5, %v9844_v50 }
 0x4ae   : > { %7989 = vmatpush3.bf16.xpose.msk.msra.mxu1 %vm9772_vm5, %v9852_v13 }
 0x4af   : > { %7992 = vmatprep.subr.msk.bf16.mxu1 %vm9772_vm5, %v9854_v16 }
 0x4b6   : > { %7995 = vmatpush3.bf16.xpose.msk.msra.mxu1 %vm9772_vm5, %v9862_v32 }
 0x4b7   : > { %7998 = vmatprep.subr.msk.bf16.mxu1 %vm9772_vm5, %v9864_v35 }
 0x4be   : > { %8001 = vmatpush3.bf16.xpose.msk.msra.mxu1 %vm9772_vm5, %v9872_v7 }
 0x4bf   : > { %8004 = vmatprep.subr.msk.bf16.mxu1 %vm9772_vm5, %v10145_v12 }
 0x4c6   : > { %8007 = vmatpush3.bf16.xpose.msk.msra.mxu1 %vm9772_vm5, %v9778_v6  ;;  %v5220_v6 = vld [vmem:[#allocation3 + $0x182] sm:$0xff] }
 0x4c7   : > { %8010 = vmatprep.subr.msk.bf16.mxu1 %vm9772_vm5, %v9973_v26 }
 0x4cd   : > { %7181 = vmatmul.mubr.msk.f32.vlgmr.msra.gmra.mrb[0].mxu1 %vm328_vm1, %v6540_v4 }
 0x4ce   : > { %8013 = vmatpush3.bf16.xpose.msk.msra.mxu1 %vm9772_vm5, %v9981_v47  ;;  %7214 = vmatprep.mubr.msk.f32.mxu1 %vm328_vm1, %v6574_v20  ;;  %v5221_v47 = vld [vmem:[#allocation3 + $0x18a] sm:$0xff] }
 0x4cf   : > { %8016 = vmatprep.subr.msk.bf16.mxu1 %vm9772_vm5, %v9983_v51  ;;  %v10200_v24 = vpack.c.bf16 %v5221_v47, %v5220_v6 }
 0x4d6   : > { %8019 = vmatpush3.bf16.xpose.msk.msra.mxu1 %vm9772_vm5, %v9991_v62 }
 0x4d7   : > { %8022 = vmatprep.subr.msk.bf16.mxu1 %vm9772_vm5, %v9993_v38 }
 0x4de   : > { %8025 = vmatpush3.bf16.xpose.msk.msra.mxu1 %vm9772_vm5, %v10001_v53 }
 0x4df   : > { %8028 = vmatprep.subr.msk.bf16.mxu1 %vm9772_vm5, %v10003_v9 }
 0x4e6   : > { %8031 = vmatpush3.bf16.xpose.msk.msra.mxu1 %vm9772_vm5, %v10011_v39 }
 0x4e7   : > { %8034 = vmatprep.subr.msk.bf16.mxu1 %vm9772_vm5, %v10013_v40 }
 0x4ee   : > { %8037 = vmatpush3.bf16.xpose.msk.msra.mxu1 %vm9772_vm5, %v10021_v21 }
 0x4ef   : > { %8040 = vmatprep.subr.msk.bf16.mxu1 %vm9772_vm5, %v10023_v22 }
 0x4f6   : > { %8043 = vmatpush3.bf16.xpose.msk.msra.mxu1 %vm9772_vm5, %v10031_v17 }
 0x4f7   : > { %8046 = vmatprep.subr.msk.bf16.mxu1 %vm9772_vm5, %v10033_v52 }
 0x4fe   : > { %8049 = vmatpush3.bf16.xpose.msk.msra.mxu1 %vm9772_vm5, %v10041_v41 }
 0x4ff   : > { %8052 = vmatprep.subr.msk.bf16.mxu1 %vm9772_vm5, %v10200_v24 }
 0x506   : > { %8055 = vmatpush3.bf16.xpose.msk.msra.mxu1 %vm9772_vm5, %v9960_v8 }
 0x507   : > { %8058 = vmatprep.subr.msk.bf16.mxu1 %vm9772_vm5, %v9900_v30  ;;  %v5427_v30 = vld [vmem:[#allocation3 + $0x198] sm:$0xff] }
 0x50d   : > { %7215 = vmatmul.mubr.msk.f32.vlgmr.msra.gmra.mrb[0].mxu1 %vm328_vm1, %v6574_v20 }
 0x50e   : > { %8061 = vmatpush3.bf16.xpose.msk.msra.mxu1 %vm9772_vm5, %v9908_v43  ;;  %7248 = vmatprep.mubr.msk.f32.mxu1 %vm328_vm1, %v6608_v36  ;;  %v5428_v43 = vld [vmem:[#allocation3 + $0x1a0] sm:$0xff] }
 0x50f   : > { %8064 = vmatprep.subr.msk.bf16.mxu1 %vm9772_vm5, %v9910_v44  ;;  %v8098_v44 = vpack.c.bf16 %v5428_v43, %v5427_v30 }
 0x516   : > { %8067 = vmatpush3.bf16.xpose.msk.msra.mxu1 %vm9772_vm5, %v9918_v59  ;;  %v6642_v59 = vld [vmem:[%s10380_s4 + $0x1c] sm:$0xf] }
 0x517   : > { %8070 = vmatprep.subr.msk.bf16.mxu1 %vm9772_vm5, %v9920_v60 }
 0x51e   : > { %8073 = vmatpush3.bf16.xpose.msk.msra.mxu1 %vm9772_vm5, %v9928_v42 }
 0x51f   : > { %8076 = vmatprep.subr.msk.bf16.mxu1 %vm9772_vm5, %v9930_v45 }
 0x526   : > { %8079 = vmatpush3.bf16.xpose.msk.msra.mxu1 %vm9772_vm5, %v9938_v5 }
 0x527   : > { %8082 = vmatprep.subr.msk.bf16.mxu1 %vm9772_vm5, %v9940_v0 }
 0x52e   : > { %8085 = vmatpush3.bf16.xpose.msk.msra.mxu1 %vm9772_vm5, %v9948_v27 }
 0x52f   : > { %8088 = vmatprep.subr.msk.bf16.mxu1 %vm9772_vm5, %v9950_v28 }
 0x536   : > { %8091 = vmatpush3.bf16.xpose.msk.msra.mxu1 %vm9772_vm5, %v9958_v23 }
 0x537   : > { %8094 = vmatprep.subr.msk.bf16.mxu1 %vm9772_vm5, %v10090_v3 }
 0x53e   : > { %8097 = vmatpush3.bf16.xpose.msk.msra.mxu1 %vm9772_vm5, %v9874_v19  ;;  %v6015_v19 = vld [vmem:[%s10381_s5] sm:$0xf] }
 0x53f   : > { %8100 = vmatprep.subr.msk.bf16.mxu1 %vm9772_vm5, %v8098_v44 }
 0x546   : > { %8103 = vmatpush3.bf16.xpose.msk.msra.mxu1 %vm9772_vm5, %v9889_v18  ;;  %v5840_v18 = vld [vmem:[#allocation3 + $0x1a2] sm:$0xff] }
 0x547   : > { %8106 = vmatprep.subr.msk.bf16.mxu1 %vm9772_vm5, %v9800_v15  ;;  %v8494_v15 = vmov 0  }
 0x548   : > { %8483 = vset.pattern.permute.xlu0 %v8494_v15 }
 0x549   : > { %6018 = vperm.xlu0 %8483, %v6015_v19  }
 0x54d   : > { %7249 = vmatmul.mubr.msk.f32.vlgmr.msra.gmra.mrb[0].mxu1 %vm328_vm1, %v6608_v36 }
 0x54e   : > { %8109 = vmatpush3.bf16.xpose.msk.msra.mxu1 %vm9772_vm5, %v9816_v48  ;;  %7282 = vmatprep.mubr.msk.f32.mxu1 %vm328_vm1, %v6642_v59  ;;  %v5633_v48 = vld [vmem:[#allocation3 + $0x199] sm:$0xff] }
 0x54f   : > { %8112 = vmatprep.subr.msk.bf16.mxu1 %vm9772_vm5, %v9818_v55  ;;  %v5634_v55 = vld [vmem:[#allocation3 + $0x1a1] sm:$0xff] }
 0x556   : > { %8115 = vmatpush3.bf16.xpose.msk.msra.mxu1 %vm9772_vm5, %v9832_v46  ;;  %v5615_v46 = vld [vmem:[#allocation3 + $0xc1] sm:$0xff] }
 0x557   : > { %8118 = vmatprep.subr.msk.bf16.mxu1 %vm9772_vm5, %v9834_v1  ;;  %v5616_v1 = vld [vmem:[#allocation3 + $0xc9] sm:$0xff] }
 0x55e   : > { %8121 = vmatpush3.bf16.xpose.msk.msra.mxu1 %vm9772_vm5, %v9842_v54  ;;  %v8146_v54 = vpack.c.bf16 %v5634_v55, %v5633_v48 }
 0x55f   : > { %8124 = vmatprep.subr.msk.bf16.mxu1 %vm9772_vm5, %v9844_v50  ;;  %v8143_v50 = vpack.c.bf16 %v5616_v1, %v5615_v46 }
 0x566   : > { %8127 = vmatpush3.bf16.xpose.msk.msra.mxu1 %vm9772_vm5, %v9852_v13  ;;  %v5617_v13 = vld [vmem:[#allocation3 + $0xd9] sm:$0xff] }
 0x567   : > { %8130 = vmatprep.subr.msk.bf16.mxu1 %vm9772_vm5, %v9854_v16  ;;  %v5618_v16 = vld [vmem:[#allocation3 + $0xe1] sm:$0xff] }
 0x56e   : > { %8133 = vmatpush3.bf16.xpose.msk.msra.mxu1 %vm9772_vm5, %v9862_v32  ;;  %v8149_v32 = vpack.c.bf16 %v5618_v16, %v5617_v13 }
 0x56f   : > { %8136 = vmatprep.subr.msk.bf16.mxu1 %vm9772_vm5, %v9864_v35  ;;  %v6676_v35 = vld [vmem:[%s10380_s4 + $0x20] sm:$0xf] }
 0x576   : > { %8139 = vmatpush3.bf16.xpose.msk.msra.mxu1 %vm9772_vm5, %v9872_v7  ;;  %v5839_v7 = vld [vmem:[#allocation3 + $0x19a] sm:$0xff] }
 0x577   : > { %8142 = vmatprep.subr.msk.bf16.mxu1 %vm9772_vm5, %v10145_v12  ;;  %v8194_v60 = vpack.c.bf16 %v5840_v18, %v5839_v7 }
 0x57e   : > { %8145 = vmatpush3.bf16.xpose.msk.msra.mxu1 %vm9772_vm5, %v8143_v50 }
 0x57f   : > { %8148 = vmatprep.subr.msk.bf16.mxu1 %vm9772_vm5, %v8146_v54 }
 0x586   : > { %8151 = vmatpush3.bf16.xpose.msk.msra.mxu1 %vm9772_vm5, %v8149_v32 }
 0x587   : > { %8154 = vmatprep.subr.msk.bf16.mxu1 %vm9772_vm5, %v9983_v51 }
 0x58d   : > { %7283 = vmatmul.mubr.msk.f32.vlgmr.msra.gmra.mrb[0].mxu1 %vm328_vm1, %v6642_v59 }
 0x58e   : > { %8157 = vmatpush3.bf16.xpose.msk.msra.mxu1 %vm9772_vm5, %v9991_v62  ;;  %7316 = vmatprep.mubr.msk.f32.mxu1 %vm328_vm1, %v6676_v35 }
 0x58f   : > { %8160 = vmatprep.subr.msk.bf16.mxu1 %vm9772_vm5, %v9993_v38 }
 0x596   : > { %8163 = vmatpush3.bf16.xpose.msk.msra.mxu1 %vm9772_vm5, %v10001_v53 }
 0x597   : > { %8166 = vmatprep.subr.msk.bf16.mxu1 %vm9772_vm5, %v10003_v9 }
 0x59e   : > { %8169 = vmatpush3.bf16.xpose.msk.msra.mxu1 %vm9772_vm5, %v10011_v39 }
 0x59f   : > { %8172 = vmatprep.subr.msk.bf16.mxu1 %vm9772_vm5, %v10013_v40 }
 0x5a6   : > { %8175 = vmatpush3.bf16.xpose.msk.msra.mxu1 %vm9772_vm5, %v10021_v21 }
 0x5a7   : > { %8178 = vmatprep.subr.msk.bf16.mxu1 %vm9772_vm5, %v10023_v22 }
 0x5ae   : > { %8181 = vmatpush3.bf16.xpose.msk.msra.mxu1 %vm9772_vm5, %v10031_v17 }
 0x5af   : > { %8184 = vmatprep.subr.msk.bf16.mxu1 %vm9772_vm5, %v10033_v52 }
 0x5b6   : > { %8187 = vmatpush3.bf16.xpose.msk.msra.mxu1 %vm9772_vm5, %v10041_v41 }
 0x5b7   : > { %8190 = vmatprep.subr.msk.bf16.mxu1 %vm9772_vm5, %v10200_v24 }
 0x5be   : > { %8193 = vmatpush3.bf16.xpose.msk.msra.mxu1 %vm9772_vm5, %v9960_v8 }
 0x5bf   : > { %8196 = vmatprep.subr.msk.bf16.mxu1 %vm9772_vm5, %v8194_v60 }
 0x5c6   : > { %8199 = vmatpush3.bf16.xpose.msk.msra.mxu1 %vm9772_vm5, %v9973_v26 }
 0x5c8   : > { %v6019_v42 = vpop.permute.xlu0 %6018 }
 0x5cd   : > { %7317 = vmatmul.mubr.msk.f32.vlgmr.msra.gmra.mrb[0].mxu1 %vm328_vm1, %v6676_v35 }
 0x6a0   : > { %v6008_v45 = vpop.f32.mrb[0].mxu1 }
 0x6a1   : > { %v6021_v5 = vadd.f32 %v6019_v42, %v6008_v45  ;;  %v6010_v0 = vpop.f32.mrb[1].mxu1 }
 0x6a2   : > { %v6022_v27 = vadd.f32 %v6019_v42, %v6010_v0 }
 0x6a3   : > { %v6023_v28 = vmax.f32 %v6021_v5, 0.0 }
 0x6a4   : > { %v6024_v23 = vmax.f32 %v6022_v27, 0.0 }
 0x6a6   : > { %v6027_v8 = vcombine.low %v6023_v28, %v6024_v23 }
 0x6a8   : > { %6029 = vst [vmem:[%s271_s7] sm:$0xff] %v6027_v8 }
 0x6a9 PF: > { %s16_s21 = sadd.s32 1, %s8490_s21  }
 0x6aa   : > { %p13_p4 = scmp.ge.s32.totalorder %s16_s21, 4  }
 0x6ac   :  { %15 = sbr.rel (!%p13_p4) target bundleno = 1 (0x1), region = 97 }

</bundles_post_ra>
